<compile_context>
chip_gen: v7x
topology: tpu7x:2x2x1
jax: 0.10.0
libtpu: 0.0.40
codegen_flags: <defaults>
</compile_context>

<pallas_src>
import functools
import math

import jax
import jax.numpy as jnp
from jax.experimental import pallas as pl
from jax.experimental.pallas import tpu as pltpu


def _round_up(a, b):
    return (a + b - 1) // b * b


# --------------------- linear (+ fused LN / residual) -----------------------

def _linear_kernel(*refs, has_ln, has_res, eps):
    i = 0
    x_ref = refs[i]; i += 1
    if has_ln:
        g_ref, bln_ref = refs[i], refs[i + 1]; i += 2
    w_ref, b_ref = refs[i], refs[i + 1]; i += 2
    if has_res:
        res_ref = refs[i]; i += 1
    o_ref = refs[i]

    x = x_ref[...].astype(jnp.float32)
    if has_ln:
        mu = jnp.mean(x, axis=-1, keepdims=True)
        xc = x - mu
        var = jnp.mean(xc * xc, axis=-1, keepdims=True)
        x = xc * jax.lax.rsqrt(var + eps) * g_ref[...] + bln_ref[...]
    y = jnp.dot(x.astype(jnp.bfloat16), w_ref[...],
                preferred_element_type=jnp.float32)
    y = y + b_ref[...]
    if has_res:
        y = y + res_ref[...].astype(jnp.float32)
    o_ref[...] = y.astype(o_ref.dtype)


def linear(x, w, b, *, ln=None, residual=None, out_dtype=jnp.float32,
           tm=512, eps=1e-12):
    """y = [LN](x) @ w + b [+ residual] over the last dim.  w: (K, N) (bf16 ok)."""
    orig = x.shape
    K = orig[-1]
    N = w.shape[-1]
    M = math.prod(orig[:-1])
    x2 = x.reshape(M, K)
    TM = min(tm, _round_up(M, 8))
    Mp = _round_up(M, TM)
    if Mp != M:
        x2 = jnp.pad(x2, ((0, Mp - M), (0, 0)))

    inputs = [x2]
    in_specs = [pl.BlockSpec((TM, K), lambda i: (i, 0))]
    if ln is not None:
        g, bl = ln
        inputs += [g.reshape(1, K).astype(jnp.float32),
                   bl.reshape(1, K).astype(jnp.float32)]
        in_specs += [pl.BlockSpec((1, K), lambda i: (0, 0)),
                     pl.BlockSpec((1, K), lambda i: (0, 0))]
    inputs += [w.astype(jnp.bfloat16), b.reshape(1, N).astype(jnp.float32)]
    in_specs += [pl.BlockSpec((K, N), lambda i: (0, 0)),
                 pl.BlockSpec((1, N), lambda i: (0, 0))]
    if residual is not None:
        r2 = residual.reshape(M, N)
        if Mp != M:
            r2 = jnp.pad(r2, ((0, Mp - M), (0, 0)))
        inputs.append(r2)
        in_specs.append(pl.BlockSpec((TM, N), lambda i: (i, 0)))

    out = pl.pallas_call(
        functools.partial(_linear_kernel, has_ln=ln is not None,
                          has_res=residual is not None, eps=eps),
        grid=(Mp // TM,),
        in_specs=in_specs,
        out_specs=pl.BlockSpec((TM, N), lambda i: (i, 0)),
        out_shape=jax.ShapeDtypeStruct((Mp, N), out_dtype),
        compiler_params=pltpu.CompilerParams(
            dimension_semantics=("parallel",)),
    )(*inputs)
    return out[:M].reshape(orig[:-1] + (N,))


# --------- 3-tap "same" Conv1d, single K=3*Cin matmul (+ LN/ReLU/res/post) ----------

def _conv3_kernel(*refs, has_ln, has_res, has_post, relu, eps):
    i = 0
    x_ref = refs[i]; i += 1
    if has_ln:
        g_ref, bln_ref = refs[i], refs[i + 1]; i += 2
    w_ref, b_ref = refs[i], refs[i + 1]; i += 2
    if has_res:
        res_ref = refs[i]; i += 1
    if has_post:
        g2_ref, bln2_ref, w2_ref, b2_ref = refs[i:i + 4]; i += 4
    o_ref = refs[i]; i += 1
    if has_post:
        o2_ref = refs[i]; i += 1

    x = x_ref[0].astype(jnp.float32)                         # (T, Cin)
    if has_ln:
        mu = jnp.mean(x, axis=-1, keepdims=True)
        xc = x - mu
        var = jnp.mean(xc * xc, axis=-1, keepdims=True)
        x = xc * jax.lax.rsqrt(var + eps) * g_ref[...] + bln_ref[...]
    t = x.shape[0]
    zrow = jnp.zeros((1, x.shape[1]), jnp.float32)
    xm1 = jnp.concatenate([zrow, x[:t - 1, :]], axis=0)      # x[t-1] (zero at t=0)
    xp1 = jnp.concatenate([x[1:, :], zrow], axis=0)          # x[t+1] (zero at t=T-1)
    lhs = jnp.concatenate([xm1, x, xp1], axis=-1).astype(jnp.bfloat16)   # (T, 3*Cin)
    y = jnp.dot(lhs, w_ref[...], preferred_element_type=jnp.float32) + b_ref[...]
    if relu:
        y = jnp.maximum(y, 0.0)
    if has_res:
        y = y + res_ref[0].astype(jnp.float32)
    o_ref[0] = y.astype(o_ref.dtype)
    if has_post:
        mu2 = jnp.mean(y, axis=-1, keepdims=True)
        yc = y - mu2
        var2 = jnp.mean(yc * yc, axis=-1, keepdims=True)
        yn = yc * jax.lax.rsqrt(var2 + eps) * g2_ref[...] + bln2_ref[...]
        z = jnp.dot(yn.astype(jnp.bfloat16), w2_ref[...],
                    preferred_element_type=jnp.float32) + b2_ref[...]
        o2_ref[0] = z.astype(o2_ref.dtype)


def conv1d_k3(x, w3, b, *, ln=None, residual=None, relu=False, post=None,
              out_dtype=jnp.float32, post_dtype=jnp.bfloat16, eps=1e-12):
    """Channels-last Conv1d(k=3, padding=1) via one K=3*Cin MXU matmul.
    x: (B, T, Cin) unpadded; w3: (3, Cin, Cout); b: (Cout,).
    post = (gamma, beta, W_post, b_post): fused LayerNorm + matmul on the conv output,
    emitted as a second output (B, T, Npost)."""
    B, T, Cin = x.shape
    Cout = w3.shape[-1]
    w = w3.reshape(3 * Cin, Cout).astype(jnp.bfloat16)

    inputs = [x]
    in_specs = [pl.BlockSpec((1, T, Cin), lambda bi: (bi, 0, 0))]
    if ln is not None:
        g, bl = ln
        inputs += [g.reshape(1, Cin).astype(jnp.float32),
                   bl.reshape(1, Cin).astype(jnp.float32)]
        in_specs += [pl.BlockSpec((1, Cin), lambda bi: (0, 0)),
                     pl.BlockSpec((1, Cin), lambda bi: (0, 0))]
    inputs += [w, b.reshape(1, Cout).astype(jnp.float32)]
    in_specs += [pl.BlockSpec((3 * Cin, Cout), lambda bi: (0, 0)),
                 pl.BlockSpec((1, Cout), lambda bi: (0, 0))]
    if residual is not None:
        inputs.append(residual)
        in_specs.append(pl.BlockSpec((1, T, Cout), lambda bi: (bi, 0, 0)))
    if post is not None:
        g2, bl2, w2, b2 = post
        Npost = w2.shape[-1]
        inputs += [g2.reshape(1, Cout).astype(jnp.float32),
                   bl2.reshape(1, Cout).astype(jnp.float32),
                   w2.astype(jnp.bfloat16),
                   b2.reshape(1, Npost).astype(jnp.float32)]
        in_specs += [pl.BlockSpec((1, Cout), lambda bi: (0, 0)),
                     pl.BlockSpec((1, Cout), lambda bi: (0, 0)),
                     pl.BlockSpec((Cout, Npost), lambda bi: (0, 0)),
                     pl.BlockSpec((1, Npost), lambda bi: (0, 0))]
        out_shape = (jax.ShapeDtypeStruct((B, T, Cout), out_dtype),
                     jax.ShapeDtypeStruct((B, T, Npost), post_dtype))
        out_specs = (pl.BlockSpec((1, T, Cout), lambda bi: (bi, 0, 0)),
                     pl.BlockSpec((1, T, Npost), lambda bi: (bi, 0, 0)))
    else:
        out_shape = jax.ShapeDtypeStruct((B, T, Cout), out_dtype)
        out_specs = pl.BlockSpec((1, T, Cout), lambda bi: (bi, 0, 0))

    return pl.pallas_call(
        functools.partial(_conv3_kernel, has_ln=ln is not None,
                          has_res=residual is not None,
                          has_post=post is not None, relu=relu, eps=eps),
        grid=(B,),
        in_specs=in_specs,
        out_specs=out_specs,
        out_shape=out_shape,
        compiler_params=pltpu.CompilerParams(
            dimension_semantics=("parallel",)),
    )(*inputs)


# -------- relative-position self-attention (fused out-proj + residual) --------

def _rel_attn_kernel(lens_ref, qkv_ref, bd_ref, xres_ref, bu_ref, wo_ref, bo_ref,
                     o_ref, *, heads, dk, scale):
    b = pl.program_id(0)
    length = lens_ref[b]
    T = qkv_ref.shape[1]
    D = heads * dk
    # key mask from phone_lengths (scalar prefetch) -- no mask tensor DMA
    kmask = jax.lax.broadcasted_iota(jnp.int32, (1, T), 1) < length

    qkv = qkv_ref[0]                                      # (T, 3D) bf16
    bu = bu_ref[...]                                      # (1, D)  f32
    # start accumulation with out-proj bias + residual (fused linear_out)
    y = bo_ref[...] + xres_ref[0].astype(jnp.float32)     # (T, D)
    for h in range(heads):                                # static loop, H small
        qh = qkv[:, h * dk:(h + 1) * dk].astype(jnp.float32)
        kh = qkv[:, D + h * dk:D + (h + 1) * dk]          # (T, dk) bf16
        vh = qkv[:, 2 * D + h * dk:2 * D + (h + 1) * dk]
        qu = (qh + bu[:, h * dk:(h + 1) * dk]).astype(jnp.bfloat16)
        ac = jax.lax.dot_general(qu, kh, (((1,), (1,)), ((), ())),
                                 preferred_element_type=jnp.float32)   # (T, T)
        scores = (ac + bd_ref[0, h].astype(jnp.float32)) * scale
        scores = jnp.where(kmask, scores, -1e30)
        mx = jnp.max(scores, axis=-1, keepdims=True)
        e = jnp.exp(scores - mx)
        s = jnp.sum(e, axis=-1, keepdims=True)
        attn = jnp.where(kmask, e * pl.reciprocal(s, approx=True), 0.0)
        ctx = jnp.dot(attn.astype(jnp.bfloat16), vh,
                      preferred_element_type=jnp.float32)               # (T, dk)
        # per-head slice of the output projection: y += ctx_h @ wo[h*dk:(h+1)*dk, :]
        y = y + jnp.dot(ctx.astype(jnp.bfloat16), wo_ref[h * dk:(h + 1) * dk, :],
                        preferred_element_type=jnp.float32)
    o_ref[0] = y.astype(o_ref.dtype)


def rel_attention(qkv, bd, x_res, pos_bias_u, wo, bo, lengths, *, heads):
    """qkv: (B, T, 3D) bf16; bd: (B, H, T, T) bf16 (pre-shifted, glue);
    x_res: (B, T, D) f32 residual; pos_bias_u: (H, dk); wo: (D, D); bo: (D,);
    lengths: (B,) int32.  Returns x_res + (attention context @ wo + bo): (B, T, D) f32."""
    B, T, threeD = qkv.shape
    D = threeD // 3
    dk = D // heads
    scale = 1.0 / math.sqrt(dk)
    grid_spec = pltpu.PrefetchScalarGridSpec(
        num_scalar_prefetch=1,
        grid=(B,),
        in_specs=[
            pl.BlockSpec((1, T, threeD), lambda b, lens: (b, 0, 0)),
            pl.BlockSpec((1, heads, T, T), lambda b, lens: (b, 0, 0, 0)),
            pl.BlockSpec((1, T, D), lambda b, lens: (b, 0, 0)),
            pl.BlockSpec((1, D), lambda b, lens: (0, 0)),
            pl.BlockSpec((D, D), lambda b, lens: (0, 0)),
            pl.BlockSpec((1, D), lambda b, lens: (0, 0)),
        ],
        out_specs=pl.BlockSpec((1, T, D), lambda b, lens: (b, 0, 0)),
    )
    # TODO(synk): query-row tiling (grid=(B, T//TQ)) for long T on v7x (VMEM / 2nd TC).
    return pl.pallas_call(
        functools.partial(_rel_attn_kernel, heads=heads, dk=dk, scale=scale),
        grid_spec=grid_spec,
        out_shape=jax.ShapeDtypeStruct((B, T, D), jnp.float32),
        compiler_params=pltpu.CompilerParams(
            dimension_semantics=("parallel",)),
    )(lengths, qkv.astype(jnp.bfloat16), bd.astype(jnp.bfloat16), x_res,
      pos_bias_u.reshape(1, D).astype(jnp.float32),
      wo.astype(jnp.bfloat16), bo.reshape(1, D).astype(jnp.float32))


# ------------------------------ JAX glue ops --------------------------------

def rel_positional_encoding(T, d):
    """espnet RelPositionalEncoding table, returns (2T-1, d)."""
    pos = jnp.arange(T, dtype=jnp.float32)[:, None]
    div = jnp.exp(jnp.arange(0, d, 2, dtype=jnp.float32) * -(math.log(10000.0) / d))

    def interleave(a, b):
        return jnp.stack([a, b], axis=-1).reshape(T, d)

    pe_pos = interleave(jnp.sin(pos * div), jnp.cos(pos * div))
    pe_neg = interleave(jnp.sin(-pos * div), jnp.cos(-pos * div))
    pe_pos = jnp.flip(pe_pos, axis=0)
    pe_neg = pe_neg[1:]
    return jnp.concatenate([pe_pos, pe_neg], axis=0)


def rel_shift(x):
    """espnet rel_shift: (B, H, T, 2T-1) -> (B, H, T, T), out[..,i,j] = x[..,i, j-i+T-1]."""
    B, H, T, W = x.shape                       # W == 2*T - 1
    x = jnp.pad(x, ((0, 0), (0, 0), (0, 0), (1, 0)))
    x = x.reshape(B, H, W + 1, T)
    x = x[:, :, 1:, :].reshape(B, H, T, W)
    return x[..., :T]


# ------------------------------- parameters ---------------------------------

def init_params(key, vocabs, D, H, U, num_blocks):
    keys = jax.random.split(key, 64 + 16 * num_blocks)
    it = iter(keys)

    def nrm(shape, scale):
        return scale * jax.random.normal(next(it), shape, dtype=jnp.float32)

    bf = jnp.bfloat16
    dk = D // H
    p = {
        "emb_phone": nrm((vocabs, 256), 256 ** -0.5),
        "emb_pitch": nrm((129, 128), 128 ** -0.5),
        "emb_slur": nrm((2, 64), 64 ** -0.5),
        "emb_dur_w": nrm((64,), 1.0),                    # torch Linear(1, 64)
        "emb_dur_b": nrm((64,), 0.1),
        "pre_w": nrm((512, 2 * D), 512 ** -0.5).astype(bf),   # pre_net | pre_dur_net fused
        "pre_b": nrm((2 * D,), 0.1),
        "wp_all": nrm((D, num_blocks * D), D ** -0.5).astype(bf),  # linear_pos of all blocks
        "proj_w": nrm((D, D), D ** -0.5).astype(bf),
        "proj_b": nrm((D,), 0.1),
        "proj_pitch_w": nrm((128, D), 128 ** -0.5).astype(bf),
        "proj_pitch_b": nrm((D,), 0.1),
        "after_norm_g": jnp.ones((D,), jnp.float32),
        "after_norm_b": jnp.zeros((D,), jnp.float32),
    }
    blocks = []
    for _ in range(num_blocks):
        blocks.append({
            "norm_mha_g": jnp.ones((D,), jnp.float32),
            "norm_mha_b": jnp.zeros((D,), jnp.float32),
            "w_qkv": nrm((D, 3 * D), D ** -0.5).astype(bf),   # q | k | v fused
            "b_qkv": nrm((3 * D,), 0.05),
            "wo": nrm((D, D), D ** -0.5).astype(bf),
            "bo": nrm((D,), 0.05),
            "pos_bias_u": nrm((H, dk), 0.05),
            "pos_bias_v": nrm((H, dk), 0.05),
            "norm_ff_g": jnp.ones((D,), jnp.float32),
            "norm_ff_b": jnp.zeros((D,), jnp.float32),
            "ff_w1": nrm((3, D, U), (3 * D) ** -0.5).astype(bf),
            "ff_b1": nrm((U,), 0.05),
            "ff_w2": nrm((3, U, D), (3 * U) ** -0.5).astype(bf),
            "ff_b2": nrm((D,), 0.05),
        })
    p["blocks"] = blocks
    return p


# --------------------------------- forward ----------------------------------

def text_encoder_forward(p, phone, phone_lengths, midi_id, dur, slur, *, D, H):
    B, T = phone.shape
    dk = D // H
    nb = len(p["blocks"])
    lens32 = phone_lengths.astype(jnp.int32)

    # embeddings (gathers are glue)
    phone_end = p["emb_phone"][phone] * math.sqrt(256)          # (B, T, 256)
    pitch_end = p["emb_pitch"][midi_id] * math.sqrt(128)        # (B, T, 128)
    slur_end = p["emb_slur"][slur] * math.sqrt(64)              # (B, T, 64)
    dur_f = dur.astype(jnp.float32)[..., None]                  # (B, T, 1)
    # Linear(1, 64) == broadcast multiply-add (kept in glue; no matmul needed)
    dur_end = dur_f * p["emb_dur_w"][None, None, :] + p["emb_dur_b"][None, None, :]

    xcat = jnp.concatenate([phone_end, pitch_end, slur_end, dur_end], axis=-1)  # (B,T,512)

    # fused pre_net | pre_dur_net projection (lane-dense N = 2D)
    pre = linear(xcat, p["pre_w"], p["pre_b"], out_dtype=jnp.float32)   # (B, T, 2D)
    x = pre[..., :D] * math.sqrt(D)          # RelPositionalEncoding xscale
    dur_input_btc = pre[..., D:]

    # make_non_pad_mask(phone_lengths).unsqueeze(1) -- returned to caller; attention
    # builds its own mask in-kernel from phone_lengths (scalar prefetch).
    x_mask = (jnp.arange(T)[None, :] < phone_lengths[:, None]).astype(jnp.float32)
    x_mask = x_mask[:, None, :]                                          # (B, 1, T)

    # positional table, projected for every block at once (linear_pos has no bias)
    pos_emb = rel_positional_encoding(T, D)                              # (2T-1, D)
    p_all = linear(pos_emb, p["wp_all"], jnp.zeros((nb * D,), jnp.float32),
                   out_dtype=jnp.float32)                                # (2T-1, nb*D)

    # first block's norm_mha + q|k|v projection (subsequent blocks are fused into
    # the tail of the previous block's second conv)
    blk0 = p["blocks"][0]
    qkv = linear(x, blk0["w_qkv"], blk0["b_qkv"],
                 ln=(blk0["norm_mha_g"], blk0["norm_mha_b"]),
                 out_dtype=jnp.bfloat16)                                 # (B, T, 3D)

    x_out = None
    for bi, blk in enumerate(p["blocks"]):
        # relative-position term BD = rel_shift((q + pos_bias_v) @ p^T), kept in glue
        # but carried in bf16 (halves the O(B·H·T^2) DMA into the attention kernel).
        p_h = p_all[:, bi * D:(bi + 1) * D].reshape(2 * T - 1, H, dk)
        q_h = qkv[..., :D].astype(jnp.float32).reshape(B, T, H, dk)
        qv = q_h + blk["pos_bias_v"][None, None]
        bd_raw = jnp.einsum("bthd,mhd->bhtm",
                            qv.astype(jnp.bfloat16), p_h.astype(jnp.bfloat16),
                            preferred_element_type=jnp.float32).astype(jnp.bfloat16)
        bd = rel_shift(bd_raw)                                           # (B, H, T, T) bf16

        # fused: pos_bias_u add, AC matmul, +BD, mask (from lengths), softmax,
        #        attn@v, output projection wo + bias + residual
        x = rel_attention(qkv, bd, x, blk["pos_bias_u"], blk["wo"], blk["bo"],
                          lens32, heads=H)                               # (B, T, D) f32

        # positionwise feed-forward: MultiLayeredConv1d (kernel 3, ReLU), LN fused
        h1 = conv1d_k3(x, blk["ff_w1"], blk["ff_b1"],
                       ln=(blk["norm_ff_g"], blk["norm_ff_b"]), relu=True,
                       out_dtype=jnp.bfloat16)                           # (B, T, U)
        if bi < nb - 1:
            nxt = p["blocks"][bi + 1]
            post = (nxt["norm_mha_g"], nxt["norm_mha_b"], nxt["w_qkv"], nxt["b_qkv"])
            x, qkv = conv1d_k3(h1, blk["ff_w2"], blk["ff_b2"], residual=x,
                               post=post, out_dtype=jnp.float32,
                               post_dtype=jnp.bfloat16)                  # x:(B,T,D), qkv:(B,T,3D)
        else:
            # last block: fuse after_norm + proj (1x1 conv) into the conv tail
            post = (p["after_norm_g"], p["after_norm_b"], p["proj_w"], p["proj_b"])
            x, x_out = conv1d_k3(h1, blk["ff_w2"], blk["ff_b2"], residual=x,
                                 post=post, out_dtype=jnp.float32,
                                 post_dtype=jnp.float32)                 # x_out:(B,T,D)

    x_out = jnp.transpose(x_out, (0, 2, 1)) * x_mask                     # (B, D, T)

    dur_input = jnp.transpose(dur_input_btc, (0, 2, 1))                  # (B, D, T)

    pitch_info = linear(pitch_end, p["proj_pitch_w"], p["proj_pitch_b"],
                        out_dtype=jnp.float32)
    pitch_info = jnp.transpose(pitch_info, (0, 2, 1))                    # (B, D, T)

    return x_out, x_mask, dur_input, pitch_info


# ----------------------------------- main ------------------------------------

if __name__ == "__main__":
    vocabs, D, H, U, num_blocks = 40, 64, 2, 128, 2   # small attention_dim / blocks
    B, T = 2, 16

    key = jax.random.PRNGKey(0)
    kp, k1, k2, k3, k4 = jax.random.split(key, 5)
    params = init_params(kp, vocabs, D, H, U, num_blocks)

    phone = jax.random.randint(k1, (B, T), 0, vocabs, dtype=jnp.int32)
    midi_id = jax.random.randint(k2, (B, T), 0, 129, dtype=jnp.int32)
    slur = jax.random.randint(k3, (B, T), 0, 2, dtype=jnp.int32)
    dur = jax.random.uniform(k4, (B, T), minval=0.5, maxval=4.0, dtype=jnp.float32)
    phone_lengths = jnp.array([T, T - 4], dtype=jnp.int32)

    fwd = jax.jit(functools.partial(text_encoder_forward, D=D, H=H))
    x, x_mask, dur_input, pitch_info = fwd(params, phone, phone_lengths,
                                           midi_id, dur, slur)
    jax.block_until_ready((x, x_mask, dur_input, pitch_info))

    assert x.shape == (B, D, T)
    assert x_mask.shape == (B, 1, T)
    assert dur_input.shape == (B, D, T)
    assert pitch_info.shape == (B, D, T)
    print("KERNEL_OK")
</pallas_src>

<mosaic_0001>
module attributes {stable_mosaic.version = 11 : i64} {
  func.func @_linear_kernel(%arg0: i32, %arg1: memref<32x64xf32, #tpu.memory_space<vmem>>, %arg2: memref<64x128xbf16, #tpu.memory_space<vmem>>, %arg3: memref<1x128xf32, #tpu.memory_space<vmem>>, %arg4: memref<32x128xf32, #tpu.memory_space<vmem>>) attributes {dimension_semantics = [#tpu.dimension_semantics<parallel>], iteration_bounds = array<i64: 1>, scalar_prefetch = 0 : i64, scratch_operands = 0 : i64, tpu.core_type = #tpu.core_type<tc>, window_params = [{transform_indices = @transform_0, window_bounds = array<i64: 32, 64>}, {pipeline_mode = #tpu.pipeline_mode<synchronous>, transform_indices = @transform_1, window_bounds = array<i64: 64, 128>}, {pipeline_mode = #tpu.pipeline_mode<synchronous>, transform_indices = @transform_2, window_bounds = array<i64: 1, 128>}, {transform_indices = @transform_3, window_bounds = array<i64: 32, 128>}]} {
    %c0 = arith.constant 0 : index
    %c0_0 = arith.constant 0 : index
    %0 = vector.load %arg1[%c0, %c0_0] : memref<32x64xf32, #tpu.memory_space<vmem>>, vector<32x64xf32>
    %1 = arith.truncf %0 : vector<32x64xf32> to vector<32x64xbf16>
    %c0_1 = arith.constant 0 : index
    %c0_2 = arith.constant 0 : index
    %2 = vector.load %arg2[%c0_1, %c0_2] : memref<64x128xbf16, #tpu.memory_space<vmem>>, vector<64x128xbf16>
    %cst = arith.constant dense<0.000000e+00> : vector<32x128xf32>
    %3 = tpu.matmul %1, %2, %cst {dimension_numbers = #tpu.dot_dimension_numbers<[1], [0], [0], [1], [0, 0, 1, 1], [], []>} : vector<32x64xbf16>, vector<64x128xbf16>, vector<32x128xf32> -> vector<32x128xf32>
    %c0_3 = arith.constant 0 : index
    %c0_4 = arith.constant 0 : index
    %4 = vector.load %arg3[%c0_3, %c0_4] : memref<1x128xf32, #tpu.memory_space<vmem>>, vector<1x128xf32>
    %5 = vector.broadcast %4 : vector<1x128xf32> to vector<32x128xf32>
    %6 = arith.addf %3, %5 : vector<32x128xf32>
    %c0_5 = arith.constant 0 : index
    %c0_6 = arith.constant 0 : index
    %7 = vector.load %arg4[%c0_5, %c0_6] : memref<32x128xf32, #tpu.memory_space<vmem>>, vector<32x128xf32>
    tpu.vector_store %arg4[%c0_5, %c0_6], %6 {strides = array<i32>} : memref<32x128xf32, #tpu.memory_space<vmem>>, vector<32x128xf32>,
    return
  }
  func.func @transform_0(%arg0: i32) -> (i32, i32) {
    %c0_i32 = arith.constant 0 : i32
    %c0_i32_0 = arith.constant 0 : i32
    return %arg0, %c0_i32 : i32, i32
  }
  func.func @transform_1(%arg0: i32) -> (i32, i32) {
    %c0_i32 = arith.constant 0 : i32
    %c0_i32_0 = arith.constant 0 : i32
    %c0_i32_1 = arith.constant 0 : i32
    return %c0_i32, %c0_i32_0 : i32, i32
  }
  func.func @transform_2(%arg0: i32) -> (i32, i32) {
    %c0_i32 = arith.constant 0 : i32
    %c0_i32_0 = arith.constant 0 : i32
    %c0_i32_1 = arith.constant 0 : i32
    return %c0_i32, %c0_i32_0 : i32, i32
  }
  func.func @transform_3(%arg0: i32) -> (i32, i32) {
    %c0_i32 = arith.constant 0 : i32
    %c0_i32_0 = arith.constant 0 : i32
    return %arg0, %c0_i32 : i32, i32
  }
}

module attributes {stable_mosaic.version = 11 : i64} {
  func.func @_linear_kernel(%arg0: i32, %arg1: memref<32x512xf32, #tpu.memory_space<vmem>>, %arg2: memref<512x128xbf16, #tpu.memory_space<vmem>>, %arg3: memref<1x128xf32, #tpu.memory_space<vmem>>, %arg4: memref<32x128xf32, #tpu.memory_space<vmem>>) attributes {dimension_semantics = [#tpu.dimension_semantics<parallel>], iteration_bounds = array<i64: 1>, scalar_prefetch = 0 : i64, scratch_operands = 0 : i64, tpu.core_type = #tpu.core_type<tc>, window_params = [{transform_indices = @transform_0, window_bounds = array<i64: 32, 512>}, {pipeline_mode = #tpu.pipeline_mode<synchronous>, transform_indices = @transform_1, window_bounds = array<i64: 512, 128>}, {pipeline_mode = #tpu.pipeline_mode<synchronous>, transform_indices = @transform_2, window_bounds = array<i64: 1, 128>}, {transform_indices = @transform_3, window_bounds = array<i64: 32, 128>}]} {
    %c0 = arith.constant 0 : index
    %c0_0 = arith.constant 0 : index
    %0 = vector.load %arg1[%c0, %c0_0] : memref<32x512xf32, #tpu.memory_space<vmem>>, vector<32x512xf32>
    %1 = arith.truncf %0 : vector<32x512xf32> to vector<32x512xbf16>
    %c0_1 = arith.constant 0 : index
    %c0_2 = arith.constant 0 : index
    %2 = vector.load %arg2[%c0_1, %c0_2] : memref<512x128xbf16, #tpu.memory_space<vmem>>, vector<512x128xbf16>
    %cst = arith.constant dense<0.000000e+00> : vector<32x128xf32>
    %3 = tpu.matmul %1, %2, %cst {dimension_numbers = #tpu.dot_dimension_numbers<[1], [0], [0], [1], [0, 0, 1, 1], [], []>} : vector<32x512xbf16>, vector<512x128xbf16>, vector<32x128xf32> -> vector<32x128xf32>
    %c0_3 = arith.constant 0 : index
    %c0_4 = arith.constant 0 : index
    %4 = vector.load %arg3[%c0_3, %c0_4] : memref<1x128xf32, #tpu.memory_space<vmem>>, vector<1x128xf32>
    %5 = vector.broadcast %4 : vector<1x128xf32> to vector<32x128xf32>
    %6 = arith.addf %3, %5 : vector<32x128xf32>
    %c0_5 = arith.constant 0 : index
    %c0_6 = arith.constant 0 : index
    %7 = vector.load %arg4[%c0_5, %c0_6] : memref<32x128xf32, #tpu.memory_space<vmem>>, vector<32x128xf32>
    tpu.vector_store %arg4[%c0_5, %c0_6], %6 {strides = array<i32>} : memref<32x128xf32, #tpu.memory_space<vmem>>, vector<32x128xf32>,
    return
  }
  func.func @transform_0(%arg0: i32) -> (i32, i32) {
    %c0_i32 = arith.constant 0 : i32
    %c0_i32_0 = arith.constant 0 : i32
    return %arg0, %c0_i32 : i32, i32
  }
  func.func @transform_1(%arg0: i32) -> (i32, i32) {
    %c0_i32 = arith.constant 0 : i32
    %c0_i32_0 = arith.constant 0 : i32
    %c0_i32_1 = arith.constant 0 : i32
    return %c0_i32, %c0_i32_0 : i32, i32
  }
  func.func @transform_2(%arg0: i32) -> (i32, i32) {
    %c0_i32 = arith.constant 0 : i32
    %c0_i32_0 = arith.constant 0 : i32
    %c0_i32_1 = arith.constant 0 : i32
    return %c0_i32, %c0_i32_0 : i32, i32
  }
  func.func @transform_3(%arg0: i32) -> (i32, i32) {
    %c0_i32 = arith.constant 0 : i32
    %c0_i32_0 = arith.constant 0 : i32
    return %arg0, %c0_i32 : i32, i32
  }
}

module attributes {stable_mosaic.version = 11 : i64} {
  func.func @_linear_kernel(%arg0: i32, %arg1: memref<32x64xf32, #tpu.memory_space<vmem>>, %arg2: memref<1x64xf32, #tpu.memory_space<vmem>>, %arg3: memref<1x64xf32, #tpu.memory_space<vmem>>, %arg4: memref<64x192xbf16, #tpu.memory_space<vmem>>, %arg5: memref<1x192xf32, #tpu.memory_space<vmem>>, %arg6: memref<32x192xbf16, #tpu.memory_space<vmem>>) attributes {dimension_semantics = [#tpu.dimension_semantics<parallel>], iteration_bounds = array<i64: 1>, scalar_prefetch = 0 : i64, scratch_operands = 0 : i64, tpu.core_type = #tpu.core_type<tc>, window_params = [{transform_indices = @transform_0, window_bounds = array<i64: 32, 64>}, {pipeline_mode = #tpu.pipeline_mode<synchronous>, transform_indices = @transform_1, window_bounds = array<i64: 1, 64>}, {pipeline_mode = #tpu.pipeline_mode<synchronous>, transform_indices = @transform_2, window_bounds = array<i64: 1, 64>}, {pipeline_mode = #tpu.pipeline_mode<synchronous>, transform_indices = @transform_3, window_bounds = array<i64: 64, 192>}, {pipeline_mode = #tpu.pipeline_mode<synchronous>, transform_indices = @transform_4, window_bounds = array<i64: 1, 192>}, {transform_indices = @transform_5, window_bounds = array<i64: 32, 192>}]} {
    %c0 = arith.constant 0 : index
    %c0_0 = arith.constant 0 : index
    %0 = vector.load %arg1[%c0, %c0_0] : memref<32x64xf32, #tpu.memory_space<vmem>>, vector<32x64xf32>
    %cst = arith.constant dense<0.000000e+00> : vector<32xf32>
    %1 = vector.multi_reduction <add>, %0, %cst [1] : vector<32x64xf32> to vector<32xf32>
    %2 = vector.shape_cast %1 : vector<32xf32> to vector<32x1xf32>
    %cst_1 = arith.constant 6.400000e+01 : f32
    %3 = vector.broadcast %cst_1 : f32 to vector<32x1xf32>
    %4 = arith.divf %2, %3 : vector<32x1xf32>
    %5 = vector.broadcast %4 : vector<32x1xf32> to vector<32x64xf32>
    %6 = arith.subf %0, %5 : vector<32x64xf32>
    %7 = arith.mulf %6, %6 : vector<32x64xf32>
    %cst_2 = arith.constant dense<0.000000e+00> : vector<32xf32>
    %8 = vector.multi_reduction <add>, %7, %cst_2 [1] : vector<32x64xf32> to vector<32xf32>
    %9 = vector.shape_cast %8 : vector<32xf32> to vector<32x1xf32>
    %cst_3 = arith.constant 6.400000e+01 : f32
    %10 = vector.broadcast %cst_3 : f32 to vector<32x1xf32>
    %11 = arith.divf %9, %10 : vector<32x1xf32>
    %cst_4 = arith.constant 9.99999996E-13 : f32
    %12 = vector.broadcast %cst_4 : f32 to vector<32x1xf32>
    %13 = arith.addf %11, %12 : vector<32x1xf32>
    %14 = math.rsqrt %13 : vector<32x1xf32>
    %15 = vector.broadcast %14 : vector<32x1xf32> to vector<32x64xf32>
    %16 = arith.mulf %6, %15 : vector<32x64xf32>
    %c0_5 = arith.constant 0 : index
    %c0_6 = arith.constant 0 : index
    %17 = vector.load %arg2[%c0_5, %c0_6] : memref<1x64xf32, #tpu.memory_space<vmem>>, vector<1x64xf32>
    %18 = vector.broadcast %17 : vector<1x64xf32> to vector<32x64xf32>
    %19 = arith.mulf %16, %18 : vector<32x64xf32>
    %c0_7 = arith.constant 0 : index
    %c0_8 = arith.constant 0 : index
    %20 = vector.load %arg3[%c0_7, %c0_8] : memref<1x64xf32, #tpu.memory_space<vmem>>, vector<1x64xf32>
    %21 = vector.broadcast %20 : vector<1x64xf32> to vector<32x64xf32>
    %22 = arith.addf %19, %21 : vector<32x64xf32>
    %23 = arith.truncf %22 : vector<32x64xf32> to vector<32x64xbf16>
    %c0_9 = arith.constant 0 : index
    %c0_10 = arith.constant 0 : index
    %24 = vector.load %arg4[%c0_9, %c0_10] : memref<64x192xbf16, #tpu.memory_space<vmem>>, vector<64x192xbf16>
    %cst_11 = arith.constant dense<0.000000e+00> : vector<32x192xf32>
    %25 = tpu.matmul %23, %24, %cst_11 {dimension_numbers = #tpu.dot_dimension_numbers<[1], [0], [0], [1], [0, 0, 1, 1], [], []>} : vector<32x64xbf16>, vector<64x192xbf16>, vector<32x192xf32> -> vector<32x192xf32>
    %c0_12 = arith.constant 0 : index
    %c0_13 = arith.constant 0 : index
    %26 = vector.load %arg5[%c0_12, %c0_13] : memref<1x192xf32, #tpu.memory_space<vmem>>, vector<1x192xf32>
    %27 = vector.broadcast %26 : vector<1x192xf32> to vector<32x192xf32>
    %28 = arith.addf %25, %27 : vector<32x192xf32>
    %29 = arith.truncf %28 : vector<32x192xf32> to vector<32x192xbf16>
    %c0_14 = arith.constant 0 : index
    %c0_15 = arith.constant 0 : index
    %30 = vector.load %arg6[%c0_14, %c0_15] : memref<32x192xbf16, #tpu.memory_space<vmem>>, vector<32x192xbf16>
    tpu.vector_store %arg6[%c0_14, %c0_15], %29 {strides = array<i32>} : memref<32x192xbf16, #tpu.memory_space<vmem>>, vector<32x192xbf16>,
    return
  }
  func.func @transform_0(%arg0: i32) -> (i32, i32) {
    %c0_i32 = arith.constant 0 : i32
    %c0_i32_0 = arith.constant 0 : i32
    return %arg0, %c0_i32 : i32, i32
  }
  func.func @transform_1(%arg0: i32) -> (i32, i32) {
    %c0_i32 = arith.constant 0 : i32
    %c0_i32_0 = arith.constant 0 : i32
    %c0_i32_1 = arith.constant 0 : i32
    return %c0_i32, %c0_i32_0 : i32, i32
  }
  func.func @transform_2(%arg0: i32) -> (i32, i32) {
    %c0_i32 = arith.constant 0 : i32
    %c0_i32_0 = arith.constant 0 : i32
    %c0_i32_1 = arith.constant 0 : i32
    return %c0_i32, %c0_i32_0 : i32, i32
  }
  func.func @transform_3(%arg0: i32) -> (i32, i32) {
    %c0_i32 = arith.constant 0 : i32
    %c0_i32_0 = arith.constant 0 : i32
    %c0_i32_1 = arith.constant 0 : i32
    return %c0_i32, %c0_i32_0 : i32, i32
  }
  func.func @transform_4(%arg0: i32) -> (i32, i32) {
    %c0_i32 = arith.constant 0 : i32
    %c0_i32_0 = arith.constant 0 : i32
    %c0_i32_1 = arith.constant 0 : i32
    return %c0_i32, %c0_i32_0 : i32, i32
  }
  func.func @transform_5(%arg0: i32) -> (i32, i32) {
    %c0_i32 = arith.constant 0 : i32
    %c0_i32_0 = arith.constant 0 : i32
    return %arg0, %c0_i32 : i32, i32
  }
}

module attributes {stable_mosaic.version = 11 : i64} {
  func.func @_rel_attn_kernel(%arg0: i32, %arg1: memref<2xi32, #tpu.memory_space<smem>>, %arg2: memref<1x16x192xbf16, #tpu.memory_space<vmem>>, %arg3: memref<1x2x16x16xbf16, #tpu.memory_space<vmem>>, %arg4: memref<1x16x64xf32, #tpu.memory_space<vmem>>, %arg5: memref<1x64xf32, #tpu.memory_space<vmem>>, %arg6: memref<64x64xbf16, #tpu.memory_space<vmem>>, %arg7: memref<1x64xf32, #tpu.memory_space<vmem>>, %arg8: memref<1x16x64xf32, #tpu.memory_space<vmem>>) attributes {dimension_semantics = [#tpu.dimension_semantics<parallel>], iteration_bounds = array<i64: 2>, scalar_prefetch = 1 : i64, scratch_operands = 0 : i64, tpu.core_type = #tpu.core_type<tc>, window_params = [{transform_indices = @transform_0, window_bounds = array<i64: 1, 16, 192>}, {transform_indices = @transform_1, window_bounds = array<i64: 1, 2, 16, 16>}, {transform_indices = @transform_2, window_bounds = array<i64: 1, 16, 64>}, {pipeline_mode = #tpu.pipeline_mode<synchronous>, transform_indices = @transform_3, window_bounds = array<i64: 1, 64>}, {pipeline_mode = #tpu.pipeline_mode<synchronous>, transform_indices = @transform_4, window_bounds = array<i64: 64, 64>}, {pipeline_mode = #tpu.pipeline_mode<synchronous>, transform_indices = @transform_5, window_bounds = array<i64: 1, 64>}, {transform_indices = @transform_6, window_bounds = array<i64: 1, 16, 64>}]} {
    %0 = arith.index_cast %arg0 : i32 to index
    %1 = memref.load %arg1[%0] : memref<2xi32, #tpu.memory_space<smem>>
    %2 = tpu.iota {dimensions = array<i32: 1>} : vector<1x16xi32>
    %3 = vector.broadcast %1 : i32 to vector<1x16xi32>
    %4 = arith.cmpi slt, %2, %3 : vector<1x16xi32>
    %c0 = arith.constant 0 : index
    %c0_0 = arith.constant 0 : index
    %c0_1 = arith.constant 0 : index
    %5 = vector.load %arg2[%c0, %c0_0, %c0_1] : memref<1x16x192xbf16, #tpu.memory_space<vmem>>, vector<1x16x192xbf16>
    %6 = vector.shape_cast %5 : vector<1x16x192xbf16> to vector<16x192xbf16>
    %c0_2 = arith.constant 0 : index
    %c0_3 = arith.constant 0 : index
    %7 = vector.load %arg5[%c0_2, %c0_3] : memref<1x64xf32, #tpu.memory_space<vmem>>, vector<1x64xf32>
    %c0_4 = arith.constant 0 : index
    %c0_5 = arith.constant 0 : index
    %8 = vector.load %arg7[%c0_4, %c0_5] : memref<1x64xf32, #tpu.memory_space<vmem>>, vector<1x64xf32>
    %c0_6 = arith.constant 0 : index
    %c0_7 = arith.constant 0 : index
    %c0_8 = arith.constant 0 : index
    %9 = vector.load %arg4[%c0_6, %c0_7, %c0_8] : memref<1x16x64xf32, #tpu.memory_space<vmem>>, vector<1x16x64xf32>
    %10 = vector.shape_cast %9 : vector<1x16x64xf32> to vector<16x64xf32>
    %11 = vector.broadcast %8 : vector<1x64xf32> to vector<16x64xf32>
    %12 = arith.addf %11, %10 : vector<16x64xf32>
    %13 = vector.extract_strided_slice %6 {offsets = [0, 0], sizes = [16, 32], strides = [1, 1]} : vector<16x192xbf16> to vector<16x32xbf16>
    %14 = arith.extf %13 : vector<16x32xbf16> to vector<16x32xf32>
    %15 = vector.extract_strided_slice %6 {offsets = [0, 64], sizes = [16, 32], strides = [1, 1]} : vector<16x192xbf16> to vector<16x32xbf16>
    %16 = vector.extract_strided_slice %6 {offsets = [0, 128], sizes = [16, 32], strides = [1, 1]} : vector<16x192xbf16> to vector<16x32xbf16>
    %17 = vector.extract_strided_slice %7 {offsets = [0, 0], sizes = [1, 32], strides = [1, 1]} : vector<1x64xf32> to vector<1x32xf32>
    %18 = vector.broadcast %17 : vector<1x32xf32> to vector<16x32xf32>
    %19 = arith.addf %14, %18 : vector<16x32xf32>
    %20 = arith.truncf %19 : vector<16x32xf32> to vector<16x32xbf16>
    %cst = arith.constant dense<0.000000e+00> : vector<16x16xf32>
    %21 = tpu.matmul %20, %15, %cst {dimension_numbers = #tpu.dot_dimension_numbers<[1], [1], [0], [0], [0, 0, 1, 0], [], []>} : vector<16x32xbf16>, vector<16x32xbf16>, vector<16x16xf32> -> vector<16x16xf32>
    %c0_9 = arith.constant 0 : index
    %c0_10 = arith.constant 0 : index
    %c0_11 = arith.constant 0 : index
    %c0_12 = arith.constant 0 : index
    %22 = vector.load %arg3[%c0_9, %c0_10, %c0_11, %c0_12] : memref<1x2x16x16xbf16, #tpu.memory_space<vmem>>, vector<1x1x16x16xbf16>
    %23 = vector.shape_cast %22 : vector<1x1x16x16xbf16> to vector<16x16xbf16>
    %24 = arith.extf %23 : vector<16x16xbf16> to vector<16x16xf32>
    %25 = arith.addf %21, %24 : vector<16x16xf32>
    %cst_13 = arith.constant 0.176776692 : f32
    %26 = vector.broadcast %cst_13 : f32 to vector<16x16xf32>
    %27 = arith.mulf %25, %26 : vector<16x16xf32>
    %cst_14 = arith.constant -1.000000e+30 : f32
    %28 = vector.shape_cast %4 : vector<1x16xi1> to vector<1x16xi1>
    %29 = vector.broadcast %28 : vector<1x16xi1> to vector<16x16xi1>
    %30 = vector.broadcast %cst_14 : f32 to vector<16x16xf32>
    %31 = arith.select %29, %27, %30 : vector<16x16xi1>, vector<16x16xf32>
    %cst_15 = arith.constant dense<0xFF800000> : vector<16xf32>
    %32 = vector.multi_reduction <maximumf>, %31, %cst_15 [1] : vector<16x16xf32> to vector<16xf32>
    %33 = vector.shape_cast %32 : vector<16xf32> to vector<16x1xf32>
    %34 = vector.broadcast %33 : vector<16x1xf32> to vector<16x16xf32>
    %35 = arith.subf %31, %34 : vector<16x16xf32>
    %36 = math.exp %35 : vector<16x16xf32>
    %cst_16 = arith.constant dense<0.000000e+00> : vector<16xf32>
    %37 = vector.multi_reduction <add>, %36, %cst_16 [1] : vector<16x16xf32> to vector<16xf32>
    %38 = vector.shape_cast %37 : vector<16xf32> to vector<16x1xf32>
    %39 = tpu.reciprocal %38 {approx = true} : vector<16x1xf32> -> vector<16x1xf32>
    %40 = vector.broadcast %39 : vector<16x1xf32> to vector<16x16xf32>
    %41 = arith.mulf %36, %40 : vector<16x16xf32>
    %cst_17 = arith.constant 0.000000e+00 : f32
    %42 = vector.shape_cast %4 : vector<1x16xi1> to vector<1x16xi1>
    %43 = vector.broadcast %42 : vector<1x16xi1> to vector<16x16xi1>
    %44 = vector.broadcast %cst_17 : f32 to vector<16x16xf32>
    %45 = arith.select %43, %41, %44 : vector<16x16xi1>, vector<16x16xf32>
    %46 = arith.truncf %45 : vector<16x16xf32> to vector<16x16xbf16>
    %cst_18 = arith.constant dense<0.000000e+00> : vector<16x32xf32>
    %47 = tpu.matmul %46, %16, %cst_18 {dimension_numbers = #tpu.dot_dimension_numbers<[1], [0], [0], [1], [0, 0, 1, 1], [], []>} : vector<16x16xbf16>, vector<16x32xbf16>, vector<16x32xf32> -> vector<16x32xf32>
    %48 = arith.truncf %47 : vector<16x32xf32> to vector<16x32xbf16>
    %c0_19 = arith.constant 0 : index
    %c0_20 = arith.constant 0 : index
    %49 = vector.load %arg6[%c0_19, %c0_20] : memref<64x64xbf16, #tpu.memory_space<vmem>>, vector<32x64xbf16>
    %cst_21 = arith.constant dense<0.000000e+00> : vector<16x64xf32>
    %50 = tpu.matmul %48, %49, %cst_21 {dimension_numbers = #tpu.dot_dimension_numbers<[1], [0], [0], [1], [0, 0, 1, 1], [], []>} : vector<16x32xbf16>, vector<32x64xbf16>, vector<16x64xf32> -> vector<16x64xf32>
    %51 = arith.addf %12, %50 : vector<16x64xf32>
    %52 = vector.extract_strided_slice %6 {offsets = [0, 32], sizes = [16, 32], strides = [1, 1]} : vector<16x192xbf16> to vector<16x32xbf16>
    %53 = arith.extf %52 : vector<16x32xbf16> to vector<16x32xf32>
    %54 = vector.extract_strided_slice %6 {offsets = [0, 96], sizes = [16, 32], strides = [1, 1]} : vector<16x192xbf16> to vector<16x32xbf16>
    %55 = vector.extract_strided_slice %6 {offsets = [0, 160], sizes = [16, 32], strides = [1, 1]} : vector<16x192xbf16> to vector<16x32xbf16>
    %56 = vector.extract_strided_slice %7 {offsets = [0, 32], sizes = [1, 32], strides = [1, 1]} : vector<1x64xf32> to vector<1x32xf32>
    %57 = vector.broadcast %56 : vector<1x32xf32> to vector<16x32xf32>
    %58 = arith.addf %53, %57 : vector<16x32xf32>
    %59 = arith.truncf %58 : vector<16x32xf32> to vector<16x32xbf16>
    %cst_22 = arith.constant dense<0.000000e+00> : vector<16x16xf32>
    %60 = tpu.matmul %59, %54, %cst_22 {dimension_numbers = #tpu.dot_dimension_numbers<[1], [1], [0], [0], [0, 0, 1, 0], [], []>} : vector<16x32xbf16>, vector<16x32xbf16>, vector<16x16xf32> -> vector<16x16xf32>
    %c0_23 = arith.constant 0 : index
    %c1 = arith.constant 1 : index
    %c0_24 = arith.constant 0 : index
    %c0_25 = arith.constant 0 : index
    %61 = vector.load %arg3[%c0_23, %c1, %c0_24, %c0_25] : memref<1x2x16x16xbf16, #tpu.memory_space<vmem>>, vector<1x1x16x16xbf16>
    %62 = vector.shape_cast %61 : vector<1x1x16x16xbf16> to vector<16x16xbf16>
    %63 = arith.extf %62 : vector<16x16xbf16> to vector<16x16xf32>
    %64 = arith.addf %60, %63 : vector<16x16xf32>
    %cst_26 = arith.constant 0.176776692 : f32
    %65 = vector.broadcast %cst_26 : f32 to vector<16x16xf32>
    %66 = arith.mulf %64, %65 : vector<16x16xf32>
    %cst_27 = arith.constant -1.000000e+30 : f32
    %67 = vector.shape_cast %4 : vector<1x16xi1> to vector<1x16xi1>
    %68 = vector.broadcast %67 : vector<1x16xi1> to vector<16x16xi1>
    %69 = vector.broadcast %cst_27 : f32 to vector<16x16xf32>
    %70 = arith.select %68, %66, %69 : vector<16x16xi1>, vector<16x16xf32>
    %cst_28 = arith.constant dense<0xFF800000> : vector<16xf32>
    %71 = vector.multi_reduction <maximumf>, %70, %cst_28 [1] : vector<16x16xf32> to vector<16xf32>
    %72 = vector.shape_cast %71 : vector<16xf32> to vector<16x1xf32>
    %73 = vector.broadcast %72 : vector<16x1xf32> to vector<16x16xf32>
    %74 = arith.subf %70, %73 : vector<16x16xf32>
    %75 = math.exp %74 : vector<16x16xf32>
    %cst_29 = arith.constant dense<0.000000e+00> : vector<16xf32>
    %76 = vector.multi_reduction <add>, %75, %cst_29 [1] : vector<16x16xf32> to vector<16xf32>
    %77 = vector.shape_cast %76 : vector<16xf32> to vector<16x1xf32>
    %78 = tpu.reciprocal %77 {approx = true} : vector<16x1xf32> -> vector<16x1xf32>
    %79 = vector.broadcast %78 : vector<16x1xf32> to vector<16x16xf32>
    %80 = arith.mulf %75, %79 : vector<16x16xf32>
    %cst_30 = arith.constant 0.000000e+00 : f32
    %81 = vector.shape_cast %4 : vector<1x16xi1> to vector<1x16xi1>
    %82 = vector.broadcast %81 : vector<1x16xi1> to vector<16x16xi1>
    %83 = vector.broadcast %cst_30 : f32 to vector<16x16xf32>
    %84 = arith.select %82, %80, %83 : vector<16x16xi1>, vector<16x16xf32>
    %85 = arith.truncf %84 : vector<16x16xf32> to vector<16x16xbf16>
    %cst_31 = arith.constant dense<0.000000e+00> : vector<16x32xf32>
    %86 = tpu.matmul %85, %55, %cst_31 {dimension_numbers = #tpu.dot_dimension_numbers<[1], [0], [0], [1], [0, 0, 1, 1], [], []>} : vector<16x16xbf16>, vector<16x32xbf16>, vector<16x32xf32> -> vector<16x32xf32>
    %87 = arith.truncf %86 : vector<16x32xf32> to vector<16x32xbf16>
    %c32 = arith.constant 32 : index
    %c0_32 = arith.constant 0 : index
    %88 = vector.load %arg6[%c32, %c0_32] : memref<64x64xbf16, #tpu.memory_space<vmem>>, vector<32x64xbf16>
    %cst_33 = arith.constant dense<0.000000e+00> : vector<16x64xf32>
    %89 = tpu.matmul %87, %88, %cst_33 {dimension_numbers = #tpu.dot_dimension_numbers<[1], [0], [0], [1], [0, 0, 1, 1], [], []>} : vector<16x32xbf16>, vector<32x64xbf16>, vector<16x64xf32> -> vector<16x64xf32>
    %90 = arith.addf %51, %89 : vector<16x64xf32>
    %c0_34 = arith.constant 0 : index
    %c0_35 = arith.constant 0 : index
    %c0_36 = arith.constant 0 : index
    %91 = vector.load %arg8[%c0_34, %c0_35, %c0_36] : memref<1x16x64xf32, #tpu.memory_space<vmem>>, vector<1x16x64xf32>
    %92 = vector.shape_cast %91 : vector<1x16x64xf32> to vector<16x64xf32>
    %93 = vector.shape_cast %90 : vector<16x64xf32> to vector<1x16x64xf32>
    tpu.vector_store %arg8[%c0_34, %c0_35, %c0_36], %93 {strides = array<i32>} : memref<1x16x64xf32, #tpu.memory_space<vmem>>, vector<1x16x64xf32>,
    return
  }
  func.func @transform_0(%arg0: i32, %arg1: memref<2xi32, #tpu.memory_space<smem>>) -> (i32, i32, i32) {
    %c0_i32 = arith.constant 0 : i32
    %c0_i32_0 = arith.constant 0 : i32
    %c0_i32_1 = arith.constant 0 : i32
    return %arg0, %c0_i32, %c0_i32_0 : i32, i32, i32
  }
  func.func @transform_1(%arg0: i32, %arg1: memref<2xi32, #tpu.memory_space<smem>>) -> (i32, i32, i32, i32) {
    %c0_i32 = arith.constant 0 : i32
    %c0_i32_0 = arith.constant 0 : i32
    %c0_i32_1 = arith.constant 0 : i32
    %c0_i32_2 = arith.constant 0 : i32
    return %arg0, %c0_i32, %c0_i32_0, %c0_i32_1 : i32, i32, i32, i32
  }
  func.func @transform_2(%arg0: i32, %arg1: memref<2xi32, #tpu.memory_space<smem>>) -> (i32, i32, i32) {
    %c0_i32 = arith.constant 0 : i32
    %c0_i32_0 = arith.constant 0 : i32
    %c0_i32_1 = arith.constant 0 : i32
    return %arg0, %c0_i32, %c0_i32_0 : i32, i32, i32
  }
  func.func @transform_3(%arg0: i32, %arg1: memref<2xi32, #tpu.memory_space<smem>>) -> (i32, i32) {
    %c0_i32 = arith.constant 0 : i32
    %c0_i32_0 = arith.constant 0 : i32
    %c0_i32_1 = arith.constant 0 : i32
    return %c0_i32, %c0_i32_0 : i32, i32
  }
  func.func @transform_4(%arg0: i32, %arg1: memref<2xi32, #tpu.memory_space<smem>>) -> (i32, i32) {
    %c0_i32 = arith.constant 0 : i32
    %c0_i32_0 = arith.constant 0 : i32
    %c0_i32_1 = arith.constant 0 : i32
    return %c0_i32, %c0_i32_0 : i32, i32
  }
  func.func @transform_5(%arg0: i32, %arg1: memref<2xi32, #tpu.memory_space<smem>>) -> (i32, i32) {
    %c0_i32 = arith.constant 0 : i32
    %c0_i32_0 = arith.constant 0 : i32
    %c0_i32_1 = arith.constant 0 : i32
    return %c0_i32, %c0_i32_0 : i32, i32
  }
  func.func @transform_6(%arg0: i32, %arg1: memref<2xi32, #tpu.memory_space<smem>>) -> (i32, i32, i32) {
    %c0_i32 = arith.constant 0 : i32
    %c0_i32_0 = arith.constant 0 : i32
    %c0_i32_1 = arith.constant 0 : i32
    return %arg0, %c0_i32, %c0_i32_0 : i32, i32, i32
  }
}

module attributes {stable_mosaic.version = 11 : i64} {
  func.func @_conv3_kernel(%arg0: i32, %arg1: memref<1x16x64xf32, #tpu.memory_space<vmem>>, %arg2: memref<1x64xf32, #tpu.memory_space<vmem>>, %arg3: memref<1x64xf32, #tpu.memory_space<vmem>>, %arg4: memref<192x128xbf16, #tpu.memory_space<vmem>>, %arg5: memref<1x128xf32, #tpu.memory_space<vmem>>, %arg6: memref<1x16x128xbf16, #tpu.memory_space<vmem>>) attributes {dimension_semantics = [#tpu.dimension_semantics<parallel>], iteration_bounds = array<i64: 2>, scalar_prefetch = 0 : i64, scratch_operands = 0 : i64, tpu.core_type = #tpu.core_type<tc>, window_params = [{transform_indices = @transform_0, window_bounds = array<i64: 1, 16, 64>}, {pipeline_mode = #tpu.pipeline_mode<synchronous>, transform_indices = @transform_1, window_bounds = array<i64: 1, 64>}, {pipeline_mode = #tpu.pipeline_mode<synchronous>, transform_indices = @transform_2, window_bounds = array<i64: 1, 64>}, {pipeline_mode = #tpu.pipeline_mode<synchronous>, transform_indices = @transform_3, window_bounds = array<i64: 192, 128>}, {pipeline_mode = #tpu.pipeline_mode<synchronous>, transform_indices = @transform_4, window_bounds = array<i64: 1, 128>}, {transform_indices = @transform_5, window_bounds = array<i64: 1, 16, 128>}]} {
    %c0 = arith.constant 0 : index
    %c0_0 = arith.constant 0 : index
    %c0_1 = arith.constant 0 : index
    %0 = vector.load %arg1[%c0, %c0_0, %c0_1] : memref<1x16x64xf32, #tpu.memory_space<vmem>>, vector<1x16x64xf32>
    %1 = vector.shape_cast %0 : vector<1x16x64xf32> to vector<16x64xf32>
    %cst = arith.constant dense<0.000000e+00> : vector<16xf32>
    %2 = vector.multi_reduction <add>, %1, %cst [1] : vector<16x64xf32> to vector<16xf32>
    %3 = vector.shape_cast %2 : vector<16xf32> to vector<16x1xf32>
    %cst_2 = arith.constant 6.400000e+01 : f32
    %4 = vector.broadcast %cst_2 : f32 to vector<16x1xf32>
    %5 = arith.divf %3, %4 : vector<16x1xf32>
    %6 = vector.broadcast %5 : vector<16x1xf32> to vector<16x64xf32>
    %7 = arith.subf %1, %6 : vector<16x64xf32>
    %8 = arith.mulf %7, %7 : vector<16x64xf32>
    %cst_3 = arith.constant dense<0.000000e+00> : vector<16xf32>
    %9 = vector.multi_reduction <add>, %8, %cst_3 [1] : vector<16x64xf32> to vector<16xf32>
    %10 = vector.shape_cast %9 : vector<16xf32> to vector<16x1xf32>
    %cst_4 = arith.constant 6.400000e+01 : f32
    %11 = vector.broadcast %cst_4 : f32 to vector<16x1xf32>
    %12 = arith.divf %10, %11 : vector<16x1xf32>
    %cst_5 = arith.constant 9.99999996E-13 : f32
    %13 = vector.broadcast %cst_5 : f32 to vector<16x1xf32>
    %14 = arith.addf %12, %13 : vector<16x1xf32>
    %15 = math.rsqrt %14 : vector<16x1xf32>
    %16 = vector.broadcast %15 : vector<16x1xf32> to vector<16x64xf32>
    %17 = arith.mulf %7, %16 : vector<16x64xf32>
    %c0_6 = arith.constant 0 : index
    %c0_7 = arith.constant 0 : index
    %18 = vector.load %arg2[%c0_6, %c0_7] : memref<1x64xf32, #tpu.memory_space<vmem>>, vector<1x64xf32>
    %19 = vector.broadcast %18 : vector<1x64xf32> to vector<16x64xf32>
    %20 = arith.mulf %17, %19 : vector<16x64xf32>
    %c0_8 = arith.constant 0 : index
    %c0_9 = arith.constant 0 : index
    %21 = vector.load %arg3[%c0_8, %c0_9] : memref<1x64xf32, #tpu.memory_space<vmem>>, vector<1x64xf32>
    %22 = vector.broadcast %21 : vector<1x64xf32> to vector<16x64xf32>
    %23 = arith.addf %20, %22 : vector<16x64xf32>
    %cst_10 = arith.constant 0.000000e+00 : f32
    %24 = vector.broadcast %cst_10 : f32 to vector<1x64xf32>
    %25 = vector.extract_strided_slice %23 {offsets = [0, 0], sizes = [15, 64], strides = [1, 1]} : vector<16x64xf32> to vector<15x64xf32>
    %26 = tpu.concatenate %24, %25 in 0 : vector<1x64xf32>, vector<15x64xf32> -> vector<16x64xf32>
    %27 = vector.extract_strided_slice %23 {offsets = [1, 0], sizes = [15, 64], strides = [1, 1]} : vector<16x64xf32> to vector<15x64xf32>
    %28 = tpu.concatenate %27, %24 in 0 : vector<15x64xf32>, vector<1x64xf32> -> vector<16x64xf32>
    %29 = tpu.concatenate %26, %23, %28 in 1 : vector<16x64xf32>, vector<16x64xf32>, vector<16x64xf32> -> vector<16x192xf32>
    %30 = arith.truncf %29 : vector<16x192xf32> to vector<16x192xbf16>
    %c0_11 = arith.constant 0 : index
    %c0_12 = arith.constant 0 : index
    %31 = vector.load %arg4[%c0_11, %c0_12] : memref<192x128xbf16, #tpu.memory_space<vmem>>, vector<192x128xbf16>
    %cst_13 = arith.constant dense<0.000000e+00> : vector<16x128xf32>
    %32 = tpu.matmul %30, %31, %cst_13 {dimension_numbers = #tpu.dot_dimension_numbers<[1], [0], [0], [1], [0, 0, 1, 1], [], []>} : vector<16x192xbf16>, vector<192x128xbf16>, vector<16x128xf32> -> vector<16x128xf32>
    %c0_14 = arith.constant 0 : index
    %c0_15 = arith.constant 0 : index
    %33 = vector.load %arg5[%c0_14, %c0_15] : memref<1x128xf32, #tpu.memory_space<vmem>>, vector<1x128xf32>
    %34 = vector.broadcast %33 : vector<1x128xf32> to vector<16x128xf32>
    %35 = arith.addf %32, %34 : vector<16x128xf32>
    %cst_16 = arith.constant 0.000000e+00 : f32
    %36 = vector.broadcast %cst_16 : f32 to vector<16x128xf32>
    %37 = arith.maximumf %35, %36 : vector<16x128xf32>
    %38 = arith.truncf %37 : vector<16x128xf32> to vector<16x128xbf16>
    %c0_17 = arith.constant 0 : index
    %c0_18 = arith.constant 0 : index
    %c0_19 = arith.constant 0 : index
    %39 = vector.load %arg6[%c0_17, %c0_18, %c0_19] : memref<1x16x128xbf16, #tpu.memory_space<vmem>>, vector<1x16x128xbf16>
    %40 = vector.shape_cast %39 : vector<1x16x128xbf16> to vector<16x128xbf16>
    %41 = vector.shape_cast %38 : vector<16x128xbf16> to vector<1x16x128xbf16>
    tpu.vector_store %arg6[%c0_17, %c0_18, %c0_19], %41 {strides = array<i32>} : memref<1x16x128xbf16, #tpu.memory_space<vmem>>, vector<1x16x128xbf16>,
    return
  }
  func.func @transform_0(%arg0: i32) -> (i32, i32, i32) {
    %c0_i32 = arith.constant 0 : i32
    %c0_i32_0 = arith.constant 0 : i32
    %c0_i32_1 = arith.constant 0 : i32
    return %arg0, %c0_i32, %c0_i32_0 : i32, i32, i32
  }
  func.func @transform_1(%arg0: i32) -> (i32, i32) {
    %c0_i32 = arith.constant 0 : i32
    %c0_i32_0 = arith.constant 0 : i32
    %c0_i32_1 = arith.constant 0 : i32
    return %c0_i32, %c0_i32_0 : i32, i32
  }
  func.func @transform_2(%arg0: i32) -> (i32, i32) {
    %c0_i32 = arith.constant 0 : i32
    %c0_i32_0 = arith.constant 0 : i32
    %c0_i32_1 = arith.constant 0 : i32
    return %c0_i32, %c0_i32_0 : i32, i32
  }
  func.func @transform_3(%arg0: i32) -> (i32, i32) {
    %c0_i32 = arith.constant 0 : i32
    %c0_i32_0 = arith.constant 0 : i32
    %c0_i32_1 = arith.constant 0 : i32
    return %c0_i32, %c0_i32_0 : i32, i32
  }
  func.func @transform_4(%arg0: i32) -> (i32, i32) {
    %c0_i32 = arith.constant 0 : i32
    %c0_i32_0 = arith.constant 0 : i32
    %c0_i32_1 = arith.constant 0 : i32
    return %c0_i32, %c0_i32_0 : i32, i32
  }
  func.func @transform_5(%arg0: i32) -> (i32, i32, i32) {
    %c0_i32 = arith.constant 0 : i32
    %c0_i32_0 = arith.constant 0 : i32
    %c0_i32_1 = arith.constant 0 : i32
    return %arg0, %c0_i32, %c0_i32_0 : i32, i32, i32
  }
}

module attributes {stable_mosaic.version = 11 : i64} {
  func.func @_conv3_kernel(%arg0: i32, %arg1: memref<1x16x128xbf16, #tpu.memory_space<vmem>>, %arg2: memref<384x64xbf16, #tpu.memory_space<vmem>>, %arg3: memref<1x64xf32, #tpu.memory_space<vmem>>, %arg4: memref<1x16x64xf32, #tpu.memory_space<vmem>>, %arg5: memref<1x64xf32, #tpu.memory_space<vmem>>, %arg6: memref<1x64xf32, #tpu.memory_space<vmem>>, %arg7: memref<64x64xbf16, #tpu.memory_space<vmem>>, %arg8: memref<1x64xf32, #tpu.memory_space<vmem>>, %arg9: memref<1x16x64xf32, #tpu.memory_space<vmem>>, %arg10: memref<1x16x64xf32, #tpu.memory_space<vmem>>) attributes {dimension_semantics = [#tpu.dimension_semantics<parallel>], iteration_bounds = array<i64: 2>, scalar_prefetch = 0 : i64, scratch_operands = 0 : i64, tpu.core_type = #tpu.core_type<tc>, window_params = [{transform_indices = @transform_0, window_bounds = array<i64: 1, 16, 128>}, {pipeline_mode = #tpu.pipeline_mode<synchronous>, transform_indices = @transform_1, window_bounds = array<i64: 384, 64>}, {pipeline_mode = #tpu.pipeline_mode<synchronous>, transform_indices = @transform_2, window_bounds = array<i64: 1, 64>}, {transform_indices = @transform_3, window_bounds = array<i64: 1, 16, 64>}, {pipeline_mode = #tpu.pipeline_mode<synchronous>, transform_indices = @transform_4, window_bounds = array<i64: 1, 64>}, {pipeline_mode = #tpu.pipeline_mode<synchronous>, transform_indices = @transform_5, window_bounds = array<i64: 1, 64>}, {pipeline_mode = #tpu.pipeline_mode<synchronous>, transform_indices = @transform_6, window_bounds = array<i64: 64, 64>}, {pipeline_mode = #tpu.pipeline_mode<synchronous>, transform_indices = @transform_7, window_bounds = array<i64: 1, 64>}, {transform_indices = @transform_8, window_bounds = array<i64: 1, 16, 64>}, {transform_indices = @transform_9, window_bounds = array<i64: 1, 16, 64>}]} {
    %c0 = arith.constant 0 : index
    %c0_0 = arith.constant 0 : index
    %c0_1 = arith.constant 0 : index
    %0 = vector.load %arg1[%c0, %c0_0, %c0_1] : memref<1x16x128xbf16, #tpu.memory_space<vmem>>, vector<1x16x128xbf16>
    %1 = vector.shape_cast %0 : vector<1x16x128xbf16> to vector<16x128xbf16>
    %2 = arith.extf %1 : vector<16x128xbf16> to vector<16x128xf32>
    %cst = arith.constant 0.000000e+00 : f32
    %3 = vector.broadcast %cst : f32 to vector<1x128xf32>
    %4 = vector.extract_strided_slice %2 {offsets = [0, 0], sizes = [15, 128], strides = [1, 1]} : vector<16x128xf32> to vector<15x128xf32>
    %5 = tpu.concatenate %3, %4 in 0 : vector<1x128xf32>, vector<15x128xf32> -> vector<16x128xf32>
    %6 = vector.extract_strided_slice %2 {offsets = [1, 0], sizes = [15, 128], strides = [1, 1]} : vector<16x128xf32> to vector<15x128xf32>
    %7 = tpu.concatenate %6, %3 in 0 : vector<15x128xf32>, vector<1x128xf32> -> vector<16x128xf32>
    %8 = tpu.concatenate %5, %2, %7 in 1 : vector<16x128xf32>, vector<16x128xf32>, vector<16x128xf32> -> vector<16x384xf32>
    %9 = arith.truncf %8 : vector<16x384xf32> to vector<16x384xbf16>
    %c0_2 = arith.constant 0 : index
    %c0_3 = arith.constant 0 : index
    %10 = vector.load %arg2[%c0_2, %c0_3] : memref<384x64xbf16, #tpu.memory_space<vmem>>, vector<384x64xbf16>
    %cst_4 = arith.constant dense<0.000000e+00> : vector<16x64xf32>
    %11 = tpu.matmul %9, %10, %cst_4 {dimension_numbers = #tpu.dot_dimension_numbers<[1], [0], [0], [1], [0, 0, 1, 1], [], []>} : vector<16x384xbf16>, vector<384x64xbf16>, vector<16x64xf32> -> vector<16x64xf32>
    %c0_5 = arith.constant 0 : index
    %c0_6 = arith.constant 0 : index
    %12 = vector.load %arg3[%c0_5, %c0_6] : memref<1x64xf32, #tpu.memory_space<vmem>>, vector<1x64xf32>
    %13 = vector.broadcast %12 : vector<1x64xf32> to vector<16x64xf32>
    %14 = arith.addf %11, %13 : vector<16x64xf32>
    %c0_7 = arith.constant 0 : index
    %c0_8 = arith.constant 0 : index
    %c0_9 = arith.constant 0 : index
    %15 = vector.load %arg4[%c0_7, %c0_8, %c0_9] : memref<1x16x64xf32, #tpu.memory_space<vmem>>, vector<1x16x64xf32>
    %16 = vector.shape_cast %15 : vector<1x16x64xf32> to vector<16x64xf32>
    %17 = arith.addf %14, %16 : vector<16x64xf32>
    %c0_10 = arith.constant 0 : index
    %c0_11 = arith.constant 0 : index
    %c0_12 = arith.constant 0 : index
    %18 = vector.load %arg9[%c0_10, %c0_11, %c0_12] : memref<1x16x64xf32, #tpu.memory_space<vmem>>, vector<1x16x64xf32>
    %19 = vector.shape_cast %18 : vector<1x16x64xf32> to vector<16x64xf32>
    %20 = vector.shape_cast %17 : vector<16x64xf32> to vector<1x16x64xf32>
    tpu.vector_store %arg9[%c0_10, %c0_11, %c0_12], %20 {strides = array<i32>} : memref<1x16x64xf32, #tpu.memory_space<vmem>>, vector<1x16x64xf32>,
    %cst_13 = arith.constant dense<0.000000e+00> : vector<16xf32>
    %21 = vector.multi_reduction <add>, %17, %cst_13 [1] : vector<16x64xf32> to vector<16xf32>
    %22 = vector.shape_cast %21 : vector<16xf32> to vector<16x1xf32>
    %cst_14 = arith.constant 6.400000e+01 : f32
    %23 = vector.broadcast %cst_14 : f32 to vector<16x1xf32>
    %24 = arith.divf %22, %23 : vector<16x1xf32>
    %25 = vector.broadcast %24 : vector<16x1xf32> to vector<16x64xf32>
    %26 = arith.subf %17, %25 : vector<16x64xf32>
    %27 = arith.mulf %26, %26 : vector<16x64xf32>
    %cst_15 = arith.constant dense<0.000000e+00> : vector<16xf32>
    %28 = vector.multi_reduction <add>, %27, %cst_15 [1] : vector<16x64xf32> to vector<16xf32>
    %29 = vector.shape_cast %28 : vector<16xf32> to vector<16x1xf32>
    %cst_16 = arith.constant 6.400000e+01 : f32
    %30 = vector.broadcast %cst_16 : f32 to vector<16x1xf32>
    %31 = arith.divf %29, %30 : vector<16x1xf32>
    %cst_17 = arith.constant 9.99999996E-13 : f32
    %32 = vector.broadcast %cst_17 : f32 to vector<16x1xf32>
    %33 = arith.addf %31, %32 : vector<16x1xf32>
    %34 = math.rsqrt %33 : vector<16x1xf32>
    %35 = vector.broadcast %34 : vector<16x1xf32> to vector<16x64xf32>
    %36 = arith.mulf %26, %35 : vector<16x64xf32>
    %c0_18 = arith.constant 0 : index
    %c0_19 = arith.constant 0 : index
    %37 = vector.load %arg5[%c0_18, %c0_19] : memref<1x64xf32, #tpu.memory_space<vmem>>, vector<1x64xf32>
    %38 = vector.broadcast %37 : vector<1x64xf32> to vector<16x64xf32>
    %39 = arith.mulf %36, %38 : vector<16x64xf32>
    %c0_20 = arith.constant 0 : index
    %c0_21 = arith.constant 0 : index
    %40 = vector.load %arg6[%c0_20, %c0_21] : memref<1x64xf32, #tpu.memory_space<vmem>>, vector<1x64xf32>
    %41 = vector.broadcast %40 : vector<1x64xf32> to vector<16x64xf32>
    %42 = arith.addf %39, %41 : vector<16x64xf32>
    %43 = arith.truncf %42 : vector<16x64xf32> to vector<16x64xbf16>
    %c0_22 = arith.constant 0 : index
    %c0_23 = arith.constant 0 : index
    %44 = vector.load %arg7[%c0_22, %c0_23] : memref<64x64xbf16, #tpu.memory_space<vmem>>, vector<64x64xbf16>
    %cst_24 = arith.constant dense<0.000000e+00> : vector<16x64xf32>
    %45 = tpu.matmul %43, %44, %cst_24 {dimension_numbers = #tpu.dot_dimension_numbers<[1], [0], [0], [1], [0, 0, 1, 1], [], []>} : vector<16x64xbf16>, vector<64x64xbf16>, vector<16x64xf32> -> vector<16x64xf32>
    %c0_25 = arith.constant 0 : index
    %c0_26 = arith.constant 0 : index
    %46 = vector.load %arg8[%c0_25, %c0_26] : memref<1x64xf32, #tpu.memory_space<vmem>>, vector<1x64xf32>
    %47 = vector.broadcast %46 : vector<1x64xf32> to vector<16x64xf32>
    %48 = arith.addf %45, %47 : vector<16x64xf32>
    %c0_27 = arith.constant 0 : index
    %c0_28 = arith.constant 0 : index
    %c0_29 = arith.constant 0 : index
    %49 = vector.load %arg10[%c0_27, %c0_28, %c0_29] : memref<1x16x64xf32, #tpu.memory_space<vmem>>, vector<1x16x64xf32>
    %50 = vector.shape_cast %49 : vector<1x16x64xf32> to vector<16x64xf32>
    %51 = vector.shape_cast %48 : vector<16x64xf32> to vector<1x16x64xf32>
    tpu.vector_store %arg10[%c0_27, %c0_28, %c0_29], %51 {strides = array<i32>} : memref<1x16x64xf32, #tpu.memory_space<vmem>>, vector<1x16x64xf32>,
    return
  }
  func.func @transform_0(%arg0: i32) -> (i32, i32, i32) {
    %c0_i32 = arith.constant 0 : i32
    %c0_i32_0 = arith.constant 0 : i32
    %c0_i32_1 = arith.constant 0 : i32
    return %arg0, %c0_i32, %c0_i32_0 : i32, i32, i32
  }
  func.func @transform_1(%arg0: i32) -> (i32, i32) {
    %c0_i32 = arith.constant 0 : i32
    %c0_i32_0 = arith.constant 0 : i32
    %c0_i32_1 = arith.constant 0 : i32
    return %c0_i32, %c0_i32_0 : i32, i32
  }
  func.func @transform_2(%arg0: i32) -> (i32, i32) {
    %c0_i32 = arith.constant 0 : i32
    %c0_i32_0 = arith.constant 0 : i32
    %c0_i32_1 = arith.constant 0 : i32
    return %c0_i32, %c0_i32_0 : i32, i32
  }
  func.func @transform_3(%arg0: i32) -> (i32, i32, i32) {
    %c0_i32 = arith.constant 0 : i32
    %c0_i32_0 = arith.constant 0 : i32
    %c0_i32_1 = arith.constant 0 : i32
    return %arg0, %c0_i32, %c0_i32_0 : i32, i32, i32
  }
  func.func @transform_4(%arg0: i32) -> (i32, i32) {
    %c0_i32 = arith.constant 0 : i32
    %c0_i32_0 = arith.constant 0 : i32
    %c0_i32_1 = arith.constant 0 : i32
    return %c0_i32, %c0_i32_0 : i32, i32
  }
  func.func @transform_5(%arg0: i32) -> (i32, i32) {
    %c0_i32 = arith.constant 0 : i32
    %c0_i32_0 = arith.constant 0 : i32
    %c0_i32_1 = arith.constant 0 : i32
    return %c0_i32, %c0_i32_0 : i32, i32
  }
  func.func @transform_6(%arg0: i32) -> (i32, i32) {
    %c0_i32 = arith.constant 0 : i32
    %c0_i32_0 = arith.constant 0 : i32
    %c0_i32_1 = arith.constant 0 : i32
    return %c0_i32, %c0_i32_0 : i32, i32
  }
  func.func @transform_7(%arg0: i32) -> (i32, i32) {
    %c0_i32 = arith.constant 0 : i32
    %c0_i32_0 = arith.constant 0 : i32
    %c0_i32_1 = arith.constant 0 : i32
    return %c0_i32, %c0_i32_0 : i32, i32
  }
  func.func @transform_8(%arg0: i32) -> (i32, i32, i32) {
    %c0_i32 = arith.constant 0 : i32
    %c0_i32_0 = arith.constant 0 : i32
    %c0_i32_1 = arith.constant 0 : i32
    return %arg0, %c0_i32, %c0_i32_0 : i32, i32, i32
  }
  func.func @transform_9(%arg0: i32) -> (i32, i32, i32) {
    %c0_i32 = arith.constant 0 : i32
    %c0_i32_0 = arith.constant 0 : i32
    %c0_i32_1 = arith.constant 0 : i32
    return %arg0, %c0_i32, %c0_i32_0 : i32, i32, i32
  }
}

module attributes {stable_mosaic.version = 11 : i64} {
  func.func @_conv3_kernel(%arg0: i32, %arg1: memref<1x16x128xbf16, #tpu.memory_space<vmem>>, %arg2: memref<384x64xbf16, #tpu.memory_space<vmem>>, %arg3: memref<1x64xf32, #tpu.memory_space<vmem>>, %arg4: memref<1x16x64xf32, #tpu.memory_space<vmem>>, %arg5: memref<1x64xf32, #tpu.memory_space<vmem>>, %arg6: memref<1x64xf32, #tpu.memory_space<vmem>>, %arg7: memref<64x192xbf16, #tpu.memory_space<vmem>>, %arg8: memref<1x192xf32, #tpu.memory_space<vmem>>, %arg9: memref<1x16x64xf32, #tpu.memory_space<vmem>>, %arg10: memref<1x16x192xbf16, #tpu.memory_space<vmem>>) attributes {dimension_semantics = [#tpu.dimension_semantics<parallel>], iteration_bounds = array<i64: 2>, scalar_prefetch = 0 : i64, scratch_operands = 0 : i64, tpu.core_type = #tpu.core_type<tc>, window_params = [{transform_indices = @transform_0, window_bounds = array<i64: 1, 16, 128>}, {pipeline_mode = #tpu.pipeline_mode<synchronous>, transform_indices = @transform_1, window_bounds = array<i64: 384, 64>}, {pipeline_mode = #tpu.pipeline_mode<synchronous>, transform_indices = @transform_2, window_bounds = array<i64: 1, 64>}, {transform_indices = @transform_3, window_bounds = array<i64: 1, 16, 64>}, {pipeline_mode = #tpu.pipeline_mode<synchronous>, transform_indices = @transform_4, window_bounds = array<i64: 1, 64>}, {pipeline_mode = #tpu.pipeline_mode<synchronous>, transform_indices = @transform_5, window_bounds = array<i64: 1, 64>}, {pipeline_mode = #tpu.pipeline_mode<synchronous>, transform_indices = @transform_6, window_bounds = array<i64: 64, 192>}, {pipeline_mode = #tpu.pipeline_mode<synchronous>, transform_indices = @transform_7, window_bounds = array<i64: 1, 192>}, {transform_indices = @transform_8, window_bounds = array<i64: 1, 16, 64>}, {transform_indices = @transform_9, window_bounds = array<i64: 1, 16, 192>}]} {
    %c0 = arith.constant 0 : index
    %c0_0 = arith.constant 0 : index
    %c0_1 = arith.constant 0 : index
    %0 = vector.load %arg1[%c0, %c0_0, %c0_1] : memref<1x16x128xbf16, #tpu.memory_space<vmem>>, vector<1x16x128xbf16>
    %1 = vector.shape_cast %0 : vector<1x16x128xbf16> to vector<16x128xbf16>
    %2 = arith.extf %1 : vector<16x128xbf16> to vector<16x128xf32>
    %cst = arith.constant 0.000000e+00 : f32
    %3 = vector.broadcast %cst : f32 to vector<1x128xf32>
    %4 = vector.extract_strided_slice %2 {offsets = [0, 0], sizes = [15, 128], strides = [1, 1]} : vector<16x128xf32> to vector<15x128xf32>
    %5 = tpu.concatenate %3, %4 in 0 : vector<1x128xf32>, vector<15x128xf32> -> vector<16x128xf32>
    %6 = vector.extract_strided_slice %2 {offsets = [1, 0], sizes = [15, 128], strides = [1, 1]} : vector<16x128xf32> to vector<15x128xf32>
    %7 = tpu.concatenate %6, %3 in 0 : vector<15x128xf32>, vector<1x128xf32> -> vector<16x128xf32>
    %8 = tpu.concatenate %5, %2, %7 in 1 : vector<16x128xf32>, vector<16x128xf32>, vector<16x128xf32> -> vector<16x384xf32>
    %9 = arith.truncf %8 : vector<16x384xf32> to vector<16x384xbf16>
    %c0_2 = arith.constant 0 : index
    %c0_3 = arith.constant 0 : index
    %10 = vector.load %arg2[%c0_2, %c0_3] : memref<384x64xbf16, #tpu.memory_space<vmem>>, vector<384x64xbf16>
    %cst_4 = arith.constant dense<0.000000e+00> : vector<16x64xf32>
    %11 = tpu.matmul %9, %10, %cst_4 {dimension_numbers = #tpu.dot_dimension_numbers<[1], [0], [0], [1], [0, 0, 1, 1], [], []>} : vector<16x384xbf16>, vector<384x64xbf16>, vector<16x64xf32> -> vector<16x64xf32>
    %c0_5 = arith.constant 0 : index
    %c0_6 = arith.constant 0 : index
    %12 = vector.load %arg3[%c0_5, %c0_6] : memref<1x64xf32, #tpu.memory_space<vmem>>, vector<1x64xf32>
    %13 = vector.broadcast %12 : vector<1x64xf32> to vector<16x64xf32>
    %14 = arith.addf %11, %13 : vector<16x64xf32>
    %c0_7 = arith.constant 0 : index
    %c0_8 = arith.constant 0 : index
    %c0_9 = arith.constant 0 : index
    %15 = vector.load %arg4[%c0_7, %c0_8, %c0_9] : memref<1x16x64xf32, #tpu.memory_space<vmem>>, vector<1x16x64xf32>
    %16 = vector.shape_cast %15 : vector<1x16x64xf32> to vector<16x64xf32>
    %17 = arith.addf %14, %16 : vector<16x64xf32>
    %c0_10 = arith.constant 0 : index
    %c0_11 = arith.constant 0 : index
    %c0_12 = arith.constant 0 : index
    %18 = vector.load %arg9[%c0_10, %c0_11, %c0_12] : memref<1x16x64xf32, #tpu.memory_space<vmem>>, vector<1x16x64xf32>
    %19 = vector.shape_cast %18 : vector<1x16x64xf32> to vector<16x64xf32>
    %20 = vector.shape_cast %17 : vector<16x64xf32> to vector<1x16x64xf32>
    tpu.vector_store %arg9[%c0_10, %c0_11, %c0_12], %20 {strides = array<i32>} : memref<1x16x64xf32, #tpu.memory_space<vmem>>, vector<1x16x64xf32>,
    %cst_13 = arith.constant dense<0.000000e+00> : vector<16xf32>
    %21 = vector.multi_reduction <add>, %17, %cst_13 [1] : vector<16x64xf32> to vector<16xf32>
    %22 = vector.shape_cast %21 : vector<16xf32> to vector<16x1xf32>
    %cst_14 = arith.constant 6.400000e+01 : f32
    %23 = vector.broadcast %cst_14 : f32 to vector<16x1xf32>
    %24 = arith.divf %22, %23 : vector<16x1xf32>
    %25 = vector.broadcast %24 : vector<16x1xf32> to vector<16x64xf32>
    %26 = arith.subf %17, %25 : vector<16x64xf32>
    %27 = arith.mulf %26, %26 : vector<16x64xf32>
    %cst_15 = arith.constant dense<0.000000e+00> : vector<16xf32>
    %28 = vector.multi_reduction <add>, %27, %cst_15 [1] : vector<16x64xf32> to vector<16xf32>
    %29 = vector.shape_cast %28 : vector<16xf32> to vector<16x1xf32>
    %cst_16 = arith.constant 6.400000e+01 : f32
    %30 = vector.broadcast %cst_16 : f32 to vector<16x1xf32>
    %31 = arith.divf %29, %30 : vector<16x1xf32>
    %cst_17 = arith.constant 9.99999996E-13 : f32
    %32 = vector.broadcast %cst_17 : f32 to vector<16x1xf32>
    %33 = arith.addf %31, %32 : vector<16x1xf32>
    %34 = math.rsqrt %33 : vector<16x1xf32>
    %35 = vector.broadcast %34 : vector<16x1xf32> to vector<16x64xf32>
    %36 = arith.mulf %26, %35 : vector<16x64xf32>
    %c0_18 = arith.constant 0 : index
    %c0_19 = arith.constant 0 : index
    %37 = vector.load %arg5[%c0_18, %c0_19] : memref<1x64xf32, #tpu.memory_space<vmem>>, vector<1x64xf32>
    %38 = vector.broadcast %37 : vector<1x64xf32> to vector<16x64xf32>
    %39 = arith.mulf %36, %38 : vector<16x64xf32>
    %c0_20 = arith.constant 0 : index
    %c0_21 = arith.constant 0 : index
    %40 = vector.load %arg6[%c0_20, %c0_21] : memref<1x64xf32, #tpu.memory_space<vmem>>, vector<1x64xf32>
    %41 = vector.broadcast %40 : vector<1x64xf32> to vector<16x64xf32>
    %42 = arith.addf %39, %41 : vector<16x64xf32>
    %43 = arith.truncf %42 : vector<16x64xf32> to vector<16x64xbf16>
    %c0_22 = arith.constant 0 : index
    %c0_23 = arith.constant 0 : index
    %44 = vector.load %arg7[%c0_22, %c0_23] : memref<64x192xbf16, #tpu.memory_space<vmem>>, vector<64x192xbf16>
    %cst_24 = arith.constant dense<0.000000e+00> : vector<16x192xf32>
    %45 = tpu.matmul %43, %44, %cst_24 {dimension_numbers = #tpu.dot_dimension_numbers<[1], [0], [0], [1], [0, 0, 1, 1], [], []>} : vector<16x64xbf16>, vector<64x192xbf16>, vector<16x192xf32> -> vector<16x192xf32>
    %c0_25 = arith.constant 0 : index
    %c0_26 = arith.constant 0 : index
    %46 = vector.load %arg8[%c0_25, %c0_26] : memref<1x192xf32, #tpu.memory_space<vmem>>, vector<1x192xf32>
    %47 = vector.broadcast %46 : vector<1x192xf32> to vector<16x192xf32>
    %48 = arith.addf %45, %47 : vector<16x192xf32>
    %49 = arith.truncf %48 : vector<16x192xf32> to vector<16x192xbf16>
    %c0_27 = arith.constant 0 : index
    %c0_28 = arith.constant 0 : index
    %c0_29 = arith.constant 0 : index
    %50 = vector.load %arg10[%c0_27, %c0_28, %c0_29] : memref<1x16x192xbf16, #tpu.memory_space<vmem>>, vector<1x16x192xbf16>
    %51 = vector.shape_cast %50 : vector<1x16x192xbf16> to vector<16x192xbf16>
    %52 = vector.shape_cast %49 : vector<16x192xbf16> to vector<1x16x192xbf16>
    tpu.vector_store %arg10[%c0_27, %c0_28, %c0_29], %52 {strides = array<i32>} : memref<1x16x192xbf16, #tpu.memory_space<vmem>>, vector<1x16x192xbf16>,
    return
  }
  func.func @transform_0(%arg0: i32) -> (i32, i32, i32) {
    %c0_i32 = arith.constant 0 : i32
    %c0_i32_0 = arith.constant 0 : i32
    %c0_i32_1 = arith.constant 0 : i32
    return %arg0, %c0_i32, %c0_i32_0 : i32, i32, i32
  }
  func.func @transform_1(%arg0: i32) -> (i32, i32) {
    %c0_i32 = arith.constant 0 : i32
    %c0_i32_0 = arith.constant 0 : i32
    %c0_i32_1 = arith.constant 0 : i32
    return %c0_i32, %c0_i32_0 : i32, i32
  }
  func.func @transform_2(%arg0: i32) -> (i32, i32) {
    %c0_i32 = arith.constant 0 : i32
    %c0_i32_0 = arith.constant 0 : i32
    %c0_i32_1 = arith.constant 0 : i32
    return %c0_i32, %c0_i32_0 : i32, i32
  }
  func.func @transform_3(%arg0: i32) -> (i32, i32, i32) {
    %c0_i32 = arith.constant 0 : i32
    %c0_i32_0 = arith.constant 0 : i32
    %c0_i32_1 = arith.constant 0 : i32
    return %arg0, %c0_i32, %c0_i32_0 : i32, i32, i32
  }
  func.func @transform_4(%arg0: i32) -> (i32, i32) {
    %c0_i32 = arith.constant 0 : i32
    %c0_i32_0 = arith.constant 0 : i32
    %c0_i32_1 = arith.constant 0 : i32
    return %c0_i32, %c0_i32_0 : i32, i32
  }
  func.func @transform_5(%arg0: i32) -> (i32, i32) {
    %c0_i32 = arith.constant 0 : i32
    %c0_i32_0 = arith.constant 0 : i32
    %c0_i32_1 = arith.constant 0 : i32
    return %c0_i32, %c0_i32_0 : i32, i32
  }
  func.func @transform_6(%arg0: i32) -> (i32, i32) {
    %c0_i32 = arith.constant 0 : i32
    %c0_i32_0 = arith.constant 0 : i32
    %c0_i32_1 = arith.constant 0 : i32
    return %c0_i32, %c0_i32_0 : i32, i32
  }
  func.func @transform_7(%arg0: i32) -> (i32, i32) {
    %c0_i32 = arith.constant 0 : i32
    %c0_i32_0 = arith.constant 0 : i32
    %c0_i32_1 = arith.constant 0 : i32
    return %c0_i32, %c0_i32_0 : i32, i32
  }
  func.func @transform_8(%arg0: i32) -> (i32, i32, i32) {
    %c0_i32 = arith.constant 0 : i32
    %c0_i32_0 = arith.constant 0 : i32
    %c0_i32_1 = arith.constant 0 : i32
    return %arg0, %c0_i32, %c0_i32_0 : i32, i32, i32
  }
  func.func @transform_9(%arg0: i32) -> (i32, i32, i32) {
    %c0_i32 = arith.constant 0 : i32
    %c0_i32_0 = arith.constant 0 : i32
    %c0_i32_1 = arith.constant 0 : i32
    return %arg0, %c0_i32, %c0_i32_0 : i32, i32, i32
  }
}

module attributes {stable_mosaic.version = 11 : i64} {
  func.func @_linear_kernel(%arg0: i32, %arg1: memref<32x128xf32, #tpu.memory_space<vmem>>, %arg2: memref<128x64xbf16, #tpu.memory_space<vmem>>, %arg3: memref<1x64xf32, #tpu.memory_space<vmem>>, %arg4: memref<32x64xf32, #tpu.memory_space<vmem>>) attributes {dimension_semantics = [#tpu.dimension_semantics<parallel>], iteration_bounds = array<i64: 1>, scalar_prefetch = 0 : i64, scratch_operands = 0 : i64, tpu.core_type = #tpu.core_type<tc>, window_params = [{transform_indices = @transform_0, window_bounds = array<i64: 32, 128>}, {pipeline_mode = #tpu.pipeline_mode<synchronous>, transform_indices = @transform_1, window_bounds = array<i64: 128, 64>}, {pipeline_mode = #tpu.pipeline_mode<synchronous>, transform_indices = @transform_2, window_bounds = array<i64: 1, 64>}, {transform_indices = @transform_3, window_bounds = array<i64: 32, 64>}]} {
    %c0 = arith.constant 0 : index
    %c0_0 = arith.constant 0 : index
    %0 = vector.load %arg1[%c0, %c0_0] : memref<32x128xf32, #tpu.memory_space<vmem>>, vector<32x128xf32>
    %1 = arith.truncf %0 : vector<32x128xf32> to vector<32x128xbf16>
    %c0_1 = arith.constant 0 : index
    %c0_2 = arith.constant 0 : index
    %2 = vector.load %arg2[%c0_1, %c0_2] : memref<128x64xbf16, #tpu.memory_space<vmem>>, vector<128x64xbf16>
    %cst = arith.constant dense<0.000000e+00> : vector<32x64xf32>
    %3 = tpu.matmul %1, %2, %cst {dimension_numbers = #tpu.dot_dimension_numbers<[1], [0], [0], [1], [0, 0, 1, 1], [], []>} : vector<32x128xbf16>, vector<128x64xbf16>, vector<32x64xf32> -> vector<32x64xf32>
    %c0_3 = arith.constant 0 : index
    %c0_4 = arith.constant 0 : index
    %4 = vector.load %arg3[%c0_3, %c0_4] : memref<1x64xf32, #tpu.memory_space<vmem>>, vector<1x64xf32>
    %5 = vector.broadcast %4 : vector<1x64xf32> to vector<32x64xf32>
    %6 = arith.addf %3, %5 : vector<32x64xf32>
    %c0_5 = arith.constant 0 : index
    %c0_6 = arith.constant 0 : index
    %7 = vector.load %arg4[%c0_5, %c0_6] : memref<32x64xf32, #tpu.memory_space<vmem>>, vector<32x64xf32>
    tpu.vector_store %arg4[%c0_5, %c0_6], %6 {strides = array<i32>} : memref<32x64xf32, #tpu.memory_space<vmem>>, vector<32x64xf32>,
    return
  }
  func.func @transform_0(%arg0: i32) -> (i32, i32) {
    %c0_i32 = arith.constant 0 : i32
    %c0_i32_0 = arith.constant 0 : i32
    return %arg0, %c0_i32 : i32, i32
  }
  func.func @transform_1(%arg0: i32) -> (i32, i32) {
    %c0_i32 = arith.constant 0 : i32
    %c0_i32_0 = arith.constant 0 : i32
    %c0_i32_1 = arith.constant 0 : i32
    return %c0_i32, %c0_i32_0 : i32, i32
  }
  func.func @transform_2(%arg0: i32) -> (i32, i32) {
    %c0_i32 = arith.constant 0 : i32
    %c0_i32_0 = arith.constant 0 : i32
    %c0_i32_1 = arith.constant 0 : i32
    return %c0_i32, %c0_i32_0 : i32, i32
  }
  func.func @transform_3(%arg0: i32) -> (i32, i32) {
    %c0_i32 = arith.constant 0 : i32
    %c0_i32_0 = arith.constant 0 : i32
    return %arg0, %c0_i32 : i32, i32
  }
}

</mosaic_0001>

<bundles_post_ra>
// kernel: text_encoder_forward.11
= control target key start
LH: loop header
LB: loop body
LE: loop exit
PB: predicated region body
PF: predicated region fallthrough
CT: control target
= control target key end

     0   :  { %vm60_vm0 = vcmask 523264   ;;  %s212_s1 = inlined_call_operand.vmem [shape: bf16[64,128], index: 1, kind: input, shape index: {}]   ;;  %s213_s0 = inlined_call_operand.vmem [shape: f32[32,64], index: 0, kind: input, shape index: {}]   ;;  %s214_s2 = inlined_call_operand.vmem [shape: f32[1,128], index: 2, kind: input, shape index: {}]   ;;  %s215_s3 = inlined_call_operand.vmem [shape: f32[32,128], index: 3, kind: output, shape index: {}]  }
   0x1   :  { %v149_v0 = vld [vmem:[%s212_s1] sm:$0xff]   ;;  %v150_v1 = vld [vmem:[%s212_s1 + $0x8] sm:$0xff]   ;;  %v151_v2 = vld [vmem:[%s212_s1 + $0x10] sm:$0xff]  }
   0x2   :  { %137 = vmatprep.subr.bf16.mxu0 %v149_v0  ;;  %v15_v3 = vld [vmem:[%s213_s0] sm:$0xff]  ;;  %v16_v4 = vld [vmem:[%s213_s0 + $0x8] sm:$0xff]  ;;  %v152_v6 = vld [vmem:[%s212_s1 + $0x18] sm:$0xff]  }
   0x3   :  { %138 = vmatpush3.bf16.msra.mxu0 %v149_v0  ;;  %v19_v5 = vpack.c.bf16 %v16_v4, %v15_v3  ;;  %v17_v7 = vld [vmem:[%s213_s0 + $0x10] sm:$0xff]  ;;  %v18_v8 = vld [vmem:[%s213_s0 + $0x18] sm:$0xff]  ;;  %v124_v10 = vld [vmem:[%s214_s2] ss:$0 sm:$0xff] }
   0x4   :  { %139 = vmatprep.subr.bf16.mxu0 %v150_v1  ;;  %v20_v9 = vpack.c.bf16 %v18_v8, %v17_v7 }
   0x5   :  { %145 = vmatprep.mubr.msk.bf16.mxu0 %vm60_vm0, %v19_v5 }
   0x7   :  { %140 = vmatpush3.bf16.msra.mxu0 %v150_v1 }
   0x8   :  { %141 = vmatprep.subr.bf16.mxu0 %v151_v2 }
   0xb   :  { %142 = vmatpush3.bf16.msra.mxu0 %v151_v2 }
   0xc   :  { %143 = vmatprep.subr.bf16.mxu0 %v152_v6 }
   0xf   :  { %144 = vmatpush3.bf16.msra.mxu0 %v152_v6 }
  0x12   :  { %146 = vmatmul.mubr.msk.bf16.vlgmr.msra.gmra.mrb[0].mxu0 %vm60_vm0, %v20_v9 }
  0xe5   :  { %v147_v11 = vpop.f32.mrb[0].mxu0 }
  0xe6   :  { %v110_v12 = vadd.f32 %v147_v11, %v124_v10  ;;  %v101_v13 = vpop.f32.mrb[1].mxu0 }
  0xe7   :  { %v102_v14 = vadd.f32 %v124_v10, %v101_v13  ;;  %v148_v15 = vpop.f32.mrb[2].mxu0 }
  0xe8   :  { %118 = vst [vmem:[%s215_s3 + $0x10] sm:$0xff] %v110_v12  ;;  %v113_v16 = vadd.f32 %v148_v15, %v124_v10  ;;  %v104_v17 = vpop.f32.mrb[3].mxu0 }
  0xe9   :  { %116 = vst [vmem:[%s215_s3] sm:$0xff] %v102_v14  ;;  %v105_v18 = vadd.f32 %v124_v10, %v104_v17 }
  0xea   :  { %119 = vst [vmem:[%s215_s3 + $0x18] sm:$0xff] %v113_v16 }
  0xeb   :  { %117 = vst [vmem:[%s215_s3 + $0x8] sm:$0xff] %v105_v18 }

// kernel: text_encoder_forward.12
= control target key start
LH: loop header
LB: loop body
LE: loop exit
PB: predicated region body
PF: predicated region fallthrough
CT: control target
= control target key end

     0   :  { %vm25_vm0 = vcmask 523264   ;;  %v306_v36 = vmov 0   ;;  %vm246_vm1 = vcmask 1043456   ;;  %vm247_vm2 = vcmask 523268   ;;  %s436_s0 = inlined_call_operand.vmem [shape: f32[32,64], index: 0, kind: input, shape index: {}]   ;;  %s437_s3 = inlined_call_operand.vmem [shape: bf16[64,192], index: 3, kind: input, shape index: {}]   ;;  %s438_s1 = inlined_call_operand.vmem [shape: f32[1,64], index: 1, kind: input, shape index: {}]   ;;  %s439_s2 = inlined_call_operand.vmem [shape: f32[1,64], index: 2, kind: input, shape index: {}]   ;;  %s440_s4 = inlined_call_operand.vmem [shape: f32[1,192], index: 4, kind: input, shape index: {}]   ;;  %s441_s5 = inlined_call_operand.vmem [shape: bf16[32,192], index: 5, kind: output, shape index: {}]  }
   0x1   :  { %v21_v0 = vld [vmem:[%s436_s0] sm:$0xff]  ;;  %v23_v1 = vld [vmem:[%s436_s0 + $0x10] sm:$0xff]  ;;  %v22_v2 = vld [vmem:[%s436_s0 + $0x8] sm:$0xff]  ;;  %201 = vmatprep.mubr.bf16.mxu0 %v306_v36  ;;  %211 = vmatprep.mubr.bf16.mxu1 %v306_v36 }
   0x2   :  { %v26_v3 = vsel %vm25_vm0, %v21_v0, 0.0  ;;  %v32_v4 = vsel %vm25_vm0, %v23_v1, 0.0  ;;  %v24_v5 = vld [vmem:[%s436_s0 + $0x18] sm:$0xff]  ;;  %v29_v6 = vsel %vm25_vm0, %v22_v2, 0.0  ;;  %v286_v28 = vld [vmem:[%s437_s3 + $0x4] ss:$8 sps:$4 sm:$0xff]   ;;  %vm412_vm3 = vmor %vm247_vm2, %vm246_vm1 }
   0x3   :  { %27 = vadd.xlane.f32.xlu0 %v26_v3  ;;  %33 = vadd.xlane.f32.xlu1 %v32_v4  ;;  %v35_v7 = vsel %vm25_vm0, %v24_v5, 0.0  ;;  %v288_v29 = vld [vmem:[%s437_s3] ss:$8 sps:$4 sm:$0xff]   ;;  %v289_v30 = vld [vmem:[%s437_s3 + $0x14] ss:$8 sps:$4 sm:$0xff]  }
   0x4   :  { %169 = vmatprep.subr.bf16.mxu0 %v286_v28  ;;  %277 = vmatprep.subr.bf16.mxu1 %v286_v28  ;;  %v291_v31 = vld [vmem:[%s437_s3 + $0x10] ss:$8 sps:$4 sm:$0xff]   ;;  %v292_v32 = vld [vmem:[%s437_s3 + $0x24] ss:$8 sps:$4 sm:$0xff]   ;;  %v294_v33 = vld [vmem:[%s437_s3 + $0x20] ss:$8 sps:$4 sm:$0xff]  }
   0x5   :  { %170 = vmatpush1.bf16.msra.mxu0 %v288_v29  ;;  %281 = vmatpush1.bf16.msra.mxu1 %v288_v29  ;;  %v295_v34 = vld [vmem:[%s437_s3 + $0x34] ss:$8 sps:$4 sm:$0xff]   ;;  %v297_v35 = vld [vmem:[%s437_s3 + $0x30] ss:$8 sps:$4 sm:$0xff]   ;;  %v257_v51 = vld [vmem:[%s438_s1] ss:$0 sm:$0xff] }
   0x6   :  { %171 = vmatprep.subr.bf16.mxu0 %v289_v30  ;;  %278 = vmatprep.subr.bf16.mxu1 %v289_v30  ;;  %v258_v57 = vld [vmem:[%s439_s2] ss:$0 sm:$0xff] }
   0x7   :  { %30 = vadd.xlane.f32.xlu0 %v29_v6  ;;  %36 = vadd.xlane.f32.xlu1 %v35_v7 }
   0x9   :  { %172 = vmatpush1.bf16.msra.mxu0 %v291_v31  ;;  %282 = vmatpush1.bf16.msra.mxu1 %v291_v31 }
   0xa   :  { %173 = vmatprep.subr.bf16.mxu0 %v292_v32  ;;  %279 = vmatprep.subr.bf16.mxu1 %v292_v32 }
   0xd   :  { %174 = vmatpush1.bf16.msra.mxu0 %v294_v33  ;;  %283 = vmatpush1.bf16.msra.mxu1 %v294_v33 }
   0xe   :  { %175 = vmatprep.subr.bf16.mxu0 %v295_v34  ;;  %280 = vmatprep.subr.bf16.mxu1 %v295_v34 }
  0x11   :  { %176 = vmatpush1.bf16.msra.mxu0 %v297_v35  ;;  %284 = vmatpush1.bf16.msra.mxu1 %v297_v35 }
  0x90   :  { %v28_v8 = vpop.xlane.xlu0 %27  ;;  %v34_v9 = vpop.xlane.xlu1 %33 }
  0x91   :  { %v39_v10 = vmul.f32 0.015625, %v28_v8  ;;  %v41_v11 = vmul.f32 0.015625, %v34_v9  ;;  %v111_v8 = vld [vmem:[%s440_s4] sm:$0x3] }
  0x93   :  { %v353_v12 = vsub.f32 %v21_v0, %v39_v10  ;;  %v355_v13 = vsub.f32 %v23_v1, %v41_v11 }
  0x94   :  { %v31_v14 = vpop.xlane.xlu0 %30  ;;  %v37_v15 = vpop.xlane.xlu1 %36 }
  0x95   :  { %v40_v16 = vmul.f32 0.015625, %v31_v14  ;;  %v42_v17 = vmul.f32 0.015625, %v37_v15  ;;  %v47_v18 = vmul.f32 %v353_v12, %v353_v12  ;;  %v49_v19 = vmul.f32 %v355_v13, %v355_v13 }
  0x97   :  { %v361_v20 = vsub.f32 %v22_v2, %v40_v16  ;;  %v363_v21 = vsub.f32 %v24_v5, %v42_v17  ;;  %v51_v22 = vsel %vm25_vm0, %v47_v18, 0.0  ;;  %v57_v23 = vsel %vm25_vm0, %v49_v19, 0.0 }
  0x98   :  { %52 = vadd.xlane.f32.xlu0 %v51_v22  ;;  %v113_v5 = vlaneseq }
  0x99   :  { %v48_v24 = vmul.f32 %v361_v20, %v361_v20  ;;  %v50_v25 = vmul.f32 %v363_v21, %v363_v21 }
  0x9a   :  { %v114_v6 = vshrl.u32 %v113_v5, 7 }
  0x9b   :  { %v54_v26 = vsel %vm25_vm0, %v48_v24, 0.0  ;;  %v60_v27 = vsel %vm25_vm0, %v50_v25, 0.0 }
  0x9c   :  { %58 = vadd.xlane.f32.xlu0 %v57_v23  ;;  %55 = vadd.xlane.f32.xlu1 %v54_v26  ;;  %v115_v7 = vsub.s32 0, %v114_v6  ;;  %v119_v9 = vsub.s32 1, %v114_v6 }
  0x9e   :  { %v116_v10 = vrot.slane %v111_v8, %v115_v7  ;;  %v120_v11 = vrot.slane %v111_v8, %v119_v9 }
  0xa0   :  { %61 = vadd.xlane.f32.xlu1 %v60_v27 }
 0x125   :  { %v53_v37 = vpop.xlane.xlu0 %52 }
 0x126   :  { %v63_v38 = vmul.f32 0.015625, %v53_v37 }
 0x128   :  { %v67_v39 = vadd.f32 1e-12, %v63_v38 }
 0x129   :  { %v56_v40 = vpop.xlane.xlu1 %55  ;;  %v59_v41 = vpop.xlane.xlu0 %58 }
 0x12a   :  { %298 = vrsqrt.f32 %v67_v39  ;;  %v64_v42 = vmul.f32 0.015625, %v56_v40  ;;  %v65_v43 = vmul.f32 0.015625, %v59_v41 }
 0x12c   :  { %v68_v44 = vadd.f32 1e-12, %v64_v42  ;;  %v69_v45 = vadd.f32 1e-12, %v65_v43 }
 0x12d   :  { %v62_v46 = vpop.xlane.xlu1 %61 }
 0x12e   :  { %300 = vrsqrt.f32 %v68_v44  ;;  %v66_v47 = vmul.f32 0.015625, %v62_v46 }
 0x12f   :  { %302 = vrsqrt.f32 %v69_v45 }
 0x130   :  { %v70_v48 = vadd.f32 1e-12, %v66_v47 }
 0x132   :  { %304 = vrsqrt.f32 %v70_v48 }
 0x134   :  { %v299_v49 = vpop.eup %298 }
 0x135   :  { %v75_v50 = vmul.f32 %v299_v49, %v353_v12 }
 0x137   :  { %v86_v55 = vmul.f32 %v257_v51, %v75_v50 }
 0x138   :  { %v301_v52 = vpop.eup %300 }
 0x139   :  { %v303_v53 = vpop.eup %302  ;;  %v76_v54 = vmul.f32 %v301_v52, %v361_v20  ;;  %v97_v61 = vadd.f32 %v258_v57, %v86_v55 }
 0x13a   :  { %v77_v56 = vmul.f32 %v303_v53, %v355_v13 }
 0x13b   :  { %v87_v58 = vmul.f32 %v257_v51, %v76_v54 }
 0x13c   :  { %v305_v59 = vpop.eup %304  ;;  %v88_v63 = vmul.f32 %v257_v51, %v77_v56 }
 0x13d   :  { %v78_v60 = vmul.f32 %v305_v59, %v363_v21  ;;  %v98_v62 = vadd.f32 %v258_v57, %v87_v58 }
 0x13e   :  { %v99_v2 = vadd.f32 %v258_v57, %v88_v63 }
 0x13f   :  { %v101_v0 = vpack.c.bf16 %v98_v62, %v97_v61  ;;  %v89_v1 = vmul.f32 %v257_v51, %v78_v60 }
 0x141   :  { %267 = vmatmul.mubr.msk.bf16.vlgmr.msra.gmra.mrb[0].mxu0 %vm25_vm0, %v101_v0  ;;  %v100_v3 = vadd.f32 %v258_v57, %v89_v1 }
 0x143   :  { %v102_v4 = vpack.c.bf16 %v100_v3, %v99_v2 }
 0x145   :  { %268 = vmatmul.mubr.msk.bf16.vlgmr.msra.gmra.mrb[0].mxu1 %vm25_vm0, %v102_v4 }
 0x214   :  { %v203_v12 = vpop.f32.mrb[0].mxu0 }
 0x215   :  { %v204_v13 = vadd.f32 %v203_v12, %v116_v10  ;;  %v205_v14 = vpop.f32.mrb[1].mxu0 }
 0x216   :  { %v206_v15 = vadd.f32 %v205_v14, %v120_v11  ;;  %v207_v16 = vpop.f32.mrb[2].mxu0 }
 0x217   :  { %v208_v18 = vadd.f32 %v207_v16, %v116_v10  ;;  %v209_v19 = vpop.f32.mrb[3].mxu0 }
 0x218   :  { %v273_v20 = vpack.c.bf16 %v206_v15, %v204_v13  ;;  %v210_v21 = vadd.f32 %v209_v19, %v120_v11  ;;  %v213_v22 = vpop.f32.mrb[0].mxu1 }
 0x219   :  { %v214_v23 = vadd.f32 %v213_v22, %v116_v10  ;;  %v215_v24 = vpop.f32.mrb[1].mxu1 }
 0x21a   :  { %249 = vst.msk [vmem:[%s441_s5] sm:$0xff] %vm412_vm3, %v273_v20  ;;  %v274_v25 = vpack.c.bf16 %v210_v21, %v208_v18  ;;  %v216_v26 = vadd.f32 %v215_v24, %v120_v11  ;;  %v217_v27 = vpop.f32.mrb[2].mxu1 }
 0x21b   :  { %v218_v28 = vadd.f32 %v217_v27, %v116_v10  ;;  %v219_v29 = vpop.f32.mrb[3].mxu1 }
 0x21c   :  { %250 = vst.msk [vmem:[%s441_s5 + $0x8] sm:$0xff] %vm412_vm3, %v274_v25  ;;  %v275_v30 = vpack.c.bf16 %v216_v26, %v214_v23  ;;  %v220_v31 = vadd.f32 %v219_v29, %v120_v11 }
 0x21e   :  { %251 = vst.msk [vmem:[%s441_s5 + $0x10] sm:$0xff] %vm412_vm3, %v275_v30  ;;  %v276_v32 = vpack.c.bf16 %v220_v31, %v218_v28 }
 0x220   :  { %252 = vst.msk [vmem:[%s441_s5 + $0x18] sm:$0xff] %vm412_vm3, %v276_v32 }

// kernel: text_encoder_forward.10
= control target key start
LH: loop header
LB: loop body
LE: loop exit
PB: predicated region body
PF: predicated region fallthrough
CT: control target
= control target key end

     0   :  { %s708_s1 = inlined_call_operand.vmem [shape: bf16[512,128], index: 1, kind: input, shape index: {}]   ;;  %s709_s0 = inlined_call_operand.vmem [shape: f32[32,512], index: 0, kind: input, shape index: {}]   ;;  %s710_s2 = inlined_call_operand.vmem [shape: f32[1,128], index: 2, kind: input, shape index: {}]   ;;  %s711_s3 = inlined_call_operand.vmem [shape: f32[32,128], index: 3, kind: output, shape index: {}]  }
   0x1   :  { %v497_v0 = vld [vmem:[%s708_s1 + $0x40] sm:$0xff]   ;;  %v501_v4 = vld [vmem:[%s708_s1 + $0x48] sm:$0xff]   ;;  %v505_v8 = vld [vmem:[%s708_s1 + $0x50] sm:$0xff]  }
   0x2   :  { %v498_v1 = vld [vmem:[%s708_s1 + $0xc0] sm:$0xff]   ;;  %441 = vmatprep.subr.bf16.mxu0 %v497_v0  ;;  %v502_v5 = vld [vmem:[%s708_s1 + $0xc8] sm:$0xff]   ;;  %v506_v9 = vld [vmem:[%s708_s1 + $0xd0] sm:$0xff]  }
   0x3   :  { %v499_v2 = vld [vmem:[%s708_s1] sm:$0xff]   ;;  %469 = vmatprep.subr.bf16.mxu1 %v498_v1  ;;  %v503_v6 = vld [vmem:[%s708_s1 + $0x8] sm:$0xff]   ;;  %v507_v10 = vld [vmem:[%s708_s1 + $0x10] sm:$0xff]  }
   0x4   :  { %v500_v3 = vld [vmem:[%s708_s1 + $0x80] sm:$0xff]   ;;  %442 = vmatpush3.bf16.msra.mxu0 %v499_v2  ;;  %v504_v7 = vld [vmem:[%s708_s1 + $0x88] sm:$0xff]   ;;  %v508_v11 = vld [vmem:[%s708_s1 + $0x90] sm:$0xff]  }
   0x5   :  { %470 = vmatpush3.bf16.msra.mxu1 %v500_v3  ;;  %443 = vmatprep.subr.bf16.mxu0 %v501_v4  ;;  %v509_v12 = vld [vmem:[%s708_s1 + $0x58] sm:$0xff]   ;;  %v513_v16 = vld [vmem:[%s708_s1 + $0x60] sm:$0xff]   ;;  %v517_v20 = vld [vmem:[%s708_s1 + $0x68] sm:$0xff]  }
   0x6   :  { %471 = vmatprep.subr.bf16.mxu1 %v502_v5  ;;  %v510_v13 = vld [vmem:[%s708_s1 + $0xd8] sm:$0xff]   ;;  %v514_v17 = vld [vmem:[%s708_s1 + $0xe0] sm:$0xff]   ;;  %v518_v21 = vld [vmem:[%s708_s1 + $0xe8] sm:$0xff]  }
   0x7   :  { %v511_v14 = vld [vmem:[%s708_s1 + $0x18] sm:$0xff]   ;;  %v515_v18 = vld [vmem:[%s708_s1 + $0x20] sm:$0xff]   ;;  %v519_v22 = vld [vmem:[%s708_s1 + $0x28] sm:$0xff]  }
   0x8   :  { %444 = vmatpush3.bf16.msra.mxu0 %v503_v6  ;;  %v512_v15 = vld [vmem:[%s708_s1 + $0x98] sm:$0xff]   ;;  %v516_v19 = vld [vmem:[%s708_s1 + $0xa0] sm:$0xff]   ;;  %v520_v23 = vld [vmem:[%s708_s1 + $0xa8] sm:$0xff]  }
   0x9   :  { %472 = vmatpush3.bf16.msra.mxu1 %v504_v7  ;;  %445 = vmatprep.subr.bf16.mxu0 %v505_v8  ;;  %v521_v24 = vld [vmem:[%s708_s1 + $0x70] sm:$0xff]   ;;  %v525_v28 = vld [vmem:[%s708_s1 + $0x78] sm:$0xff]   ;;  %v16_v32 = vld [vmem:[%s709_s0 + $0x8] sm:$0xff] }
   0xa   :  { %473 = vmatprep.subr.bf16.mxu1 %v506_v9  ;;  %v522_v25 = vld [vmem:[%s708_s1 + $0xf0] sm:$0xff]   ;;  %v526_v29 = vld [vmem:[%s708_s1 + $0xf8] sm:$0xff]   ;;  %v20_v33 = vld [vmem:[%s709_s0 + $0x28] sm:$0xff] }
   0xb   :  { %v523_v26 = vld [vmem:[%s708_s1 + $0x30] sm:$0xff]   ;;  %v527_v30 = vld [vmem:[%s708_s1 + $0x38] sm:$0xff]   ;;  %v32_v35 = vpack.c.bf16 %v20_v33, %v16_v32  ;;  %v15_v37 = vld [vmem:[%s709_s0] sm:$0xff] }
   0xc   :  { %446 = vmatpush3.bf16.msra.mxu0 %v507_v10  ;;  %v524_v27 = vld [vmem:[%s708_s1 + $0xb0] sm:$0xff]   ;;  %v528_v31 = vld [vmem:[%s708_s1 + $0xb8] sm:$0xff]   ;;  %v19_v38 = vld [vmem:[%s709_s0 + $0x20] sm:$0xff] }
   0xd   :  { %474 = vmatpush3.bf16.msra.mxu1 %v508_v11  ;;  %447 = vmatprep.subr.bf16.mxu0 %v509_v12  ;;  %v18_v34 = vld [vmem:[%s709_s0 + $0x18] sm:$0xff]  ;;  %v31_v40 = vpack.c.bf16 %v19_v38, %v15_v37  ;;  %v17_v41 = vld [vmem:[%s709_s0 + $0x10] sm:$0xff]  ;;  %v24_v43 = vld [vmem:[%s709_s0 + $0x48] sm:$0xff] }
   0xe   :  { %475 = vmatprep.subr.bf16.mxu1 %v510_v13  ;;  %v22_v36 = vld [vmem:[%s709_s0 + $0x38] sm:$0xff]  ;;  %v21_v42 = vld [vmem:[%s709_s0 + $0x30] sm:$0xff]  ;;  %334 = vmatprep.mubr.bf16.mxu0 %v32_v35  ;;  %v28_v45 = vld [vmem:[%s709_s0 + $0x68] sm:$0xff] }
   0xf   :  { %v34_v39 = vpack.c.bf16 %v22_v36, %v18_v34  ;;  %v33_v44 = vpack.c.bf16 %v21_v42, %v17_v41  ;;  %v26_v46 = vld [vmem:[%s709_s0 + $0x58] sm:$0xff]  ;;  %v36_v48 = vpack.c.bf16 %v28_v45, %v24_v43  ;;  %v23_v50 = vld [vmem:[%s709_s0 + $0x40] sm:$0xff]  ;;  %v25_v52 = vld [vmem:[%s709_s0 + $0x50] sm:$0xff] }
  0x10   :  { %448 = vmatpush3.bf16.msra.mxu0 %v511_v14  ;;  %v30_v47 = vld [vmem:[%s709_s0 + $0x78] sm:$0xff]  ;;  %v27_v51 = vld [vmem:[%s709_s0 + $0x60] sm:$0xff]  ;;  %v29_v53 = vld [vmem:[%s709_s0 + $0x70] sm:$0xff] }
  0x11   :  { %476 = vmatpush3.bf16.msra.mxu1 %v512_v15  ;;  %449 = vmatprep.subr.bf16.mxu0 %v513_v16  ;;  %v38_v49 = vpack.c.bf16 %v30_v47, %v26_v46  ;;  %v35_v54 = vpack.c.bf16 %v27_v51, %v23_v50  ;;  %v37_v55 = vpack.c.bf16 %v29_v53, %v25_v52  ;;  %v408_v58 = vld [vmem:[%s710_s2] ss:$0 sm:$0xff] }
  0x12   :  { %477 = vmatprep.subr.bf16.mxu1 %v514_v17  ;;  %383 = vmatprep.mubr.bf16.mxu1 %v34_v39 }
  0x14   :  { %450 = vmatpush3.bf16.msra.mxu0 %v515_v18 }
  0x15   :  { %478 = vmatpush3.bf16.msra.mxu1 %v516_v19  ;;  %451 = vmatprep.subr.bf16.mxu0 %v517_v20 }
  0x16   :  { %479 = vmatprep.subr.bf16.mxu1 %v518_v21 }
  0x18   :  { %452 = vmatpush3.bf16.msra.mxu0 %v519_v22 }
  0x19   :  { %480 = vmatpush3.bf16.msra.mxu1 %v520_v23  ;;  %453 = vmatprep.subr.bf16.mxu0 %v521_v24 }
  0x1a   :  { %481 = vmatprep.subr.bf16.mxu1 %v522_v25 }
  0x1c   :  { %454 = vmatpush3.bf16.msra.mxu0 %v523_v26 }
  0x1d   :  { %482 = vmatpush3.bf16.msra.mxu1 %v524_v27  ;;  %455 = vmatprep.subr.bf16.mxu0 %v525_v28 }
  0x1e   :  { %483 = vmatprep.subr.bf16.mxu1 %v526_v29 }
  0x20   :  { %456 = vmatpush3.bf16.msra.mxu0 %v527_v30 }
  0x21   :  { %484 = vmatpush3.bf16.msra.mxu1 %v528_v31 }
  0x23   :  { %335 = vmatmul.mubr.bf16.vlgmr.msra.gmra.mrb[0].mxu0 %v31_v40 }
  0x24   :  { %384 = vmatmul.mubr.bf16.vlgmr.msra.gmra.mrb[0].mxu1 %v33_v44  ;;  %342 = vmatprep.mubr.bf16.mxu0 %v36_v48 }
  0x25   :  { %391 = vmatprep.mubr.bf16.mxu1 %v38_v49 }
  0x2b   :  { %343 = vmatmul.mubr.bf16.gmra.mrb[4].mxu0 %v35_v54 }
  0x2c   :  { %392 = vmatmul.mubr.bf16.gmra.mrb[4].mxu1 %v37_v55 }
  0xf6   :  { %v457_v56 = vpop.f32.mrb[0].mxu0 }
  0xf7   :  { %v485_v57 = vpop.f32.mrb[0].mxu1  ;;  %v458_v59 = vpop.f32.mrb[1].mxu0 }
  0xf8   :  { %v459_v60 = vadd.f32 %v458_v59, %v457_v56  ;;  %v486_v61 = vpop.f32.mrb[1].mxu1  ;;  %v460_v62 = vpop.f32.mrb[2].mxu0 }
  0xf9   :  { %v487_v63 = vadd.f32 %v486_v61, %v485_v57  ;;  %v488_v0 = vpop.f32.mrb[2].mxu1  ;;  %v461_v1 = vpop.f32.mrb[3].mxu0 }
  0xfa   :  { %v337_v2 = vadd.f32 %v459_v60, %v408_v58  ;;  %v462_v3 = vadd.f32 %v461_v1, %v460_v62  ;;  %v489_v4 = vpop.f32.mrb[3].mxu1 }
  0xfb   :  { %v490_v5 = vadd.f32 %v489_v4, %v488_v0 }
  0xfc   :  { %v386_v6 = vadd.f32 %v487_v63, %v337_v2  ;;  %v340_v7 = vadd.f32 %v462_v3, %v408_v58 }
  0xfe   :  { %400 = vst [vmem:[%s711_s3] sm:$0xff] %v386_v6  ;;  %v389_v8 = vadd.f32 %v490_v5, %v340_v7  ;;  %v463_v9 = vpop.f32.mrb[4].mxu0 }
  0xff   :  { %v491_v10 = vpop.f32.mrb[4].mxu1  ;;  %v464_v11 = vpop.f32.mrb[5].mxu0 }
 0x100   :  { %401 = vst [vmem:[%s711_s3 + $0x8] sm:$0xff] %v389_v8  ;;  %v465_v12 = vadd.f32 %v464_v11, %v463_v9  ;;  %v492_v13 = vpop.f32.mrb[5].mxu1  ;;  %v466_v14 = vpop.f32.mrb[6].mxu0 }
 0x101   :  { %v493_v15 = vadd.f32 %v492_v13, %v491_v10  ;;  %v494_v16 = vpop.f32.mrb[6].mxu1  ;;  %v467_v17 = vpop.f32.mrb[7].mxu0 }
 0x102   :  { %v345_v18 = vadd.f32 %v465_v12, %v408_v58  ;;  %v468_v19 = vadd.f32 %v467_v17, %v466_v14  ;;  %v495_v20 = vpop.f32.mrb[7].mxu1 }
 0x103   :  { %v496_v21 = vadd.f32 %v495_v20, %v494_v16 }
 0x104   :  { %v394_v22 = vadd.f32 %v493_v15, %v345_v18  ;;  %v348_v23 = vadd.f32 %v468_v19, %v408_v58 }
 0x106   :  { %402 = vst [vmem:[%s711_s3 + $0x10] sm:$0xff] %v394_v22  ;;  %v397_v24 = vadd.f32 %v496_v21, %v348_v23 }
 0x108   :  { %403 = vst [vmem:[%s711_s3 + $0x18] sm:$0xff] %v397_v24 }

// kernel: text_encoder_forward.14
= control target key start
LH: loop header
LB: loop body
LE: loop exit
PB: predicated region body
PF: predicated region fallthrough
CT: control target
= control target key end

     0   :  { %s623_s18 = smov 0   ;;  %s696_s0 = inlined_call_operand.vmem [shape: f32[2,16,64], index: 0, kind: input, shape index: {}]   ;;  %s697_s1 = inlined_call_operand.vmem [shape: f32[1,64], index: 1, kind: input, shape index: {}]   ;;  %s698_s2 = inlined_call_operand.vmem [shape: f32[1,64], index: 2, kind: input, shape index: {}]   ;;  %s699_s3 = inlined_call_operand.vmem [shape: bf16[192,128], index: 3, kind: input, shape index: {}]   ;;  %s700_s4 = inlined_call_operand.vmem [shape: f32[1,128], index: 4, kind: input, shape index: {}]   ;;  %s701_s5 = inlined_call_operand.vmem [shape: bf16[2,16,128], index: 5, kind: output, shape index: {}]  }
   0x1 LB: > { %s514_s19 = sadd.s32 4294967295, %s589_s18   ;;  %p518_p0 = scmp.ge.s32.totalorder %s589_s18, 1  ;;  %s589_s18 = sphi %s623_s18, %s15_s18  }
   0x2   : > { %p187_p1 = scmp.lt.s32.totalorder %s589_s18, 3 }
   0x4   : > { %p188_p2 = pnand %p518_p0, %p187_p1 }
   0x5   : > { %p215_p3 = scmp.lt.s32.totalorder (!%p188_p2), %s514_s19, 1  ;;  %vm228_vm0 = vcmask (!%p188_p2), 523264   ;;  %v567_v14 = vld [vmem:[%s699_s3] sm:$0xff] (!%p188_p2)   ;;  %v591_v15 = vmov (!%p188_p2), 0   ;;  %v568_v16 = vld [vmem:[%s699_s3 + $0x8] sm:$0xff] (!%p188_p2)   ;;  %v569_v17 = vld [vmem:[%s699_s3 + $0x10] sm:$0xff] (!%p188_p2)  }
   0x6   : > { %191 = sbr.rel (%p188_p2) target bundleno = 677 (0x2a5), region = 40  ;;  %406 = vmatprep.subr.bf16.mxu0 (!%p188_p2), %v591_v15  ;;  %v570_v18 = vld [vmem:[%s699_s3 + $0x18] sm:$0xff] (!%p188_p2)   ;;  %v571_v19 = vld [vmem:[%s699_s3 + $0x20] sm:$0xff] (!%p188_p2)   ;;  %v572_v20 = vld [vmem:[%s699_s3 + $0x28] sm:$0xff] (!%p188_p2)   ;;  %vm283_vm1 = vcmask (!%p188_p2), 1046528   ;;  %vm276_vm2 = vcmask (!%p188_p2), 1040384  }
   0x7   : > { %407 = vmatpush1.bf16.msra.mxu0 (!%p188_p2), %v567_v14  ;;  %v573_v21 = vld [vmem:[%s699_s3 + $0x30] sm:$0xff] (!%p188_p2)   ;;  %v574_v22 = vld [vmem:[%s699_s3 + $0x38] sm:$0xff] (!%p188_p2)   ;;  %v575_v23 = vld [vmem:[%s699_s3 + $0x40] sm:$0xff] (!%p188_p2)   ;;  %s592_s29 = smov (!%p188_p2), 64  }
   0x8   : > { %408 = vmatprep.subr.bf16.mxu0 (!%p188_p2), %v591_v15  ;;  %v576_v24 = vld [vmem:[%s699_s3 + $0x48] sm:$0xff] (!%p188_p2)   ;;  %v577_v25 = vld [vmem:[%s699_s3 + $0x50] sm:$0xff] (!%p188_p2)   ;;  %v523_v33 = vld [vmem:[%s697_s1] ss:$0 sm:$0xff] (!%p188_p2) }
   0x9   : > { %v578_v34 = vld [vmem:[%s699_s3 + $0x58] sm:$0xff] (!%p188_p2)   ;;  %v524_v37 = vld [vmem:[%s698_s2] ss:$0 sm:$0xff] (!%p188_p2) }
   0xa   : > { %v525_v59 = vld [vmem:[%s700_s4] ss:$0 sm:$0xff] (!%p188_p2) }
   0xb   : > { %409 = vmatpush1.bf16.msra.mxu0 (!%p188_p2), %v568_v16 }
   0xc   : > { %410 = vmatprep.subr.bf16.mxu0 (!%p188_p2), %v591_v15 }
   0xd   : > { %s703_s19 = smov (!%p215_p3, %s514_s19), 1 }
   0xe   : > { %s543_s20 = sshll.u32 %s703_s19, 4  ;;  %s544_s7 = sshll.u32 %s703_s19, 3 }
   0xf   : > { %s219_s23 = scalar_lea.vmem %s696_s0, %s543_s20  ;;  %411 = vmatpush1.bf16.msra.mxu0 %v569_v17  ;;  %s224_s10 = scalar_lea.vmem %s701_s5, %s544_s7 }
  0x10   : > { %v226_v0 = vld [vmem:[%s219_s23] sm:$0xff]  ;;  %v227_v1 = vld [vmem:[%s219_s23 + $0x8] sm:$0xff]  ;;  %412 = vmatprep.subr.bf16.mxu0 %v591_v15 }
  0x11   : > { %v229_v2 = vsel %vm228_vm0, %v226_v0, 0.0  ;;  %v232_v3 = vsel %vm228_vm0, %v227_v1, 0.0 }
  0x12   : > { %230 = vadd.xlane.f32.xlu0 %v229_v2 }
  0x13   : > { %413 = vmatpush1.bf16.msra.mxu0 %v570_v18 }
  0x14   : > { %414 = vmatprep.subr.bf16.mxu0 %v591_v15 }
  0x16   : > { %233 = vadd.xlane.f32.xlu0 %v232_v3 }
  0x17   : > { %415 = vmatpush1.bf16.msra.mxu0 %v571_v19 }
  0x18   : > { %416 = vmatprep.subr.bf16.mxu0 %v591_v15 }
  0x1b   : > { %417 = vmatpush1.bf16.msra.mxu0 %v572_v20 }
  0x1c   : > { %418 = vmatprep.subr.bf16.mxu0 %v591_v15 }
  0x1f   : > { %419 = vmatpush1.bf16.msra.mxu0 %v573_v21 }
  0x20   : > { %420 = vmatprep.subr.bf16.mxu0 %v591_v15 }
  0x23   : > { %421 = vmatpush1.bf16.msra.mxu0 %v574_v22 }
  0x24   : > { %422 = vmatprep.subr.bf16.mxu0 %v591_v15 }
  0x27   : > { %423 = vmatpush1.bf16.msra.mxu0 %v575_v23 }
  0x28   : > { %424 = vmatprep.subr.bf16.mxu0 %v591_v15 }
  0x2b   : > { %425 = vmatpush1.bf16.msra.mxu0 %v576_v24 }
  0x2c   : > { %426 = vmatprep.subr.bf16.mxu0 %v591_v15 }
  0x2f   : > { %427 = vmatpush1.bf16.msra.mxu0 %v577_v25 }
  0x30   : > { %428 = vmatprep.subr.bf16.mxu0 %v591_v15 }
  0x33   : > { %429 = vmatpush1.bf16.msra.mxu0 %v578_v34 }
  0x9f   : > { %v231_v4 = vpop.xlane.xlu0 %230 }
  0xa0   : > { %v236_v5 = vmul.f32 0.015625, %v231_v4 }
  0xa2   : > { %v238_v6 = vsub.f32 %v226_v0, %v236_v5 }
  0xa3   : > { %v234_v7 = vpop.xlane.xlu0 %233 }
  0xa4   : > { %v237_v8 = vmul.f32 0.015625, %v234_v7  ;;  %v240_v9 = vmul.f32 %v238_v6, %v238_v6 }
  0xa6   : > { %v239_v10 = vsub.f32 %v227_v1, %v237_v8  ;;  %v242_v11 = vsel %vm228_vm0, %v240_v9, 0.0 }
  0xa7   : > { %243 = vadd.xlane.f32.xlu1 %v242_v11 }
  0xa8   : > { %v241_v12 = vmul.f32 %v239_v10, %v239_v10 }
  0xaa   : > { %v245_v13 = vsel %vm228_vm0, %v241_v12, 0.0 }
  0xab   : > { %246 = vadd.xlane.f32.xlu1 %v245_v13 }
 0x134   : > { %v244_v26 = vpop.xlane.xlu1 %243 }
 0x135   : > { %v248_v27 = vmul.f32 0.015625, %v244_v26 }
 0x137   : > { %v250_v28 = vadd.f32 1e-12, %v248_v27 }
 0x138   : > { %v247_v29 = vpop.xlane.xlu1 %246 }
 0x139   : > { %579 = vrsqrt.f32 %v250_v28  ;;  %v249_v30 = vmul.f32 0.015625, %v247_v29 }
 0x13b   : > { %v251_v31 = vadd.f32 1e-12, %v249_v30 }
 0x13d   : > { %581 = vrsqrt.f32 %v251_v31 }
 0x143   : > { %v580_v32 = vpop.eup %579 }
 0x144   : > { %v254_v35 = vmul.f32 %v580_v32, %v238_v6 }
 0x146   : > { %v263_v36 = vmul.f32 %v523_v33, %v254_v35 }
 0x147   : > { %v582_v38 = vpop.eup %581 }
 0x148   : > { %v255_v39 = vmul.f32 %v582_v38, %v239_v10  ;;  %v272_v40 = vadd.f32 %v524_v37, %v263_v36 }
 0x14a   : > { %v264_v41 = vmul.f32 %v523_v33, %v255_v39  ;;  %v284_v43 = vrot.slane %v272_v40, 1  ;;  %v277_v46 = vrot.slane %v272_v40, 7 }
 0x14c   : > { %v273_v42 = vadd.f32 %v524_v37, %v264_v41  ;;  %v282_v55 = vsel %vm276_vm2, 0.0, %v277_v46 }
 0x14e   : > { %v562_v44 = vpack.i.bf16 %v273_v42, %v272_v40  ;;  %v285_v45 = vrot.slane %v273_v42, 1  ;;  %v278_v47 = vrot.slane %v273_v42, 7 }
 0x150   : > { %563 = vrot.lane.b32.xlu0 %v562_v44, %s592_s29  ;;  %v286_v48 = vsel %vm283_vm1, %v284_v43, %v285_v45  ;;  %v289_v49 = vsel %vm283_vm1, %v285_v45, 0.0  ;;  %v279_v50 = vsel %vm276_vm2, %v277_v46, %v278_v47 }
 0x151   : > { %v299_v51 = vpack.c.bf16 %v289_v49, %v286_v48 }
 0x153   : > { %538 = vmatprep.mubr.msk.bf16.mxu0 %vm228_vm0, %v299_v51 }
 0x1c2   : > { %v564_v52 = vpop.permute.xlu0 %563 }
 0x1c3   : > { %v566_v53 = vunpack.i.h.bf16 %v564_v52  ;;  %v565_v54 = vunpack.i.l.bf16 %v564_v52 }
 0x1c5   : > { %v296_v56 = vsel %vm228_vm0, %v282_v55, %v565_v54  ;;  %v297_v57 = vsel %vm228_vm0, %v279_v50, %v566_v53 }
 0x1c6   : > { %v298_v58 = vpack.c.bf16 %v297_v57, %v296_v56 }
 0x1c8   : > { %439 = vmatmul.mubr.bf16.vlgmr.msra.gmra.mrb[0].mxu0 %v298_v58 }
 0x29b   : > { %v440_v60 = vpop.f32.mrb[0].mxu0 }
 0x29c   : > { %v441_v61 = vadd.f32 %v525_v59, %v440_v60  ;;  %v442_v62 = vpop.f32.mrb[1].mxu0 }
 0x29d   : > { %v443_v63 = vpop.f32.mrb[2].mxu0 }
 0x29e   : > { %v444_v0 = vadd.f32 %v525_v59, %v443_v63  ;;  %v445_v1 = vpop.f32.mrb[3].mxu0  ;;  %v447_v2 = vmax.f32 %v441_v61, 0.0 }
 0x2a0   : > { %v448_v3 = vmax.f32 %v444_v0, 0.0 }
 0x2a2   : > { %v550_v4 = vpack.c.bf16 %v448_v3, %v447_v2 }
 0x2a4   : > { %551 = vst [vmem:[%s224_s10] sm:$0xff] %v550_v4  }
 0x2a5 PF: > { %s15_s18 = sadd.s32 1, %s589_s18  }
 0x2a6   : > { %p12_p4 = scmp.ge.s32.totalorder %s15_s18, 4  }
 0x2a8   :  { %14 = sbr.rel (!%p12_p4) target bundleno = 1 (0x1), region = 70 }

// kernel: text_encoder_forward.13
= control target key start
LH: loop header
LB: loop body
LE: loop exit
PB: predicated region body
PF: predicated region fallthrough
CT: control target
= control target key end

     0   :  { %s1139_s0 = inlined_call_operand.vmem [shape: s32[2], index: 0, kind: input, shape index: {}]   ;;  %s1140_s1 = inlined_call_operand.vmem [shape: bf16[2,16,192], index: 1, kind: input, shape index: {}]   ;;  %s1141_s2 = inlined_call_operand.vmem [shape: bf16[2,2,16,16], index: 2, kind: input, shape index: {}]   ;;  %s1142_s3 = inlined_call_operand.vmem [shape: f32[2,16,64], index: 3, kind: input, shape index: {}]   ;;  %s1143_s4 = inlined_call_operand.vmem [shape: f32[1,64], index: 4, kind: input, shape index: {}]   ;;  %s1144_s5 = inlined_call_operand.vmem [shape: bf16[64,64], index: 5, kind: input, shape index: {}]   ;;  %s1145_s6 = inlined_call_operand.vmem [shape: f32[1,64], index: 6, kind: input, shape index: {}]   ;;  %s1146_s7 = inlined_call_operand.vmem [shape: f32[2,16,64], index: 7, kind: output, shape index: {}]  }
   0x1   :  { %s12_s26 = sshll.u32 %s1139_s0, 4  ;;  %s13_s26 = int_to_ptr.vmem [resolvable:$true] %s12_s26 }
   0x2   :  { %s950_s27 = scalar_lea.vmem %s13_s26, 16  ;;  %p955_p1 = scmp.lt.s32.totalorder %s13_s26, %s13_s26 }
   0x3   :  { %p951_p0 = scmp.ne.s32.totalorder %s13_s26, %s950_s27  ;;  %p956_p2 = scmp.lt.s32.totalorder %s950_s27, %s950_s27 }
   0x5   :  { %p957_p3 = por %p956_p2, %p955_p1 }
   0x7   :  { %p958_p4 = pnand %p957_p3, %p951_p0 }
   0x9   :  { %961 = shalt.err (!%p958_p4)  }
   0xa   :  { %s972_s28 = smov [#allocation3]  }
   0xb   :  { %15 = dma.vmem_to_smem %s13_s26, 16, %s972_s28, [#allocation2] }
   0xc   :  { %966 = dma.done.wait [#allocation2], 16 }
   0xd   :  { %967 = vsyncadd [#allocation2], 4294967280 }
   0xe   :  { %17 = sfence }
   0xf   :  { %s1021_s29 = smov 0  }
  0x10 LB: > { %s1027_s0 = sadd.s32 4294967295, %s970_s29   ;;  %p814_p5 = scmp.ge.s32.totalorder %s970_s29, 1  ;;  %s970_s29 = sphi %s1021_s29, %s23_s29  }
  0x11   : > { %p239_p6 = scmp.lt.s32.totalorder %s970_s29, 3 }
  0x13   : > { %p240_p7 = pnand %p814_p5, %p239_p6 }
  0x14   : > { %p279_p8 = scmp.lt.s32.totalorder (!%p240_p7), %s1027_s0, 1  ;;  %v973_v0 = vmov (!%p240_p7), 0.0   ;;  %vm974_vm0 = vmmov (!%p240_p7), 0   ;;  %v824_v3 = vld [vmem:[%s1143_s4] ss:$0 sm:$0xff] (!%p240_p7)  ;;  %s975_s14 = smov (!%p240_p7), 64   ;;  %v301_v14 = vlaneseq (!%p240_p7) }
  0x15   : > { %243 = sbr.rel (%p240_p7) target bundleno = 1675 (0x68b), region = 44  ;;  %868 = vmatprep.subr.bf16.mxu0 (!%p240_p7), %v973_v0  ;;  %880 = vmatprep.subr.bf16.mxu1 (!%p240_p7), %v973_v0  ;;  %vm341_vm1 = vcmask (!%p240_p7), 261120   ;;  %s300_s18 = sld [smem:[#allocation3 + %s1027_s0]] (!%p240_p7)  ;;  %vm395_vm3 = vcmask (!%p240_p7), 130048   ;;  %v930_v42 = vld [vmem:[%s1144_s5] sm:$0xff] (!%p240_p7)   ;;  %v931_v55 = vld [vmem:[%s1144_s5 + $0x8] sm:$0xff] (!%p240_p7)  }
  0x16   : > { %870 = vmatprep.mubr.msk.bf16.mxu0 (!%p240_p7), %vm974_vm0, %v973_v0  ;;  %884 = vmatprep.mubr.msk.bf16.mxu1 (!%p240_p7), %vm974_vm0, %v973_v0  ;;  %v302_v16 = vand.u32 (!%p240_p7), 127, %v301_v14  ;;  %s976_s19 = smov (!%p240_p7), 32   ;;  %s977_s20 = smov (!%p240_p7), 96   ;;  %v933_v23 = vld [vmem:[%s1144_s5 + $0x18] sm:$0xff] (!%p240_p7)   ;;  %vm728_vm4 = vcmask (!%p240_p7), 523264  }
  0x17   : > { %881 = vmatpush3.bf16.msra.mxu1 (!%p240_p7), %v930_v42 }
  0x18   : > { %882 = vmatprep.subr.bf16.mxu1 (!%p240_p7), %v973_v0 }
  0x1b   : > { %v303_v18 = vstv (!%p240_p7), %s300_s18  ;;  %883 = vmatpush3.bf16.msra.mxu1 (!%p240_p7), %v931_v55 }
  0x1c   : > { %s280_s30 = scalar_select %p279_p8, %s1027_s0, 1  ;;  %vm1065_vm2 = vcmp.lt.s32.totalorder %v302_v16, %v303_v18  ;;  %894 = vmatprep.subr.bf16.mxu1 %v973_v0 }
  0x1e   : > { %s1039_s8 = sshll.u32 %s280_s30, 4 }
  0x1f   : > { %s283_s11 = scalar_lea.vmem %s1140_s1, %s1039_s8  ;;  %s1061_s17 = scalar_lea.vmem %s1141_s2, %s1039_s8 }
  0x20   : > { %v305_v1 = vld [vmem:[%s283_s11] sm:$0xff]  ;;  %v306_v2 = vld [vmem:[%s283_s11 + $0x8] sm:$0xff]  ;;  %s293_s9 = scalar_lea.vmem %s1142_s3, %s1039_s8 }
  0x21   : > { %v320_v4 = vunpack.c.l.bf16 %v306_v2  ;;  %v825_v5 = vcombine.low %v305_v1, %v306_v2  ;;  %v1048_v6 = vcombine.high %v305_v1, %v306_v2  ;;  %v319_v7 = vunpack.c.l.bf16 %v305_v1  ;;  %v846_v13 = vld [vmem:[%s1061_s17] sm:$0xff]   ;;  %v853_v59 = vld [vmem:[%s1061_s17 + $0x8] sm:$0xff]  }
  0x22   : > { %v847_v15 = vunpack.c.l.bf16 %v846_v13  ;;  %v848_v17 = vunpack.c.h.bf16 %v846_v13  ;;  %v851_v62 = vunpack.c.l.bf16 %v853_v59  ;;  %v852_v63 = vunpack.c.h.bf16 %v853_v59 }
  0x23   : > { %v328_v8 = vadd.f32 %v824_v3, %v320_v4  ;;  %339 = vrot.lane.b32.xlu0 %v825_v5, %s975_s14  ;;  %v327_v9 = vadd.f32 %v824_v3, %v319_v7  ;;  %s298_s14 = scalar_lea.vmem %s1146_s7, %s1039_s8 }
  0x25   : > { %v329_v10 = vpack.c.bf16 %v328_v8, %v327_v9 }
  0x95   : > { %v340_v11 = vpop.permute.xlu0 %339 }
  0x96   : > { %v346_v12 = vsel %vm341_vm1, %v340_v11, 0 }
  0x97   : > { %869 = vmatpush3.bf16.xpose.msra.mxu0 %v346_v12 }
  0x98   : > { %874 = vmatprep.subr.bf16.mxu0 %v973_v0 }
  0x9e   : > { %871 = vmatmul.mubr.msk.bf16.vlgmr.msra.gmra.mrb[0].mxu0 %vm341_vm1, %v329_v10 }
  0x9f   : > { %875 = vmatpush3.bf16.msra.mxu0 %v1048_v6  ;;  %876 = vmatprep.mubr.msk.bf16.mxu0 %vm974_vm0, %v973_v0 }
  0xa0   : > { %888 = vmatprep.subr.bf16.mxu0 %v973_v0 }
 0x171   : > { %v382_v19 = vpop.f32.mrb[0].mxu0 }
 0x172   : > { %v383_v20 = vadd.f32 %v847_v15, %v382_v19  ;;  %v872_v21 = vpop.f32.mrb[1].mxu0 }
 0x173   : > { %v385_v22 = vpop.f32.mrb[2].mxu0 }
 0x174   : > { %v389_v24 = vmul.f32 0.17677669, %v383_v20  ;;  %v386_v25 = vadd.f32 %v848_v17, %v385_v22  ;;  %v873_v26 = vpop.f32.mrb[3].mxu0 }
 0x176   : > { %v390_v27 = vmul.f32 0.17677669, %v386_v25  ;;  %v393_v28 = vsel %vm1065_vm2, %v389_v24, -1e+30 }
 0x177   : > { %v396_v29 = vsel %vm395_vm3, %v393_v28, -inf }
 0x178   : > { %397 = vmax.xlane.f32.xlu0 %v396_v29  ;;  %v394_v30 = vsel %vm1065_vm2, %v390_v27, -1e+30 }
 0x179   : > { %v399_v31 = vsel %vm395_vm3, %v394_v30, -inf }
 0x17a   : > { %400 = vmax.xlane.f32.xlu1 %v399_v31 }
 0x205   : > { %v398_v32 = vpop.xlane.xlu0 %397 }
 0x206   : > { %v402_v33 = vsub.f32 %v393_v28, %v398_v32 }
 0x207   : > { %v401_v34 = vpop.xlane.xlu1 %400 }
 0x208   : > { %v404_v35 = vmul.f32 1.442695, %v402_v33  ;;  %v403_v36 = vsub.f32 %v394_v30, %v401_v34 }
 0x20a   : > { %934 = vpow2.f32 %v404_v35  ;;  %v406_v37 = vmul.f32 1.442695, %v403_v36 }
 0x20c   : > { %936 = vpow2.f32 %v406_v37 }
 0x214   : > { %v935_v38 = vpop.eup %934 }
 0x215   : > { %v408_v39 = vsel %vm395_vm3, %v935_v38, 0.0 }
 0x216   : > { %v937_v40 = vpop.eup %936  ;;  %409 = vadd.xlane.f32.xlu1 %v408_v39 }
 0x217   : > { %v411_v41 = vsel %vm395_vm3, %v937_v40, 0.0 }
 0x21a   : > { %412 = vadd.xlane.f32.xlu1 %v411_v41  ;;  %v310_v41 = vld [vmem:[%s293_s9 + $0x8] sm:$0xff] }
 0x22b   : > { %540 = vrot.lane.b32.xlu1 %v825_v5, %s976_s19 }
 0x22f   : > { %538 = vrot.lane.b32.xlu1 %v329_v10, %s977_s20 }
 0x2a3   : > { %v410_v43 = vpop.xlane.xlu1 %409 }
 0x2a4   : > { %938 = vrcp.f32 %v410_v43 }
 0x2a7   : > { %v413_v44 = vpop.xlane.xlu1 %412 }
 0x2a8   : > { %940 = vrcp.f32 %v413_v44 }
 0x2ab   : > { %v541_v49 = vpop.permute.xlu1 %540 }
 0x2ac   : > { %v546_v52 = vsel %vm341_vm1, %v541_v49, 0 }
 0x2ae   : > { %v939_v45 = vpop.eup %938 }
 0x2af   : > { %v416_v46 = vmul.f32 %v939_v45, %v935_v38  ;;  %v539_v54 = vpop.permute.xlu1 %538 }
 0x2b1   : > { %v418_v50 = vsel %vm1065_vm2, %v416_v46, 0.0 }
 0x2b2   : > { %v941_v47 = vpop.eup %940 }
 0x2b3   : > { %v417_v48 = vmul.f32 %v941_v47, %v937_v40  ;;  %v309_v40 = vld [vmem:[%s293_s9] sm:$0xff] }
 0x2b5   : > { %v419_v51 = vsel %vm1065_vm2, %v417_v48, 0.0 }
 0x2b6   : > { %v420_v53 = vpack.c.bf16 %v419_v51, %v418_v50 }
 0x2b8   : > { %877 = vmatmul.mubr.msk.bf16.vlgmr.msra.gmra.mrb[4].mxu0 %vm395_vm3, %v420_v53 }
 0x2b9   : > { %889 = vmatpush3.bf16.xpose.msra.mxu0 %v546_v52  ;;  %890 = vmatprep.mubr.msk.bf16.mxu0 %vm974_vm0, %v973_v0 }
 0x2c0   : > { %891 = vmatmul.mubr.msk.bf16.vlgmr.msra.gmra.mrb[8].mxu0 %vm341_vm1, %v539_v54 }
 0x38b   : > { %v462_v56 = vpop.f32.mrb[4].mxu0 }
 0x38c   : > { %v878_v57 = vpop.f32.mrb[5].mxu0 }
 0x38d   : > { %v465_v58 = vpop.f32.mrb[6].mxu0 }
 0x38e   : > { %v469_v60 = vpack.c.bf16 %v465_v58, %v462_v56  ;;  %v879_v61 = vpop.f32.mrb[7].mxu0 }
 0x390   : > { %885 = vmatmul.mubr.msk.bf16.vlgmr.msra.gmra.mrb[0].mxu1 %vm341_vm1, %v469_v60 }
 0x391   : > { %896 = vmatprep.mubr.msk.bf16.mxu1 %vm974_vm0, %v973_v0 }
 0x393   : > { %v582_v1 = vpop.f32.mrb[8].mxu0 }
 0x394   : > { %v583_v2 = vadd.f32 %v851_v62, %v582_v1  ;;  %v892_v3 = vpop.f32.mrb[9].mxu0 }
 0x395   : > { %v585_v4 = vpop.f32.mrb[10].mxu0 }
 0x396   : > { %v589_v5 = vmul.f32 0.17677669, %v583_v2  ;;  %v586_v7 = vadd.f32 %v852_v63, %v585_v4  ;;  %v893_v8 = vpop.f32.mrb[11].mxu0 }
 0x398   : > { %v590_v9 = vmul.f32 0.17677669, %v586_v7  ;;  %v591_v10 = vsel %vm1065_vm2, %v589_v5, -1e+30 }
 0x399   : > { %v593_v11 = vsel %vm395_vm3, %v591_v10, -inf }
 0x39a   : > { %594 = vmax.xlane.f32.xlu1 %v593_v11  ;;  %v592_v12 = vsel %vm1065_vm2, %v590_v9, -1e+30 }
 0x39b   : > { %v596_v13 = vsel %vm395_vm3, %v592_v12, -inf }
 0x39c   : > { %597 = vmax.xlane.f32.xlu0 %v596_v13 }
 0x427   : > { %v595_v14 = vpop.xlane.xlu1 %594 }
 0x428   : > { %v599_v15 = vsub.f32 %v591_v10, %v595_v14 }
 0x429   : > { %v598_v16 = vpop.xlane.xlu0 %597 }
 0x42a   : > { %v601_v17 = vmul.f32 1.442695, %v599_v15  ;;  %v600_v18 = vsub.f32 %v592_v12, %v598_v16 }
 0x42c   : > { %942 = vpow2.f32 %v601_v17  ;;  %v603_v19 = vmul.f32 1.442695, %v600_v18 }
 0x42e   : > { %944 = vpow2.f32 %v603_v19 }
 0x436   : > { %v943_v20 = vpop.eup %942 }
 0x437   : > { %v605_v21 = vsel %vm395_vm3, %v943_v20, 0.0 }
 0x438   : > { %v945_v22 = vpop.eup %944  ;;  %606 = vadd.xlane.f32.xlu0 %v605_v21 }
 0x439   : > { %v608_v24 = vsel %vm395_vm3, %v945_v22, 0.0 }
 0x43c   : > { %609 = vadd.xlane.f32.xlu0 %v608_v24 }
 0x452   : > { %618 = vrot.lane.b32.xlu0 %v1048_v6, %s977_s20  ;;  %v932_v6 = vld [vmem:[%s1144_s5 + $0x10] sm:$0xff]  }
 0x4c5   : > { %v607_v25 = vpop.xlane.xlu0 %606 }
 0x4c6   : > { %946 = vrcp.f32 %v607_v25 }
 0x4c9   : > { %v610_v26 = vpop.xlane.xlu0 %609 }
 0x4ca   : > { %948 = vrcp.f32 %v610_v26 }
 0x4cd   : > { %v619_v27 = vpop.permute.xlu0 %618 }
 0x4ce   : > { %895 = vmatpush3.bf16.msra.mxu1 %v619_v27 }
 0x4cf   : > { %900 = vmatprep.subr.bf16.mxu1 %v973_v0 }
 0x4d0   : > { %v947_v28 = vpop.eup %946 }
 0x4d1   : > { %v613_v29 = vmul.f32 %v947_v28, %v943_v20 }
 0x4d3   : > { %v615_v32 = vsel %vm1065_vm2, %v613_v29, 0.0 }
 0x4d4   : > { %v949_v30 = vpop.eup %948 }
 0x4d5   : > { %v614_v31 = vmul.f32 %v949_v30, %v945_v22 }
 0x4d7   : > { %v616_v33 = vsel %vm1065_vm2, %v614_v31, 0.0 }
 0x4d8   : > { %v617_v34 = vpack.c.bf16 %v616_v33, %v615_v32 }
 0x4da   : > { %897 = vmatmul.mubr.msk.bf16.vlgmr.msra.gmra.mrb[4].mxu1 %vm395_vm3, %v617_v34 }
 0x4db   : > { %901 = vmatpush3.bf16.msra.mxu1 %v932_v6  ;;  %904 = vmatprep.mubr.msk.bf16.mxu1 %vm974_vm0, %v973_v0 }
 0x4dc   : > { %902 = vmatprep.subr.bf16.mxu1 %v973_v0  ;;  %v823_v0 = vld [vmem:[%s1145_s6] ss:$0 sm:$0xff] }
 0x4dd   : > { %v317_v42 = vadd.f32 %v823_v0, %v309_v40  ;;  %v318_v43 = vadd.f32 %v823_v0, %v310_v41 }
 0x4df   : > { %903 = vmatpush3.bf16.msra.mxu1 %v933_v23 }
 0x5ad   : > { %v658_v35 = vpop.f32.mrb[4].mxu1 }
 0x5ae   : > { %v898_v36 = vpop.f32.mrb[5].mxu1 }
 0x5af   : > { %v661_v37 = vpop.f32.mrb[6].mxu1 }
 0x5b0   : > { %v665_v38 = vpack.c.bf16 %v661_v37, %v658_v35  ;;  %v899_v39 = vpop.f32.mrb[7].mxu1 }
 0x5b2   : > { %905 = vmatmul.mubr.msk.bf16.vlgmr.msra.gmra.mrb[0].mxu1 %vm341_vm1, %v665_v38 }
 0x685   : > { %v719_v44 = vpop.f32.mrb[0].mxu1 }
 0x686   : > { %v908_v45 = vadd.f32 %v719_v44, %v317_v42  ;;  %v906_v46 = vpop.f32.mrb[1].mxu1 }
 0x687   : > { %v722_v47 = vpop.f32.mrb[2].mxu1 }
 0x688   : > { %729 = vst.msk [vmem:[%s298_s14] sm:$0xff] %vm728_vm4, %v908_v45  ;;  %v909_v48 = vadd.f32 %v722_v47, %v318_v43  ;;  %v907_v49 = vpop.f32.mrb[3].mxu1 }
 0x68a   : > { %730 = vst.msk [vmem:[%s298_s14 + $0x8] sm:$0xff] %vm728_vm4, %v909_v48 }
 0x68b PF: > { %s23_s29 = sadd.s32 1, %s970_s29  }
 0x68c   : > { %p20_p9 = scmp.ge.s32.totalorder %s23_s29, 4  }
 0x68e   :  { %22 = sbr.rel (!%p20_p9) target bundleno = 16 (0x10), region = 81 }

// kernel: text_encoder_forward.18
= control target key start
LH: loop header
LB: loop body
LE: loop exit
PB: predicated region body
PF: predicated region fallthrough
CT: control target
= control target key end

     0   :  { %15 = vsyncpa [#allocation3], 0  ;;  %s1504_s0 = inlined_call_operand.vmem [shape: bf16[2,16,128], index: 0, kind: input, shape index: {}]   ;;  %s1505_s1 = inlined_call_operand.vmem [shape: bf16[384,64], index: 1, kind: input, shape index: {}]   ;;  %s1506_s2 = inlined_call_operand.vmem [shape: f32[1,64], index: 2, kind: input, shape index: {}]   ;;  %s1507_s3 = inlined_call_operand.vmem [shape: f32[2,16,64], index: 3, kind: input, shape index: {}]   ;;  %s1508_s4 = inlined_call_operand.vmem [shape: f32[1,64], index: 4, kind: input, shape index: {}]   ;;  %s1509_s5 = inlined_call_operand.vmem [shape: f32[1,64], index: 5, kind: input, shape index: {}]   ;;  %s1510_s6 = inlined_call_operand.vmem [shape: bf16[64,64], index: 6, kind: input, shape index: {}]   ;;  %s1511_s7 = inlined_call_operand.vmem [shape: f32[1,64], index: 7, kind: input, shape index: {}]   ;;  %s1512_s8 = inlined_call_operand.hbm [shape: f32[2,16,64], index: 8, kind: output, shape index: {0}]   ;;  %s1513_s9 = inlined_call_operand.vmem [shape: f32[2,16,64], index: 9, kind: output, shape index: {1}]  }
   0x1   :  { %17 = vsyncpa [#allocation3 + $0x1], 0  ;;  %s1255_s30 = smov 0   ;;  %s1257_s10 = smov 0  }
   0x2   :  { %s1259_s11 = smov 0   ;;  %s1261_s12 = smov 0  }
   0x3 LB: > { %s1276_s13 = sadd.s32 4294967295, %s1197_s12   ;;  %s928_s14 = sadd.s32 4294967294, %s1197_s12   ;;  %s1197_s12 = sphi %s1261_s12, %s1519_s12   ;;  %s1193_s11 = sphi %s1259_s11, %s1518_s11   ;;  %s1189_s10 = sphi %s1257_s10, %s1517_s10   ;;  %s1185_s30 = sphi %s1255_s30, %s1516_s30  }
   0x4   : > { %s1280_s15 = sadd.s32 1, %s1197_s12   ;;  %s208_s16 = sadd.s32 1, %s1193_s11 }
   0x5   : > { %s205_s17 = ssub.s32 %s1197_s12, %s1280_s15  ;;  %p218_p0 = scmp.ne.s32.totalorder %s1193_s11, %s1189_s10 }
   0x6   : > { %p206_p1 = scmp.eq.s32.totalorder %s205_s17, 0  ;;  %p219_p2 = scmp.eq.s32.totalorder %s1276_s13, 1 }
   0x7   : > { %p224_p3 = scmp.ne.s32.totalorder %s1189_s10, %s1185_s30  ;;  %p225_p4 = scmp.eq.s32.totalorder %s928_s14, 1 }
   0x8   : > { %s1291_s18 = scalar_select %p206_p1, %s1193_s11, %s208_s16  }
   0x9   : > { %p1293_p5 = por %p219_p2, %p218_p0  ;;  %p1297_p6 = por %p225_p4, %p224_p3 }
   0xa   : > { %p931_p7 = scmp.ge.s32.totalorder %s1197_s12, 1  ;;  %p303_p8 = scmp.lt.s32.totalorder %s1197_s12, 3 }
   0xc   : > { %p304_p9 = pnand %p931_p7, %p303_p8 }
   0xd   : > { %v1101_v0 = vld [vmem:[%s1505_s1 + $0x40] sm:$0xff] (!%p304_p9)   ;;  %v1199_v2 = vmov (!%p304_p9), 0.0   ;;  %v1104_v4 = vld [vmem:[%s1505_s1 + $0x48] sm:$0xff] (!%p304_p9)   ;;  %v1107_v7 = vld [vmem:[%s1505_s1 + $0x50] sm:$0xff] (!%p304_p9)   ;;  %vm1200_vm0 = vmmov (!%p304_p9), 0   ;;  %p349_p10 = scmp.lt.s32.totalorder (!%p304_p9), %s1276_s13, 1 }
   0xe   : > { %307 = sbr.rel (%p304_p9) target bundleno = 803 (0x323), region = 52  ;;  %v1102_v1 = vld [vmem:[%s1505_s1] sm:$0xff] (!%p304_p9)   ;;  %1025 = vmatprep.subr.bf16.mxu1 (!%p304_p9), %v1199_v2  ;;  %989 = vmatprep.subr.bf16.mxu0 (!%p304_p9), %v1101_v0  ;;  %v1105_v5 = vld [vmem:[%s1505_s1 + $0x8] sm:$0xff] (!%p304_p9)   ;;  %v1108_v8 = vld [vmem:[%s1505_s1 + $0x10] sm:$0xff] (!%p304_p9)   ;;  %vm371_vm1 = vcmask (!%p304_p9), 1040384   ;;  %vm378_vm2 = vcmask (!%p304_p9), 1046528  }
   0xf   : > { %v1103_v3 = vld [vmem:[%s1505_s1 + $0x80] sm:$0xff] (!%p304_p9)   ;;  %990 = vmatpush3.bf16.msra.mxu0 (!%p304_p9), %v1102_v1  ;;  %v1106_v6 = vld [vmem:[%s1505_s1 + $0x88] sm:$0xff] (!%p304_p9)   ;;  %1041 = vmatprep.mubr.msk.bf16.mxu1 (!%p304_p9), %vm1200_vm0, %v1199_v2  ;;  %v1109_v9 = vld [vmem:[%s1505_s1 + $0x90] sm:$0xff] (!%p304_p9)   ;;  %vm1201_vm4 = vmmov (!%p304_p9), 1   ;;  %s339_s29 = sand.u32 (!%p304_p9), 1, %s1189_s10   ;;  %vm673_vm7 = vcmask (!%p304_p9), 523264  }
  0x10   : > { %1026 = vmatpush3.bf16.msra.mxu1 (!%p304_p9), %v1103_v3  ;;  %991 = vmatprep.subr.bf16.mxu0 (!%p304_p9), %v1104_v4  ;;  %v1110_v10 = vld [vmem:[%s1505_s1 + $0x58] sm:$0xff] (!%p304_p9)   ;;  %v1113_v13 = vld [vmem:[%s1505_s1 + $0x60] sm:$0xff] (!%p304_p9)   ;;  %v1116_v16 = vld [vmem:[%s1505_s1 + $0x68] sm:$0xff] (!%p304_p9)   ;;  %s988_s22 = sshll.u32 (!%p304_p9), %s1276_s13, 8  ;;  %s1453_s27 = scalar_lea.sflag (!%p304_p9), [#allocation3], %s339_s29 }
  0x11   : > { %1027 = vmatprep.subr.bf16.mxu1 (!%p304_p9), %v1199_v2  ;;  %v1111_v11 = vld [vmem:[%s1505_s1 + $0x18] sm:$0xff] (!%p304_p9)   ;;  %v1114_v14 = vld [vmem:[%s1505_s1 + $0x20] sm:$0xff] (!%p304_p9)   ;;  %v1117_v17 = vld [vmem:[%s1505_s1 + $0x28] sm:$0xff] (!%p304_p9)   ;;  %s1447_s26 = scalar_lea.hbm (!%p304_p9), %s1512_s8, %s988_s22 }
  0x12   : > { %v1112_v12 = vld [vmem:[%s1505_s1 + $0x98] sm:$0xff] (!%p304_p9)   ;;  %v1115_v15 = vld [vmem:[%s1505_s1 + $0xa0] sm:$0xff] (!%p304_p9)   ;;  %v1118_v18 = vld [vmem:[%s1505_s1 + $0xa8] sm:$0xff] (!%p304_p9)  }
  0x13   : > { %992 = vmatpush3.bf16.msra.mxu0 (!%p304_p9), %v1105_v5  ;;  %v1119_v19 = vld [vmem:[%s1505_s1 + $0x70] sm:$0xff] (!%p304_p9)   ;;  %v1122_v23 = vld [vmem:[%s1505_s1 + $0x78] sm:$0xff] (!%p304_p9)   ;;  %vm965_vm3 = vmneg (!%p304_p9), %vm371_vm1 }
  0x14   : > { %1028 = vmatpush3.bf16.msra.mxu1 (!%p304_p9), %v1106_v6  ;;  %993 = vmatprep.subr.bf16.mxu0 (!%p304_p9), %v1107_v7  ;;  %v1120_v20 = vld [vmem:[%s1505_s1 + $0x30] sm:$0xff] (!%p304_p9)   ;;  %v1123_v26 = vld [vmem:[%s1505_s1 + $0x38] sm:$0xff] (!%p304_p9)   ;;  %vm966_vm5 = vmpackc.low (!%p304_p9), %vm1201_vm4, %vm965_vm3 }
  0x15   : > { %1029 = vmatprep.subr.bf16.mxu1 %v1199_v2  ;;  %s1350_s23 = scalar_select %p349_p10, %s1276_s13, 1  ;;  %v1121_v22 = vld [vmem:[%s1505_s1 + $0xb0] sm:$0xff]   ;;  %v1125_v31 = vld [vmem:[%s1505_s1 + $0xb8] sm:$0xff]   ;;  %vm969_vm6 = vmpackc.low %vm378_vm2, %vm1201_vm4 }
  0x16   : > { %v940_v38 = vld [vmem:[%s1506_s2] ss:$0 sm:$0xff]  ;;  %v1127_v5 = vld [vmem:[%s1510_s6 + $0x8] sm:$0xff]   ;;  %v1128_v6 = vld [vmem:[%s1510_s6 + $0x10] sm:$0xff]  }
  0x17   : > { %994 = vmatpush3.bf16.msra.mxu0 %v1108_v8  ;;  %s985_s14 = sshll.u32 %s1350_s23, 3  ;;  %v1126_v4 = vld [vmem:[%s1510_s6] sm:$0xff]   ;;  %v1129_v7 = vld [vmem:[%s1510_s6 + $0x18] sm:$0xff]  }
  0x18   : > { %1030 = vmatpush3.bf16.msra.mxu1 %v1109_v9  ;;  %995 = vmatprep.subr.bf16.mxu0 %v1110_v10  ;;  %s353_s28 = scalar_lea.vmem %s1504_s0, %s985_s14  ;;  %s932_s14 = sshll.u32 %s339_s29, 4 }
  0x19   : > { %1031 = vmatprep.subr.bf16.mxu1 %v1199_v2  ;;  %v365_v21 = vld [vmem:[%s353_s28] sm:$0xff]   ;;  %s986_s28 = sshll.u32 %s1350_s23, 4  ;;  %s1410_s25 = scalar_lea.vmem [#allocation2], %s932_s14 }
  0x1a   : > { %v367_v24 = vunpack.c.l.bf16 %v365_v21  ;;  %v368_v25 = vunpack.c.h.bf16 %v365_v21  ;;  %619 = vmatprep.mubr.bf16.mxu0 %v365_v21  ;;  %s358_s24 = scalar_lea.vmem %s1507_s3, %s986_s28  ;;  %s826_s21 = sshll.u32 %s1410_s25, 4  ;;  %s1449_s21 = int_to_ptr.vmem [resolvable:$true] %s826_s21 }
  0x1b   : > { %996 = vmatpush3.bf16.msra.mxu0 %v1111_v11  ;;  %v669_v48 = vld [vmem:[%s358_s24] sm:$0xff]  ;;  %v670_v51 = vld [vmem:[%s358_s24 + $0x8] sm:$0xff]  ;;  %s1135_s16 = scalar_lea.vmem %s1449_s21, 256 }
  0x1c   : > { %1032 = vmatpush3.bf16.msra.mxu1 %v1112_v12  ;;  %997 = vmatprep.subr.bf16.mxu0 %v1113_v13  ;;  %v372_v27 = vrot.slane %v367_v24, 7  ;;  %v373_v28 = vrot.slane %v368_v25, 7  ;;  %v379_v29 = vrot.slane %v367_v24, 1  ;;  %v380_v30 = vrot.slane %v368_v25, 1  ;;  %p1136_p11 = scmp.ne.s32.totalorder %s1449_s21, %s1135_s16 }
  0x1d   : > { %1033 = vmatprep.subr.bf16.mxu1 %v1199_v2 }
  0x1e   : > { %v374_v32 = vsel %vm371_vm1, %v372_v27, %v373_v28  ;;  %v381_v33 = vsel %vm378_vm2, %v379_v29, %v380_v30  ;;  %p1137_p12 = pnand %p1136_p11, %p1293_p5 }
  0x1f   : > { %998 = vmatpush3.bf16.msra.mxu0 %v1114_v14  ;;  %v967_v34 = vpack.c.bf16 %v374_v32, %v372_v27  ;;  %v970_v35 = vpack.c.bf16 %v380_v30, %v381_v33 }
  0x20   : > { %1034 = vmatpush3.bf16.msra.mxu1 %v1115_v15  ;;  %999 = vmatprep.subr.bf16.mxu0 %v1116_v16  ;;  %p1138_p13 = pneg %p1137_p12 }
  0x21   : > { %1035 = vmatprep.subr.bf16.mxu1 %v1199_v2 }
  0x23   : > { %1000 = vmatpush3.bf16.msra.mxu0 %v1117_v17 }
  0x24   : > { %1036 = vmatpush3.bf16.msra.mxu1 %v1118_v18  ;;  %1001 = vmatprep.subr.bf16.mxu0 %v1119_v19  ;;  %v973_v19 = vld [vmem:[%s1509_s5] ss:$0 sm:$0xff] }
  0x25   : > { %1037 = vmatprep.subr.bf16.mxu1 %v1199_v2 }
  0x27   : > { %1002 = vmatpush3.bf16.msra.mxu0 %v1120_v20 }
  0x28   : > { %1038 = vmatpush3.bf16.msra.mxu1 %v1121_v22  ;;  %1003 = vmatprep.subr.bf16.mxu0 %v1122_v23 }
  0x29   : > { %1039 = vmatprep.subr.bf16.mxu1 %v1199_v2 }
  0x2b   : > { %1004 = vmatpush3.bf16.msra.mxu0 %v1123_v26 }
  0x2c   : > { %1040 = vmatpush3.bf16.msra.mxu1 %v1125_v31  ;;  %1045 = vmatprep.subr.bf16.mxu0 %v1199_v2 }
  0x2e   : > { %968 = vmatmul.mubr.msk.bf16.vlgmr.msra.gmra.mrb[0].mxu0 %vm966_vm5, %v967_v34 }
  0x2f   : > { %1042 = vmatmul.mubr.msk.bf16.vlgmr.msra.gmra.mrb[0].mxu1 %vm969_vm6, %v970_v35  ;;  %1053 = vmatprep.mubr.msk.bf16.mxu0 %vm1200_vm0, %v1199_v2 }
  0x30   : > { %1046 = vmatpush3.bf16.msra.mxu0 %v1126_v4 }
  0x31   : > { %1047 = vmatprep.subr.bf16.mxu0 %v1199_v2 }
  0x34   : > { %1048 = vmatpush3.bf16.msra.mxu0 %v1127_v5 }
  0x35   : > { %1049 = vmatprep.subr.bf16.mxu0 %v1199_v2 }
  0x38   : > { %1050 = vmatpush3.bf16.msra.mxu0 %v1128_v6 }
  0x39   : > { %1051 = vmatprep.subr.bf16.mxu0 %v1199_v2  ;;  %v972_v2 = vld [vmem:[%s1508_s4] ss:$0 sm:$0xff] }
  0x3c   : > { %1052 = vmatpush3.bf16.msra.mxu0 %v1129_v7 }
 0x101   : > { %v1005_v36 = vpop.f32.mrb[0].mxu0 }
 0x102   : > { %v1006_v37 = vpop.f32.mrb[1].mxu0  ;;  %v662_v39 = vpop.f32.mrb[0].mxu1 }
 0x103   : > { %v1007_v40 = vadd.f32 %v1006_v37, %v1005_v36  ;;  %v1008_v41 = vpop.f32.mrb[2].mxu0  ;;  %v1043_v42 = vpop.f32.mrb[1].mxu1 }
 0x104   : > { %v1009_v43 = vpop.f32.mrb[3].mxu0  ;;  %v665_v44 = vpop.f32.mrb[2].mxu1 }
 0x105   : > { %v622_v45 = vadd.f32 %v1007_v40, %v940_v38  ;;  %v1010_v46 = vadd.f32 %v1009_v43, %v1008_v41  ;;  %v1044_v47 = vpop.f32.mrb[3].mxu1 }
 0x107   : > { %v663_v49 = vadd.f32 %v662_v39, %v622_v45  ;;  %v625_v50 = vadd.f32 %v1010_v46, %v940_v38 }
 0x109   : > { %v671_v52 = vadd.f32 %v669_v48, %v663_v49  ;;  %v666_v53 = vadd.f32 %v665_v44, %v625_v50 }
 0x10b   : > { %674 = vst.msk [vmem:[%s1410_s25] sm:$0xff] %vm673_vm7, %v671_v52  ;;  %v672_v54 = vadd.f32 %v670_v51, %v666_v53  ;;  %v676_v55 = vsel %vm673_vm7, %v671_v52, 0.0 }
 0x10c   : > { %677 = vadd.xlane.f32.xlu0 %v676_v55 }
 0x10d   : > { %675 = vst.msk [vmem:[%s1410_s25 + $0x8] sm:$0xff] %vm673_vm7, %v672_v54  ;;  %v679_v56 = vsel %vm673_vm7, %v672_v54, 0.0  ;;  %s1202_s25 = smov [#allocation2]  }
 0x10e   : > { %s1139_s13 = sshll.u32 %s1202_s25, 4  ;;  %s1140_s13 = int_to_ptr.vmem [resolvable:$false] %s1139_s13 }
 0x10f   : > { %s1141_s17 = scalar_lea.vmem %s1140_s13, 512  ;;  %p1142_p0 = scmp.lt.s32.totalorder %s1449_s21, %s1140_s13 }
 0x110   : > { %680 = vadd.xlane.f32.xlu0 %v679_v56  ;;  %p1143_p1 = scmp.lt.s32.totalorder %s1141_s17, %s1135_s16 }
 0x112   : > { %p1144_p2 = por %p1143_p1, %p1142_p0 }
 0x114   : > { %p1145_p3 = pnand %p1144_p2, %p1138_p13 }
 0x199   : > { %v678_v57 = vpop.xlane.xlu0 %677 }
 0x19a   : > { %v683_v58 = vmul.f32 0.015625, %v678_v57 }
 0x19c   : > { %v685_v59 = vsub.f32 %v671_v52, %v683_v58 }
 0x19d   : > { %v681_v60 = vpop.xlane.xlu0 %680 }
 0x19e   : > { %v684_v61 = vmul.f32 0.015625, %v681_v60  ;;  %v687_v62 = vmul.f32 %v685_v59, %v685_v59 }
 0x1a0   : > { %v686_v63 = vsub.f32 %v672_v54, %v684_v61  ;;  %v689_v0 = vsel %vm673_vm7, %v687_v62, 0.0 }
 0x1a1   : > { %690 = vadd.xlane.f32.xlu1 %v689_v0 }
 0x1a2   : > { %v688_v1 = vmul.f32 %v686_v63, %v686_v63 }
 0x1a4   : > { %v692_v3 = vsel %vm673_vm7, %v688_v1, 0.0 }
 0x1a5   : > { %693 = vadd.xlane.f32.xlu1 %v692_v3 }
 0x22e   : > { %v691_v8 = vpop.xlane.xlu1 %690 }
 0x22f   : > { %v695_v9 = vmul.f32 0.015625, %v691_v8 }
 0x231   : > { %v697_v10 = vadd.f32 1e-12, %v695_v9 }
 0x232   : > { %v694_v11 = vpop.xlane.xlu1 %693 }
 0x233   : > { %1131 = vrsqrt.f32 %v697_v10  ;;  %v696_v12 = vmul.f32 0.015625, %v694_v11 }
 0x235   : > { %v698_v13 = vadd.f32 1e-12, %v696_v12 }
 0x237   : > { %1133 = vrsqrt.f32 %v698_v13 }
 0x23d   : > { %v1132_v14 = vpop.eup %1131 }
 0x23e   : > { %v701_v15 = vmul.f32 %v1132_v14, %v685_v59 }
 0x240   : > { %v710_v17 = vmul.f32 %v972_v2, %v701_v15 }
 0x241   : > { %v1134_v16 = vpop.eup %1133 }
 0x242   : > { %v702_v18 = vmul.f32 %v1134_v16, %v686_v63  ;;  %v719_v21 = vadd.f32 %v973_v19, %v710_v17 }
 0x244   : > { %v711_v20 = vmul.f32 %v972_v2, %v702_v18 }
 0x246   : > { %v720_v22 = vadd.f32 %v973_v19, %v711_v20 }
 0x248   : > { %v721_v23 = vpack.c.bf16 %v720_v22, %v719_v21 }
 0x24a   : > { %1054 = vmatmul.mubr.msk.bf16.vlgmr.msra.gmra.mrb[4].mxu0 %vm673_vm7, %v721_v23 }
 0x24b   : > { %1148 = shalt.err (!%p1145_p3)
}
 0x24c   : > { %s1149_s29 = scalar_lea.hbm %s1447_s26, 256  ;;  %s1153_s14 = scalar_lea.hbm %s1512_s8, 512 }
 0x24d   : > { %p1150_p4 = scmp.ne.s32.totalorder %s1447_s26, %s1149_s29  ;;  %p1154_p9 = scmp.lt.u32.totalorder %s1447_s26, %s1512_s8 }
 0x24e   : > { %p1155_p10 = scmp.lt.u32.totalorder %s1153_s14, %s1149_s29  ;;  %p1157_p12 = scmp.lt.u32.totalorder %s1149_s29, %s1447_s26 }
 0x24f   : > { %p1151_p7 = pnand %p1150_p4, %p1293_p5 }
 0x250   : > { %p1156_p11 = por %p1155_p10, %p1154_p9 }
 0x251   : > { %p1152_p8 = pneg %p1151_p7 }
 0x252   : > { %p1158_p13 = por %p1157_p12, %p1156_p11 }
 0x254   : > { %p1159_p0 = pnand %p1158_p13, %p1152_p8 }
 0x256   : > { %1162 = shalt.err (!%p1159_p0)
}
 0x257   : > { %s1203_s16 = smov 128   ;;  %s1204_s17 = smov 8   ;;  %v974_v24 = vld [vmem:[%s1511_s7] ss:$0 sm:$0xff] }
 0x258   : > { %1057 = dma.vmem_to_hbm [thread:$0]  (%p1293_p5), %s1449_s21, 256, %s1447_s26, %s1453_s27, %s1203_s16, %s1203_s16, %s1204_s17  }
 0x259   : > { %s363_s29 = scalar_lea.vmem %s1513_s9, %s986_s28 }
 0x31d   : > { %v798_v25 = vpop.f32.mrb[4].mxu0 }
 0x31e   : > { %v799_v26 = vadd.f32 %v974_v24, %v798_v25  ;;  %v1055_v27 = vpop.f32.mrb[5].mxu0 }
 0x31f   : > { %v801_v28 = vpop.f32.mrb[6].mxu0 }
 0x320   : > { %805 = vst.msk [vmem:[%s363_s29] sm:$0xff] %vm673_vm7, %v799_v26  ;;  %v802_v29 = vadd.f32 %v974_v24, %v801_v28  ;;  %v1056_v30 = vpop.f32.mrb[7].mxu0 }
 0x322   : > { %806 = vst.msk [vmem:[%s363_s29 + $0x8] sm:$0xff] %vm673_vm7, %v802_v29 }
 0x323 PF: > { %p1063_p5 = scmp.ge.s32.totalorder %s1197_s12, 2  ;;  %s844_s19 = sand.u32 1, %s1185_s30  }
 0x324   : > { %s845_s23 = scalar_lea.sflag [#allocation3], %s844_s19 }
 0x325   : > { %p1060_p1 = pnand %p1063_p5, %p1297_p6 }
 0x327   : > { %1180 = dma.done.wait (!%p1060_p1), %s845_s23, 256  }
 0x328   : > { %1182 = vsyncadd (!%p1060_p1), %s845_s23, 4294967040  ;;  %p20_p2 = scmp.ge.s32.totalorder %s1280_s15, 4   ;;  %s1516_s30 = smov %s1189_s10 }
 0x329   : > { %s1517_s10 = smov %s1193_s11  ;;  %s1518_s11 = smov %s1291_s18 }
 0x32a   : > { %s1519_s12 = smov %s1280_s15  ;;  %22 = sbr.rel (!%p20_p2) target bundleno = 3 (0x3), region = 102 }
 0x331   :  { %858 = vsyncpa [#allocation3], 1 }
 0x332   :  { %860 = vsyncpa [#allocation3 + $0x1], 1 }

// kernel: text_encoder_forward.15
= control target key start
LH: loop header
LB: loop body
LE: loop exit
PB: predicated region body
PF: predicated region fallthrough
CT: control target
= control target key end

     0   :  { %s1181_s30 = smov 0   ;;  %s1343_s0 = inlined_call_operand.vmem [shape: bf16[2,16,128], index: 0, kind: input, shape index: {}]   ;;  %s1344_s1 = inlined_call_operand.vmem [shape: bf16[384,64], index: 1, kind: input, shape index: {}]   ;;  %s1345_s2 = inlined_call_operand.vmem [shape: f32[1,64], index: 2, kind: input, shape index: {}]   ;;  %s1346_s3 = inlined_call_operand.vmem [shape: f32[2,16,64], index: 3, kind: input, shape index: {}]   ;;  %s1347_s4 = inlined_call_operand.vmem [shape: f32[1,64], index: 4, kind: input, shape index: {}]   ;;  %s1348_s5 = inlined_call_operand.vmem [shape: f32[1,64], index: 5, kind: input, shape index: {}]   ;;  %s1349_s6 = inlined_call_operand.vmem [shape: bf16[64,192], index: 6, kind: input, shape index: {}]   ;;  %s1350_s7 = inlined_call_operand.vmem [shape: f32[1,192], index: 7, kind: input, shape index: {}]   ;;  %s1351_s8 = inlined_call_operand.vmem [shape: f32[2,16,64], index: 8, kind: output, shape index: {0}]   ;;  %s1352_s9 = inlined_call_operand.vmem [shape: bf16[2,16,192], index: 9, kind: output, shape index: {1}]  }
   0x1 LB: > { %s947_s10 = sadd.s32 4294967295, %s1125_s30   ;;  %p951_p0 = scmp.ge.s32.totalorder %s1125_s30, 1  ;;  %s1125_s30 = sphi %s1181_s30, %s20_s30  }
   0x2   : > { %p300_p1 = scmp.lt.s32.totalorder %s1125_s30, 3 }
   0x4   : > { %p301_p2 = pnand %p951_p0, %p300_p1 }
   0x5   : > { %v1077_v0 = vld [vmem:[%s1344_s1 + $0x40] sm:$0xff] (!%p301_p2)   ;;  %v1127_v2 = vmov (!%p301_p2), 0.0   ;;  %v1080_v4 = vld [vmem:[%s1344_s1 + $0x48] sm:$0xff] (!%p301_p2)   ;;  %v1083_v7 = vld [vmem:[%s1344_s1 + $0x50] sm:$0xff] (!%p301_p2)   ;;  %p346_p3 = scmp.lt.s32.totalorder (!%p301_p2), %s947_s10, 1  ;;  %vm1128_vm0 = vmmov (!%p301_p2), 0  }
   0x6   : > { %304 = sbr.rel (%p301_p2) target bundleno = 798 (0x31e), region = 52  ;;  %v1078_v1 = vld [vmem:[%s1344_s1] sm:$0xff] (!%p301_p2)   ;;  %1045 = vmatprep.subr.bf16.mxu1 (!%p301_p2), %v1127_v2  ;;  %1014 = vmatprep.subr.bf16.mxu0 (!%p301_p2), %v1077_v0  ;;  %v1081_v5 = vld [vmem:[%s1344_s1 + $0x8] sm:$0xff] (!%p301_p2)   ;;  %v1084_v8 = vld [vmem:[%s1344_s1 + $0x10] sm:$0xff] (!%p301_p2)   ;;  %vm373_vm1 = vcmask (!%p301_p2), 1040384   ;;  %vm380_vm2 = vcmask (!%p301_p2), 1046528  }
   0x7   : > { %v1079_v3 = vld [vmem:[%s1344_s1 + $0x80] sm:$0xff] (!%p301_p2)   ;;  %1015 = vmatpush3.bf16.msra.mxu0 (!%p301_p2), %v1078_v1  ;;  %v1082_v6 = vld [vmem:[%s1344_s1 + $0x88] sm:$0xff] (!%p301_p2)   ;;  %v1085_v9 = vld [vmem:[%s1344_s1 + $0x90] sm:$0xff] (!%p301_p2)   ;;  %1061 = vmatprep.mubr.msk.bf16.mxu1 (!%p301_p2), %vm1128_vm0, %v1127_v2  ;;  %vm1129_vm4 = vmmov (!%p301_p2), 1   ;;  %vm675_vm7 = vcmask (!%p301_p2), 523264   ;;  %vm842_vm8 = vcmask (!%p301_p2), 1043456  }
   0x8   : > { %1046 = vmatpush3.bf16.msra.mxu1 (!%p301_p2), %v1079_v3  ;;  %1016 = vmatprep.subr.bf16.mxu0 (!%p301_p2), %v1080_v4  ;;  %v1086_v10 = vld [vmem:[%s1344_s1 + $0x58] sm:$0xff] (!%p301_p2)   ;;  %v1089_v13 = vld [vmem:[%s1344_s1 + $0x60] sm:$0xff] (!%p301_p2)   ;;  %v1092_v16 = vld [vmem:[%s1344_s1 + $0x68] sm:$0xff] (!%p301_p2)   ;;  %vm843_vm9 = vcmask (!%p301_p2), 523268  }
   0x9   : > { %1047 = vmatprep.subr.bf16.mxu1 (!%p301_p2), %v1127_v2  ;;  %v1087_v11 = vld [vmem:[%s1344_s1 + $0x18] sm:$0xff] (!%p301_p2)   ;;  %v1090_v14 = vld [vmem:[%s1344_s1 + $0x20] sm:$0xff] (!%p301_p2)   ;;  %v1093_v17 = vld [vmem:[%s1344_s1 + $0x28] sm:$0xff] (!%p301_p2)  }
   0xa   : > { %v1088_v12 = vld [vmem:[%s1344_s1 + $0x98] sm:$0xff] (!%p301_p2)   ;;  %v1091_v15 = vld [vmem:[%s1344_s1 + $0xa0] sm:$0xff] (!%p301_p2)   ;;  %v1094_v18 = vld [vmem:[%s1344_s1 + $0xa8] sm:$0xff] (!%p301_p2)  }
   0xb   : > { %1017 = vmatpush3.bf16.msra.mxu0 (!%p301_p2), %v1081_v5  ;;  %v1095_v19 = vld [vmem:[%s1344_s1 + $0x70] sm:$0xff] (!%p301_p2)   ;;  %v1098_v23 = vld [vmem:[%s1344_s1 + $0x78] sm:$0xff] (!%p301_p2)   ;;  %vm986_vm3 = vmneg (!%p301_p2), %vm373_vm1 }
   0xc   : > { %1048 = vmatpush3.bf16.msra.mxu1 (!%p301_p2), %v1082_v6  ;;  %1018 = vmatprep.subr.bf16.mxu0 (!%p301_p2), %v1083_v7  ;;  %v1096_v20 = vld [vmem:[%s1344_s1 + $0x30] sm:$0xff] (!%p301_p2)   ;;  %v1099_v26 = vld [vmem:[%s1344_s1 + $0x38] sm:$0xff] (!%p301_p2)   ;;  %vm987_vm5 = vmpackc.low (!%p301_p2), %vm1129_vm4, %vm986_vm3 }
   0xd   : > { %1049 = vmatprep.subr.bf16.mxu1 %v1127_v2  ;;  %s1354_s10 = smov (!%p346_p3, %s947_s10), 1  ;;  %v1097_v22 = vld [vmem:[%s1344_s1 + $0xb0] sm:$0xff]   ;;  %v1101_v31 = vld [vmem:[%s1344_s1 + $0xb8] sm:$0xff]   ;;  %vm990_vm6 = vmpackc.low %vm380_vm2, %vm1129_vm4 }
   0xe   : > { %s1008_s24 = sshll.u32 %s1354_s10, 3  ;;  %s1283_s25 = sshll.u32 %s1354_s10, 4  ;;  %v961_v38 = vld [vmem:[%s1345_s2] ss:$0 sm:$0xff]  ;;  %v1104_v3 = vld [vmem:[%s1349_s6 + $0x4] ss:$8 sps:$4 sm:$0xff]   ;;  %vm844_vm10 = vmor %vm843_vm9, %vm842_vm8 }
   0xf   : > { %1019 = vmatpush3.bf16.msra.mxu0 %v1084_v8  ;;  %s350_s14 = scalar_lea.vmem %s1343_s0, %s1008_s24  ;;  %s355_s11 = scalar_lea.vmem %s1346_s3, %s1283_s25  ;;  %v1102_v4 = vld [vmem:[%s1349_s6] ss:$8 sps:$4 sm:$0xff]   ;;  %v1107_v5 = vld [vmem:[%s1349_s6 + $0x14] ss:$8 sps:$4 sm:$0xff]   ;;  %v1105_v6 = vld [vmem:[%s1349_s6 + $0x10] ss:$8 sps:$4 sm:$0xff]  }
  0x10   : > { %1050 = vmatpush3.bf16.msra.mxu1 %v1085_v9  ;;  %1020 = vmatprep.subr.bf16.mxu0 %v1086_v10  ;;  %v367_v21 = vld [vmem:[%s350_s14] sm:$0xff]   ;;  %s360_s13 = scalar_lea.vmem %s1351_s8, %s1283_s25  ;;  %v672_v51 = vld [vmem:[%s355_s11 + $0x8] sm:$0xff]  ;;  %v1111_v9 = vld [vmem:[%s1349_s6 + $0x30] ss:$8 sps:$4 sm:$0xff]   ;;  %s365_s19 = scalar_lea.vmem %s1352_s9, %s1283_s25 }
  0x11   : > { %1051 = vmatprep.subr.bf16.mxu1 %v1127_v2  ;;  %v369_v24 = vunpack.c.l.bf16 %v367_v21  ;;  %v370_v25 = vunpack.c.h.bf16 %v367_v21  ;;  %621 = vmatprep.mubr.bf16.mxu0 %v367_v21  ;;  %v671_v48 = vld [vmem:[%s355_s11] sm:$0xff]  ;;  %v1113_v10 = vld [vmem:[%s1349_s6 + $0x34] ss:$8 sps:$4 sm:$0xff]  }
  0x12   : > { %v1110_v7 = vld [vmem:[%s1349_s6 + $0x24] ss:$8 sps:$4 sm:$0xff]   ;;  %v1108_v8 = vld [vmem:[%s1349_s6 + $0x20] ss:$8 sps:$4 sm:$0xff]  }
  0x13   : > { %1021 = vmatpush3.bf16.msra.mxu0 %v1087_v11  ;;  %v374_v27 = vrot.slane %v369_v24, 7  ;;  %v375_v28 = vrot.slane %v370_v25, 7  ;;  %v381_v29 = vrot.slane %v369_v24, 1  ;;  %v382_v30 = vrot.slane %v370_v25, 1  ;;  %v994_v24 = vld [vmem:[%s1348_s5] ss:$0 sm:$0xff] }
  0x14   : > { %1052 = vmatpush3.bf16.msra.mxu1 %v1088_v12  ;;  %1022 = vmatprep.subr.bf16.mxu0 %v1089_v13  ;;  %v1130_v11 = vmov 0  }
  0x15   : > { %1053 = vmatprep.subr.bf16.mxu1 %v1127_v2  ;;  %v376_v32 = vsel %vm373_vm1, %v374_v27, %v375_v28  ;;  %v383_v33 = vsel %vm380_vm2, %v381_v29, %v382_v30  ;;  %v734_v29 = vlaneseq }
  0x16   : > { %v988_v34 = vpack.c.bf16 %v376_v32, %v374_v27  ;;  %v991_v35 = vpack.c.bf16 %v382_v30, %v383_v33  ;;  %v732_v32 = vld [vmem:[%s1350_s7] sm:$0x3] }
  0x17   : > { %1023 = vmatpush3.bf16.msra.mxu0 %v1090_v14  ;;  %v735_v30 = vshrl.u32 %v734_v29, 7 }
  0x18   : > { %1054 = vmatpush3.bf16.msra.mxu1 %v1091_v15  ;;  %1024 = vmatprep.subr.bf16.mxu0 %v1092_v16 }
  0x19   : > { %1055 = vmatprep.subr.bf16.mxu1 %v1127_v2  ;;  %v740_v33 = vsub.s32 1, %v735_v30 }
  0x1b   : > { %1025 = vmatpush3.bf16.msra.mxu0 %v1093_v17 }
  0x1c   : > { %1056 = vmatpush3.bf16.msra.mxu1 %v1094_v18  ;;  %1026 = vmatprep.subr.bf16.mxu0 %v1095_v19 }
  0x1d   : > { %1057 = vmatprep.subr.bf16.mxu1 %v1127_v2 }
  0x1f   : > { %1027 = vmatpush3.bf16.msra.mxu0 %v1096_v20  ;;  %v993_v20 = vld [vmem:[%s1347_s4] ss:$0 sm:$0xff] }
  0x20   : > { %1058 = vmatpush3.bf16.msra.mxu1 %v1097_v22  ;;  %1028 = vmatprep.subr.bf16.mxu0 %v1098_v23 }
  0x21   : > { %1059 = vmatprep.subr.bf16.mxu1 %v1127_v2 }
  0x23   : > { %1029 = vmatpush3.bf16.msra.mxu0 %v1099_v26 }
  0x24   : > { %1060 = vmatpush3.bf16.msra.mxu1 %v1101_v31  ;;  %787 = vmatprep.subr.bf16.mxu0 %v1104_v3  ;;  %v736_v31 = vsub.s32 0, %v735_v30 }
  0x26   : > { %989 = vmatmul.mubr.msk.bf16.vlgmr.msra.gmra.mrb[0].mxu0 %vm987_vm5, %v988_v34  ;;  %v737_v34 = vrot.slane %v732_v32, %v736_v31 }
  0x27   : > { %1062 = vmatmul.mubr.msk.bf16.vlgmr.msra.gmra.mrb[0].mxu1 %vm990_vm6, %v991_v35  ;;  %788 = vmatpush1.bf16.msra.mxu0 %v1102_v4  ;;  %v741_v35 = vrot.slane %v732_v32, %v740_v33 }
  0x28   : > { %789 = vmatprep.subr.bf16.mxu0 %v1107_v5  ;;  %819 = vmatprep.mubr.bf16.mxu0 %v1130_v11 }
  0x2b   : > { %790 = vmatpush1.bf16.msra.mxu0 %v1105_v6 }
  0x2c   : > { %791 = vmatprep.subr.bf16.mxu0 %v1110_v7 }
  0x2f   : > { %792 = vmatpush1.bf16.msra.mxu0 %v1108_v8 }
  0x30   : > { %793 = vmatprep.subr.bf16.mxu0 %v1113_v10 }
  0x33   : > { %794 = vmatpush1.bf16.msra.mxu0 %v1111_v9 }
  0xf9   : > { %v1030_v36 = vpop.f32.mrb[0].mxu0 }
  0xfa   : > { %v1031_v37 = vpop.f32.mrb[1].mxu0  ;;  %v664_v39 = vpop.f32.mrb[0].mxu1 }
  0xfb   : > { %v1032_v40 = vadd.f32 %v1031_v37, %v1030_v36  ;;  %v1033_v41 = vpop.f32.mrb[2].mxu0  ;;  %v1063_v42 = vpop.f32.mrb[1].mxu1 }
  0xfc   : > { %v1034_v43 = vpop.f32.mrb[3].mxu0  ;;  %v667_v44 = vpop.f32.mrb[2].mxu1 }
  0xfd   : > { %v624_v45 = vadd.f32 %v1032_v40, %v961_v38  ;;  %v1035_v46 = vadd.f32 %v1034_v43, %v1033_v41  ;;  %v1064_v47 = vpop.f32.mrb[3].mxu1 }
  0xff   : > { %v665_v49 = vadd.f32 %v664_v39, %v624_v45  ;;  %v627_v50 = vadd.f32 %v1035_v46, %v961_v38 }
 0x101   : > { %v673_v52 = vadd.f32 %v671_v48, %v665_v49  ;;  %v668_v53 = vadd.f32 %v667_v44, %v627_v50 }
 0x103   : > { %676 = vst.msk [vmem:[%s360_s13] sm:$0xff] %vm675_vm7, %v673_v52  ;;  %v674_v54 = vadd.f32 %v672_v51, %v668_v53  ;;  %v678_v55 = vsel %vm675_vm7, %v673_v52, 0.0 }
 0x104   : > { %679 = vadd.xlane.f32.xlu0 %v678_v55 }
 0x105   : > { %677 = vst.msk [vmem:[%s360_s13 + $0x8] sm:$0xff] %vm675_vm7, %v674_v54  ;;  %v681_v56 = vsel %vm675_vm7, %v674_v54, 0.0 }
 0x108   : > { %682 = vadd.xlane.f32.xlu0 %v681_v56 }
 0x191   : > { %v680_v57 = vpop.xlane.xlu0 %679 }
 0x192   : > { %v685_v58 = vmul.f32 0.015625, %v680_v57 }
 0x194   : > { %v687_v59 = vsub.f32 %v673_v52, %v685_v58 }
 0x195   : > { %v683_v60 = vpop.xlane.xlu0 %682 }
 0x196   : > { %v686_v61 = vmul.f32 0.015625, %v683_v60  ;;  %v689_v62 = vmul.f32 %v687_v59, %v687_v59 }
 0x198   : > { %v688_v63 = vsub.f32 %v674_v54, %v686_v61  ;;  %v691_v0 = vsel %vm675_vm7, %v689_v62, 0.0 }
 0x199   : > { %692 = vadd.xlane.f32.xlu1 %v691_v0 }
 0x19a   : > { %v690_v1 = vmul.f32 %v688_v63, %v688_v63 }
 0x19c   : > { %v694_v2 = vsel %vm675_vm7, %v690_v1, 0.0 }
 0x19d   : > { %695 = vadd.xlane.f32.xlu1 %v694_v2 }
 0x226   : > { %v693_v12 = vpop.xlane.xlu1 %692 }
 0x227   : > { %v697_v13 = vmul.f32 0.015625, %v693_v12 }
 0x229   : > { %v699_v14 = vadd.f32 1e-12, %v697_v13 }
 0x22a   : > { %v696_v15 = vpop.xlane.xlu1 %695 }
 0x22b   : > { %1115 = vrsqrt.f32 %v699_v14  ;;  %v698_v16 = vmul.f32 0.015625, %v696_v15 }
 0x22d   : > { %v700_v17 = vadd.f32 1e-12, %v698_v16 }
 0x22f   : > { %1117 = vrsqrt.f32 %v700_v17 }
 0x235   : > { %v1116_v18 = vpop.eup %1115 }
 0x236   : > { %v703_v19 = vmul.f32 %v1116_v18, %v687_v59 }
 0x238   : > { %v712_v22 = vmul.f32 %v993_v20, %v703_v19 }
 0x239   : > { %v1118_v21 = vpop.eup %1117 }
 0x23a   : > { %v704_v23 = vmul.f32 %v1118_v21, %v688_v63  ;;  %v721_v26 = vadd.f32 %v994_v24, %v712_v22 }
 0x23c   : > { %v713_v25 = vmul.f32 %v993_v20, %v704_v23 }
 0x23e   : > { %v722_v27 = vadd.f32 %v994_v24, %v713_v25 }
 0x240   : > { %v723_v28 = vpack.c.bf16 %v722_v27, %v721_v26 }
 0x242   : > { %1003 = vmatmul.mubr.msk.bf16.vlgmr.msra.gmra.mrb[4].mxu0 %vm675_vm7, %v723_v28 }
 0x315   : > { %v821_v36 = vpop.f32.mrb[4].mxu0 }
 0x316   : > { %v822_v37 = vadd.f32 %v821_v36, %v737_v34  ;;  %v823_v38 = vpop.f32.mrb[5].mxu0 }
 0x317   : > { %v824_v39 = vadd.f32 %v823_v38, %v741_v35  ;;  %v825_v40 = vpop.f32.mrb[6].mxu0 }
 0x318   : > { %v826_v41 = vadd.f32 %v825_v40, %v737_v34  ;;  %v827_v42 = vpop.f32.mrb[7].mxu0 }
 0x319   : > { %v1012_v43 = vpack.c.bf16 %v824_v39, %v822_v37  ;;  %v828_v44 = vadd.f32 %v827_v42, %v741_v35 }
 0x31b   : > { %845 = vst.msk [vmem:[%s365_s19] sm:$0xff] %vm844_vm10, %v1012_v43  ;;  %v1013_v45 = vpack.c.bf16 %v828_v44, %v826_v41 }
 0x31d   : > { %846 = vst.msk [vmem:[%s365_s19 + $0x8] sm:$0xff] %vm844_vm10, %v1013_v45 }
 0x31e PF: > { %s20_s30 = sadd.s32 1, %s1125_s30  }
 0x31f   : > { %p17_p4 = scmp.ge.s32.totalorder %s20_s30, 4  }
 0x321   :  { %19 = sbr.rel (!%p17_p4) target bundleno = 1 (0x1), region = 97 }

// kernel: text_encoder_forward.19
= control target key start
LH: loop header
LB: loop body
LE: loop exit
PB: predicated region body
PF: predicated region fallthrough
CT: control target
= control target key end

     0   :  { %s311_s0 = inlined_call_operand.vmem [shape: f32[32,128], index: 0, kind: input, shape index: {}]   ;;  %s312_s1 = inlined_call_operand.vmem [shape: bf16[128,64], index: 1, kind: input, shape index: {}]   ;;  %s313_s2 = inlined_call_operand.vmem [shape: f32[1,64], index: 2, kind: input, shape index: {}]   ;;  %s314_s3 = inlined_call_operand.hbm [shape: f32[32,64], index: 3, kind: output, shape index: {}]  }
   0x1   :  { %v205_v0 = vld [vmem:[%s312_s1] sm:$0xff]   ;;  %v206_v1 = vld [vmem:[%s312_s1 + $0x8] sm:$0xff]   ;;  %v207_v2 = vld [vmem:[%s312_s1 + $0x10] sm:$0xff]  }
   0x2   :  { %182 = vmatprep.subr.bf16.mxu0 %v205_v0  ;;  %v208_v3 = vld [vmem:[%s312_s1 + $0x18] sm:$0xff]   ;;  %v16_v4 = vld [vmem:[%s311_s0] sm:$0xff]  ;;  %v17_v5 = vld [vmem:[%s311_s0 + $0x8] sm:$0xff] }
   0x3   :  { %183 = vmatpush3.bf16.msra.mxu0 %v205_v0  ;;  %v20_v6 = vpack.c.bf16 %v17_v5, %v16_v4 }
   0x4   :  { %184 = vmatprep.subr.bf16.mxu0 %v206_v1 }
   0x7   :  { %185 = vmatpush3.bf16.msra.mxu0 %v206_v1 }
   0x8   :  { %186 = vmatprep.subr.bf16.mxu0 %v207_v2 }
   0x9   :  { %8 = vsyncpa [#allocation3], 0  ;;  %198 = vmatprep.mubr.bf16.mxu0 %v20_v6  ;;  %v209_v7 = vld [vmem:[%s312_s1 + $0x20] sm:$0xff]   ;;  %v210_v8 = vld [vmem:[%s312_s1 + $0x28] sm:$0xff]   ;;  %vm142_vm0 = vcmask 523264  }
   0xa   :  { %v211_v9 = vld [vmem:[%s312_s1 + $0x30] sm:$0xff]   ;;  %v212_v10 = vld [vmem:[%s312_s1 + $0x38] sm:$0xff]   ;;  %v163_v14 = vld [vmem:[%s313_s2] ss:$0 sm:$0xff]  ;;  %s237_s1 = smov [#allocation2]  }
   0xb   :  { %187 = vmatpush3.bf16.msra.mxu0 %v207_v2  ;;  %v18_v11 = vld [vmem:[%s311_s0 + $0x10] sm:$0xff]  ;;  %v19_v12 = vld [vmem:[%s311_s0 + $0x18] sm:$0xff]  ;;  %s152_s11 = sshll.u32 %s237_s1, 4  ;;  %s153_s11 = int_to_ptr.vmem [resolvable:$true] %s152_s11 }
   0xc   :  { %188 = vmatprep.subr.bf16.mxu0 %v208_v3  ;;  %v21_v13 = vpack.c.bf16 %v19_v12, %v18_v11  ;;  %s213_s0 = scalar_lea.vmem %s153_s11, 512  ;;  %p218_p1 = scmp.lt.s32.totalorder %s153_s11, %s153_s11 }
   0xd   :  { %p214_p0 = scmp.ne.s32.totalorder %s153_s11, %s213_s0  ;;  %p219_p2 = scmp.lt.s32.totalorder %s213_s0, %s213_s0 }
   0xf   :  { %189 = vmatpush3.bf16.msra.mxu0 %v208_v3  ;;  %p220_p3 = por %p219_p2, %p218_p1 }
  0x10   :  { %190 = vmatprep.subr.bf16.mxu0 %v209_v7 }
  0x11   :  { %p221_p4 = pnand %p220_p3, %p214_p0 }
  0x13   :  { %191 = vmatpush3.bf16.msra.mxu0 %v209_v7 }
  0x14   :  { %192 = vmatprep.subr.bf16.mxu0 %v210_v8 }
  0x17   :  { %193 = vmatpush3.bf16.msra.mxu0 %v210_v8 }
  0x18   :  { %194 = vmatprep.subr.bf16.mxu0 %v211_v9 }
  0x1b   :  { %195 = vmatpush3.bf16.msra.mxu0 %v211_v9 }
  0x1c   :  { %196 = vmatprep.subr.bf16.mxu0 %v212_v10 }
  0x1f   :  { %197 = vmatpush3.bf16.msra.mxu0 %v212_v10 }
  0x22   :  { %199 = vmatmul.mubr.bf16.vlgmr.msra.gmra.mrb[0].mxu0 %v21_v13 }
  0xf5   :  { %v200_v15 = vpop.f32.mrb[0].mxu0 }
  0xf6   :  { %v136_v16 = vadd.f32 %v200_v15, %v163_v14  ;;  %v127_v17 = vpop.f32.mrb[1].mxu0 }
  0xf7   :  { %v128_v18 = vadd.f32 %v163_v14, %v127_v17  ;;  %v201_v19 = vpop.f32.mrb[2].mxu0 }
  0xf8   :  { %145 = vst.msk [vmem:[#allocation2 + $0x10] sm:$0xff] %vm142_vm0, %v136_v16  ;;  %v139_v20 = vadd.f32 %v201_v19, %v163_v14  ;;  %v130_v21 = vpop.f32.mrb[3].mxu0 }
  0xf9   :  { %143 = vst.msk [vmem:[#allocation2] sm:$0xff] %vm142_vm0, %v128_v18  ;;  %v131_v22 = vadd.f32 %v163_v14, %v130_v21 }
  0xfa   :  { %146 = vst.msk [vmem:[#allocation2 + $0x18] sm:$0xff] %vm142_vm0, %v139_v20 }
  0xfb   :  { %144 = vst.msk [vmem:[#allocation2 + $0x8] sm:$0xff] %vm142_vm0, %v131_v22 }
  0xfc   :  { %224 = shalt.err (!%p221_p4)
}
  0xfd   :  { %s225_s13 = scalar_lea.hbm %s314_s3, 512 }
  0xfe   :  { %p226_p5 = scmp.ne.s32.totalorder %s314_s3, %s225_s13  ;;  %p229_p6 = scmp.lt.u32.totalorder %s225_s13, %s314_s3 }
 0x100   :  { %p231_p7 = pnand %p229_p6, %p226_p5 }
 0x102   :  { %234 = shalt.err (!%p231_p7)
}
 0x103   :  { %s238_s18 = smov 128   ;;  %s239_s19 = smov 8  }
 0x104   :  { %158 = dma.vmem_to_hbm [thread:$0]  %s153_s11, 512, %s314_s3, [#allocation3], %s238_s18, %s238_s18, %s239_s19  }
 0x105   :  { %235 = dma.done.wait [#allocation3], 512  }
 0x106   :  { %236 = vsyncadd [#allocation3], 4294966784 }
 0x107   :  { %162 = vsyncpa [#allocation3], 1 }

</bundles_post_ra>
